<compile_context>
chip_gen: v5e
topology: v5e:2x2
jax: 0.10.0
libtpu: 0.0.40
codegen_flags: <defaults>
</compile_context>

<pallas_src>
import math
import functools

import jax
import jax.numpy as jnp
from jax import lax
from jax.experimental import pallas as pl
from jax.experimental.pallas import tpu as pltpu

# ---- deterministic config (consistent with args.* of the module) ----
IMG_SIZE = 16          # args.img_size
PATCH = 4              # args.patch_size
IN_CH = 3
EMBED = 32             # args.df_dim
DEPTH = 2              # args.d_depth
HEADS = 4              # num_heads default
MLP_RATIO = 4.0
NUM_CLASSES = 1

P = (IMG_SIZE // PATCH) ** 2     # 16 patches
N = P + 1                        # 17 real tokens (patches + cls)
NPAD = 24                        # tokens padded to a sublane multiple of 8
HEAD_DIM = EMBED // HEADS        # 8
SCALE = HEAD_DIM ** -0.5         # qk_scale = head_dim ** -0.5
HIDDEN = int(EMBED * MLP_RATIO)  # 128
PATCH_DIM = IN_CH * PATCH * PATCH  # 48
LN_EPS = 1e-5                    # nn.LayerNorm default
OUT_LANES = 128                  # lane-dense padded head output
NEG_INF = -1e30                  # additive mask for padded / cross-image keys
BATCH_TILE = 8                   # max images per grid step (192 token rows)


# ------------------------- in-kernel math helpers -------------------------
def _erf(x):
    # TODO(synk): lax.erf may lack a Mosaic lowering; Abramowitz & Stegun 7.1.26
    # rational approximation (abs err < 1.5e-7 in f32) instead of exact torch.erf.
    a1, a2, a3, a4, a5 = 0.254829592, -0.284496736, 1.421413741, -1.453152027, 1.061405429
    pp = 0.3275911
    sgn = jnp.where(x >= 0.0, 1.0, -1.0)
    ax = jnp.abs(x)
    t = 1.0 / (1.0 + pp * ax)
    poly = ((((a5 * t + a4) * t + a3) * t + a2) * t + a1) * t
    return sgn * (1.0 - poly * jnp.exp(-ax * ax))


def _gelu(x):
    # x * 0.5 * (1 + erf(x / sqrt(2)))  -- matches the module's gelu()
    return x * 0.5 * (1.0 + _erf(x * (1.0 / math.sqrt(2.0))))


def _layer_norm(x, w, b):
    mu = jnp.mean(x, axis=-1, keepdims=True)
    xc = x - mu
    var = jnp.mean(xc * xc, axis=-1, keepdims=True)
    return xc * lax.rsqrt(var + LN_EPS) * w + b


def _softmax_lastdim(s):
    s = s - jnp.max(s, axis=-1, keepdims=True)
    e = jnp.exp(s)
    return e * pl.reciprocal(jnp.sum(e, axis=-1, keepdims=True), approx=True)


def _mha_full(q, k, v, bt, key_bias):
    """Full multi-head attention over all NPAD tokens of each image.

    q, k, v: (bt*NPAD, EMBED) with head columns packed (head, head_dim).
    Returns (bt*NPAD, EMBED) context, head chunks in (head, head_dim) order.
    """
    ctx = []
    for hh in range(HEADS):            # 4 static iterations; slices are static
        sl = slice(hh * HEAD_DIM, (hh + 1) * HEAD_DIM)
        qh = q[:, sl].reshape(bt, NPAD, HEAD_DIM)
        kh = k[:, sl].reshape(bt, NPAD, HEAD_DIM)
        vh = v[:, sl].reshape(bt, NPAD, HEAD_DIM)
        s = jnp.einsum('bqd,bkd->bqk', qh, kh,
                       preferred_element_type=jnp.float32) * SCALE + key_bias
        pa = _softmax_lastdim(s)
        c = jnp.einsum('bqk,bkd->bqd', pa, vh,
                       preferred_element_type=jnp.float32)
        ctx.append(c.reshape(bt * NPAD, HEAD_DIM))
    return jnp.concatenate(ctx, axis=-1)                      # (bt*NPAD, EMBED)


def _mha_cls(q_cls, k, v, cls_key_bias):
    """Attention for the bt cls queries only, formulated with pure 2-D matmuls.

    q_cls: (bt, EMBED); k, v: (bt*NPAD, EMBED).  Cross-image and padded keys are
    masked with NEG_INF so the result equals per-image attention exactly.
    """
    ctx = []
    for hh in range(HEADS):
        sl = slice(hh * HEAD_DIM, (hh + 1) * HEAD_DIM)
        s = jnp.einsum('qd,kd->qk', q_cls[:, sl], k[:, sl],
                       preferred_element_type=jnp.float32) * SCALE + cls_key_bias
        pa = _softmax_lastdim(s)                               # (bt, bt*NPAD)
        ctx.append(jnp.dot(pa, v[:, sl],
                           preferred_element_type=jnp.float32))  # (bt, HEAD_DIM)
    return jnp.concatenate(ctx, axis=-1)                       # (bt, EMBED)


# ------------------------------ fused Pallas kernel -----------------------------
def disc_fwd_kernel(patches_ref, convw_ref, base_ref,
                    ln1w_ref, ln1b_ref, qw_ref, kw_ref, vw_ref,
                    projw_ref, projb_ref, ln2w_ref, ln2b_ref,
                    fc1w_ref, fc1b_ref, fc2w_ref, fc2b_ref,
                    normw_ref, normb_ref, headw_ref, headb_ref,
                    out_ref, *, bt):
    BN = bt * NPAD

    # Patch embed (Conv2d k=stride=PATCH as im2col matmul).  conv bias + pos_embed
    # + cls token are pre-folded into the per-image (NPAD, E) base, broadcast here.
    x = jnp.dot(patches_ref[...], convw_ref[...], preferred_element_type=jnp.float32)
    x = (x.reshape(bt, NPAD, EMBED) + base_ref[...]).reshape(BN, EMBED)

    # Additive key mask for full attention: token index >= N inside each image is pad.
    kid = lax.broadcasted_iota(jnp.int32, (1, 1, NPAD), 2)
    key_bias = jnp.where(kid < N, 0.0, NEG_INF).astype(jnp.float32)   # (1,1,NPAD)

    # Row/column index machinery shared by the cls gather and the cls key mask.
    row = lax.broadcasted_iota(jnp.int32, (bt, BN), 0)
    col = lax.broadcasted_iota(jnp.int32, (bt, BN), 1)
    rel = col - row * NPAD                               # token idx of col within image `row`
    cls_sel = (rel == P).astype(jnp.float32)             # one-hot cls-row selector (bt, BN)
    cls_key_bias = jnp.where(jnp.logical_and(rel >= 0, rel < N),
                             0.0, NEG_INF).astype(jnp.float32)        # (bt, BN)

    # ---- full transformer blocks (all but the last) ----
    for l in range(DEPTH - 1):
        h = _layer_norm(x, ln1w_ref[l], ln1b_ref[l])                  # (BN, E)
        q = jnp.dot(h, qw_ref[l], preferred_element_type=jnp.float32)  # full-width QKV
        k = jnp.dot(h, kw_ref[l], preferred_element_type=jnp.float32)
        v = jnp.dot(h, vw_ref[l], preferred_element_type=jnp.float32)
        ctx = _mha_full(q, k, v, bt, key_bias)                        # (BN, E)
        x = x + jnp.dot(ctx, projw_ref[l],
                        preferred_element_type=jnp.float32) + projb_ref[l]
        h2 = _layer_norm(x, ln2w_ref[l], ln2b_ref[l])
        m = jnp.dot(h2, fc1w_ref[l], preferred_element_type=jnp.float32) + fc1b_ref[l]
        m = _gelu(m)
        m = jnp.dot(m, fc2w_ref[l], preferred_element_type=jnp.float32) + fc2b_ref[l]
        x = x + m

    # ---- last block specialized to the cls rows (the only rows the head reads) ----
    l = DEPTH - 1
    h = _layer_norm(x, ln1w_ref[l], ln1b_ref[l])                      # all rows (keys/values)
    k = jnp.dot(h, kw_ref[l], preferred_element_type=jnp.float32)      # (BN, E)
    v = jnp.dot(h, vw_ref[l], preferred_element_type=jnp.float32)
    x_cls = jnp.dot(cls_sel, x, preferred_element_type=jnp.float32)    # (bt, E) MXU gather
    h_cls = _layer_norm(x_cls, ln1w_ref[l], ln1b_ref[l])
    q_cls = jnp.dot(h_cls, qw_ref[l], preferred_element_type=jnp.float32)
    ctx = _mha_cls(q_cls, k, v, cls_key_bias)                          # (bt, E)
    x_cls = x_cls + jnp.dot(ctx, projw_ref[l],
                            preferred_element_type=jnp.float32) + projb_ref[l]
    h2 = _layer_norm(x_cls, ln2w_ref[l], ln2b_ref[l])
    m = jnp.dot(h2, fc1w_ref[l], preferred_element_type=jnp.float32) + fc1b_ref[l]
    m = _gelu(m)
    m = jnp.dot(m, fc2w_ref[l], preferred_element_type=jnp.float32) + fc2b_ref[l]
    x_cls = x_cls + m

    # ---- final norm + lane-dense head on the cls rows ----
    cls = _layer_norm(x_cls, normw_ref[...], normb_ref[...])
    out_ref[...] = jnp.dot(cls, headw_ref[...],
                           preferred_element_type=jnp.float32) + headb_ref[...]


# ------------------------------ JAX-side glue ------------------------------
def _full_spec(shape):
    nd = len(shape)
    return pl.BlockSpec(shape, lambda i: (0,) * nd)   # resident across grid steps


def discriminator_forward(x, p):
    """x: (B, 3, IMG_SIZE, IMG_SIZE) NCHW float32 -> (B, NUM_CLASSES) logits."""
    # TODO(synk): DiffAugment skipped (args.diff_aug == 'None' branch); dropouts are
    # rate 0.0 (identity), drop_path 0.0 (identity), is_mask == 0 so the epoch-
    # dependent attention masks never apply.
    # TODO(synk): optionally cast patches/weights to bf16 for v6e/v7x MXU throughput;
    # kept f32 here for parity with the torch reference.
    B = x.shape[0]
    bt = min(B, BATCH_TILE)
    n_tiles = (B + bt - 1) // bt
    Bp = n_tiles * bt
    hp = IMG_SIZE // PATCH

    # Non-overlapping patch extraction == Conv2d(k=stride=PATCH) im2col, zero-padded
    # to NPAD token rows per image and to a whole number of batch tiles.
    patches = x.reshape(B, IN_CH, hp, PATCH, hp, PATCH)
    patches = patches.transpose(0, 2, 4, 1, 3, 5).reshape(B, P, PATCH_DIM)
    patches = jnp.pad(patches, ((0, Bp - B), (0, NPAD - P), (0, 0)))
    patches = patches.reshape(Bp * NPAD, PATCH_DIM).astype(jnp.float32)

    conv_w = p["conv_w"].reshape(EMBED, PATCH_DIM).T                   # (PATCH_DIM, E)

    # Token layout per image: rows 0..P-1 = patches, row P = cls, rows P+1.. = pad.
    # conv bias + (permuted) pos_embed + cls token folded into one (NPAD, E) base.
    pos = p["pos_embed"][0]                                            # (N, E)
    base = jnp.zeros((NPAD, EMBED), jnp.float32)
    base = base.at[:P, :].set(pos[1:, :] + p["conv_b"][None, :])
    base = base.at[P, :].set(pos[0, :] + p["cls_token"][0, 0, :])

    # Lane-dense (128-wide) head: real logits live in the first NUM_CLASSES lanes.
    head_w = jnp.zeros((EMBED, OUT_LANES), jnp.float32).at[:, :NUM_CLASSES].set(p["head_w"])
    head_b = jnp.zeros((1, OUT_LANES), jnp.float32).at[:, :NUM_CLASSES].set(p["head_b"])

    weights = (conv_w, base,
               p["ln1_w"], p["ln1_b"], p["q_w"], p["k_w"], p["v_w"],
               p["proj_w"], p["proj_b"], p["ln2_w"], p["ln2_b"],
               p["fc1_w"], p["fc1_b"], p["fc2_w"], p["fc2_b"],
               p["norm_w"], p["norm_b"], head_w, head_b)

    # Advisory cost estimate so XLA schedules around the custom call sensibly.
    flops_img = (2 * NPAD * PATCH_DIM * EMBED
                 + 8 * NPAD * EMBED * EMBED + 4 * HEADS * NPAD * NPAD * HEAD_DIM
                 + 4 * NPAD * EMBED * HIDDEN
                 + 4 * NPAD * EMBED * EMBED + 4 * EMBED * EMBED
                 + 4 * HEADS * NPAD * HEAD_DIM + 4 * EMBED * HIDDEN
                 + 2 * EMBED * OUT_LANES)
    weight_bytes = 4 * sum(int(w.size) for w in weights)
    cost = pl.CostEstimate(
        flops=int(Bp * flops_img),
        transcendentals=int(Bp * (HEADS * NPAD * (NPAD + 1) + (NPAD + 1) * HIDDEN)),
        bytes_accessed=int(4 * (patches.size + Bp * OUT_LANES) + weight_bytes))

    out = pl.pallas_call(
        functools.partial(disc_fwd_kernel, bt=bt),
        out_shape=jax.ShapeDtypeStruct((Bp, OUT_LANES), jnp.float32),
        grid=(n_tiles,),
        in_specs=[pl.BlockSpec((bt * NPAD, PATCH_DIM), lambda i: (i, 0))]
                 + [_full_spec(w.shape) for w in weights],
        out_specs=pl.BlockSpec((bt, OUT_LANES), lambda i: (i, 0)),
        compiler_params=pltpu.CompilerParams(
            dimension_semantics=("parallel",)),     # batch tiles split across TCs on v7x
        cost_estimate=cost,
    )(patches, *weights)
    return out[:B, :NUM_CLASSES]


def init_params(key):
    ks = jax.random.split(key, 10)

    def nrm(k, shape):
        return (0.02 * jax.random.normal(k, shape)).astype(jnp.float32)

    return dict(
        conv_w=nrm(ks[0], (EMBED, IN_CH, PATCH, PATCH)),
        conv_b=jnp.zeros((EMBED,), jnp.float32),
        cls_token=nrm(ks[1], (1, 1, EMBED)),
        pos_embed=nrm(ks[2], (1, N, EMBED)),
        ln1_w=jnp.ones((DEPTH, 1, EMBED), jnp.float32),
        ln1_b=jnp.zeros((DEPTH, 1, EMBED), jnp.float32),
        # qkv Linear (bias=False) split into q/k/v in "x @ W" orientation,
        # output columns ordered (head, head_dim) like the PyTorch reshape.
        q_w=nrm(ks[3], (DEPTH, EMBED, EMBED)),
        k_w=nrm(ks[4], (DEPTH, EMBED, EMBED)),
        v_w=nrm(ks[5], (DEPTH, EMBED, EMBED)),
        # proj Linear in "x @ W" orientation, input rows ordered (head, head_dim).
        proj_w=nrm(ks[6], (DEPTH, EMBED, EMBED)),
        proj_b=jnp.zeros((DEPTH, 1, EMBED), jnp.float32),
        ln2_w=jnp.ones((DEPTH, 1, EMBED), jnp.float32),
        ln2_b=jnp.zeros((DEPTH, 1, EMBED), jnp.float32),
        fc1_w=nrm(ks[7], (DEPTH, EMBED, HIDDEN)),
        fc1_b=jnp.zeros((DEPTH, 1, HIDDEN), jnp.float32),
        fc2_w=nrm(ks[8], (DEPTH, HIDDEN, EMBED)),
        fc2_b=jnp.zeros((DEPTH, 1, EMBED), jnp.float32),
        norm_w=jnp.ones((1, EMBED), jnp.float32),
        norm_b=jnp.zeros((1, EMBED), jnp.float32),
        head_w=nrm(ks[9], (EMBED, NUM_CLASSES)),
        head_b=jnp.zeros((1, NUM_CLASSES), jnp.float32),
    )


if __name__ == "__main__":
    key = jax.random.PRNGKey(0)
    kx, kp = jax.random.split(key)
    x = jax.random.normal(kx, (2, IN_CH, IMG_SIZE, IMG_SIZE), jnp.float32)
    params = init_params(kp)

    fwd = jax.jit(discriminator_forward)
    out = jax.block_until_ready(fwd(x, params))
    assert out.shape == (2, NUM_CLASSES), out.shape
    assert bool(jnp.all(jnp.isfinite(out)))
    print("KERNEL_OK")
</pallas_src>

<mosaic_0001>
module attributes {stable_mosaic.version = 11 : i64} {
  func.func @disc_fwd_kernel(%arg0: i32, %arg1: memref<48x48xf32, #tpu.memory_space<vmem>>, %arg2: memref<48x32xf32, #tpu.memory_space<vmem>>, %arg3: memref<24x32xf32, #tpu.memory_space<vmem>>, %arg4: memref<2x1x32xf32, #tpu.memory_space<vmem>>, %arg5: memref<2x1x32xf32, #tpu.memory_space<vmem>>, %arg6: memref<2x32x32xf32, #tpu.memory_space<vmem>>, %arg7: memref<2x32x32xf32, #tpu.memory_space<vmem>>, %arg8: memref<2x32x32xf32, #tpu.memory_space<vmem>>, %arg9: memref<2x32x32xf32, #tpu.memory_space<vmem>>, %arg10: memref<2x1x32xf32, #tpu.memory_space<vmem>>, %arg11: memref<2x1x32xf32, #tpu.memory_space<vmem>>, %arg12: memref<2x1x32xf32, #tpu.memory_space<vmem>>, %arg13: memref<2x32x128xf32, #tpu.memory_space<vmem>>, %arg14: memref<2x1x128xf32, #tpu.memory_space<vmem>>, %arg15: memref<2x128x32xf32, #tpu.memory_space<vmem>>, %arg16: memref<2x1x32xf32, #tpu.memory_space<vmem>>, %arg17: memref<1x32xf32, #tpu.memory_space<vmem>>, %arg18: memref<1x32xf32, #tpu.memory_space<vmem>>, %arg19: memref<32x128xf32, #tpu.memory_space<vmem>>, %arg20: memref<1x128xf32, #tpu.memory_space<vmem>>, %arg21: memref<2x128xf32, #tpu.memory_space<vmem>>) attributes {dimension_semantics = [#tpu.dimension_semantics<parallel>], iteration_bounds = array<i64: 1>, scalar_prefetch = 0 : i64, scratch_operands = 0 : i64, tpu.core_type = #tpu.core_type<tc>, window_params = [{transform_indices = @transform_0, window_bounds = array<i64: 48, 48>}, {pipeline_mode = #tpu.pipeline_mode<synchronous>, transform_indices = @transform_1, window_bounds = array<i64: 48, 32>}, {pipeline_mode = #tpu.pipeline_mode<synchronous>, transform_indices = @transform_2, window_bounds = array<i64: 24, 32>}, {pipeline_mode = #tpu.pipeline_mode<synchronous>, transform_indices = @transform_3, window_bounds = array<i64: 2, 1, 32>}, {pipeline_mode = #tpu.pipeline_mode<synchronous>, transform_indices = @transform_4, window_bounds = array<i64: 2, 1, 32>}, {pipeline_mode = #tpu.pipeline_mode<synchronous>, transform_indices = @transform_5, window_bounds = array<i64: 2, 32, 32>}, {pipeline_mode = #tpu.pipeline_mode<synchronous>, transform_indices = @transform_6, window_bounds = array<i64: 2, 32, 32>}, {pipeline_mode = #tpu.pipeline_mode<synchronous>, transform_indices = @transform_7, window_bounds = array<i64: 2, 32, 32>}, {pipeline_mode = #tpu.pipeline_mode<synchronous>, transform_indices = @transform_8, window_bounds = array<i64: 2, 32, 32>}, {pipeline_mode = #tpu.pipeline_mode<synchronous>, transform_indices = @transform_9, window_bounds = array<i64: 2, 1, 32>}, {pipeline_mode = #tpu.pipeline_mode<synchronous>, transform_indices = @transform_10, window_bounds = array<i64: 2, 1, 32>}, {pipeline_mode = #tpu.pipeline_mode<synchronous>, transform_indices = @transform_11, window_bounds = array<i64: 2, 1, 32>}, {pipeline_mode = #tpu.pipeline_mode<synchronous>, transform_indices = @transform_12, window_bounds = array<i64: 2, 32, 128>}, {pipeline_mode = #tpu.pipeline_mode<synchronous>, transform_indices = @transform_13, window_bounds = array<i64: 2, 1, 128>}, {pipeline_mode = #tpu.pipeline_mode<synchronous>, transform_indices = @transform_14, window_bounds = array<i64: 2, 128, 32>}, {pipeline_mode = #tpu.pipeline_mode<synchronous>, transform_indices = @transform_15, window_bounds = array<i64: 2, 1, 32>}, {pipeline_mode = #tpu.pipeline_mode<synchronous>, transform_indices = @transform_16, window_bounds = array<i64: 1, 32>}, {pipeline_mode = #tpu.pipeline_mode<synchronous>, transform_indices = @transform_17, window_bounds = array<i64: 1, 32>}, {pipeline_mode = #tpu.pipeline_mode<synchronous>, transform_indices = @transform_18, window_bounds = array<i64: 32, 128>}, {pipeline_mode = #tpu.pipeline_mode<synchronous>, transform_indices = @transform_19, window_bounds = array<i64: 1, 128>}, {transform_indices = @transform_20, window_bounds = array<i64: 2, 128>}]} {
    %c0 = arith.constant 0 : index
    %c0_0 = arith.constant 0 : index
    %0 = vector.load %arg1[%c0, %c0_0] : memref<48x48xf32, #tpu.memory_space<vmem>>, vector<48x48xf32>
    %c0_1 = arith.constant 0 : index
    %c0_2 = arith.constant 0 : index
    %1 = vector.load %arg2[%c0_1, %c0_2] : memref<48x32xf32, #tpu.memory_space<vmem>>, vector<48x32xf32>
    %cst = arith.constant dense<0.000000e+00> : vector<48x32xf32>
    %2 = tpu.matmul %0, %1, %cst {dimension_numbers = #tpu.dot_dimension_numbers<[1], [0], [0], [1], [0, 0, 1, 1], [], []>} : vector<48x48xf32>, vector<48x32xf32>, vector<48x32xf32> -> vector<48x32xf32>
    %3 = vector.shape_cast %2 : vector<48x32xf32> to vector<2x24x32xf32>
    %c0_3 = arith.constant 0 : index
    %c0_4 = arith.constant 0 : index
    %4 = vector.load %arg3[%c0_3, %c0_4] : memref<24x32xf32, #tpu.memory_space<vmem>>, vector<24x32xf32>
    %5 = vector.shape_cast %4 : vector<24x32xf32> to vector<1x24x32xf32>
    %6 = vector.broadcast %5 : vector<1x24x32xf32> to vector<2x24x32xf32>
    %7 = arith.addf %3, %6 : vector<2x24x32xf32>
    %8 = vector.shape_cast %7 : vector<2x24x32xf32> to vector<48x32xf32>
    %9 = tpu.iota {dimensions = array<i32: 2>} : vector<1x1x24xi32>
    %c17_i32 = arith.constant 17 : i32
    %10 = vector.broadcast %c17_i32 : i32 to vector<1x1x24xi32>
    %11 = arith.cmpi slt, %9, %10 : vector<1x1x24xi32>
    %cst_5 = arith.constant 0.000000e+00 : f32
    %cst_6 = arith.constant -1.000000e+30 : f32
    %12 = vector.broadcast %cst_5 : f32 to vector<1x1x24xf32>
    %13 = vector.broadcast %cst_6 : f32 to vector<1x1x24xf32>
    %14 = arith.select %11, %12, %13 : vector<1x1x24xi1>, vector<1x1x24xf32>
    %15 = tpu.iota {dimensions = array<i32: 0>} : vector<2x48xi32>
    %16 = tpu.iota {dimensions = array<i32: 1>} : vector<2x48xi32>
    %c24_i32 = arith.constant 24 : i32
    %17 = vector.broadcast %c24_i32 : i32 to vector<2x48xi32>
    %18 = arith.muli %15, %17 : vector<2x48xi32>
    %19 = arith.subi %16, %18 : vector<2x48xi32>
    %c16_i32 = arith.constant 16 : i32
    %20 = vector.broadcast %c16_i32 : i32 to vector<2x48xi32>
    %21 = arith.cmpi eq, %19, %20 : vector<2x48xi32>
    %22 = arith.extui %21 : vector<2x48xi1> to vector<2x48xi32>
    %23 = arith.sitofp %22 : vector<2x48xi32> to vector<2x48xf32>
    %c0_i32 = arith.constant 0 : i32
    %24 = vector.broadcast %c0_i32 : i32 to vector<2x48xi32>
    %25 = arith.cmpi sge, %19, %24 : vector<2x48xi32>
    %c17_i32_7 = arith.constant 17 : i32
    %26 = vector.broadcast %c17_i32_7 : i32 to vector<2x48xi32>
    %27 = arith.cmpi slt, %19, %26 : vector<2x48xi32>
    %28 = arith.andi %25, %27 : vector<2x48xi1>
    %cst_8 = arith.constant 0.000000e+00 : f32
    %cst_9 = arith.constant -1.000000e+30 : f32
    %29 = vector.broadcast %cst_8 : f32 to vector<2x48xf32>
    %30 = vector.broadcast %cst_9 : f32 to vector<2x48xf32>
    %31 = arith.select %28, %29, %30 : vector<2x48xi1>, vector<2x48xf32>
    %c0_10 = arith.constant 0 : index
    %c0_11 = arith.constant 0 : index
    %c0_12 = arith.constant 0 : index
    %32 = vector.load %arg4[%c0_10, %c0_11, %c0_12] : memref<2x1x32xf32, #tpu.memory_space<vmem>>, vector<1x1x32xf32>
    %33 = vector.shape_cast %32 : vector<1x1x32xf32> to vector<1x32xf32>
    %c0_13 = arith.constant 0 : index
    %c0_14 = arith.constant 0 : index
    %c0_15 = arith.constant 0 : index
    %34 = vector.load %arg5[%c0_13, %c0_14, %c0_15] : memref<2x1x32xf32, #tpu.memory_space<vmem>>, vector<1x1x32xf32>
    %35 = vector.shape_cast %34 : vector<1x1x32xf32> to vector<1x32xf32>
    %cst_16 = arith.constant dense<0.000000e+00> : vector<48xf32>
    %36 = vector.multi_reduction <add>, %8, %cst_16 [1] : vector<48x32xf32> to vector<48xf32>
    %37 = vector.shape_cast %36 : vector<48xf32> to vector<48x1xf32>
    %cst_17 = arith.constant 3.200000e+01 : f32
    %38 = vector.broadcast %cst_17 : f32 to vector<48x1xf32>
    %39 = arith.divf %37, %38 : vector<48x1xf32>
    %40 = vector.broadcast %39 : vector<48x1xf32> to vector<48x32xf32>
    %41 = arith.subf %8, %40 : vector<48x32xf32>
    %42 = arith.mulf %41, %41 : vector<48x32xf32>
    %cst_18 = arith.constant dense<0.000000e+00> : vector<48xf32>
    %43 = vector.multi_reduction <add>, %42, %cst_18 [1] : vector<48x32xf32> to vector<48xf32>
    %44 = vector.shape_cast %43 : vector<48xf32> to vector<48x1xf32>
    %cst_19 = arith.constant 3.200000e+01 : f32
    %45 = vector.broadcast %cst_19 : f32 to vector<48x1xf32>
    %46 = arith.divf %44, %45 : vector<48x1xf32>
    %cst_20 = arith.constant 9.99999974E-6 : f32
    %47 = vector.broadcast %cst_20 : f32 to vector<48x1xf32>
    %48 = arith.addf %46, %47 : vector<48x1xf32>
    %49 = math.rsqrt %48 : vector<48x1xf32>
    %50 = vector.broadcast %49 : vector<48x1xf32> to vector<48x32xf32>
    %51 = arith.mulf %41, %50 : vector<48x32xf32>
    %52 = vector.broadcast %33 : vector<1x32xf32> to vector<48x32xf32>
    %53 = arith.mulf %51, %52 : vector<48x32xf32>
    %54 = vector.broadcast %35 : vector<1x32xf32> to vector<48x32xf32>
    %55 = arith.addf %53, %54 : vector<48x32xf32>
    %c0_21 = arith.constant 0 : index
    %c0_22 = arith.constant 0 : index
    %c0_23 = arith.constant 0 : index
    %56 = vector.load %arg6[%c0_21, %c0_22, %c0_23] : memref<2x32x32xf32, #tpu.memory_space<vmem>>, vector<1x32x32xf32>
    %57 = vector.shape_cast %56 : vector<1x32x32xf32> to vector<32x32xf32>
    %cst_24 = arith.constant dense<0.000000e+00> : vector<48x32xf32>
    %58 = tpu.matmul %55, %57, %cst_24 {dimension_numbers = #tpu.dot_dimension_numbers<[1], [0], [0], [1], [0, 0, 1, 1], [], []>} : vector<48x32xf32>, vector<32x32xf32>, vector<48x32xf32> -> vector<48x32xf32>
    %c0_25 = arith.constant 0 : index
    %c0_26 = arith.constant 0 : index
    %c0_27 = arith.constant 0 : index
    %59 = vector.load %arg7[%c0_25, %c0_26, %c0_27] : memref<2x32x32xf32, #tpu.memory_space<vmem>>, vector<1x32x32xf32>
    %60 = vector.shape_cast %59 : vector<1x32x32xf32> to vector<32x32xf32>
    %cst_28 = arith.constant dense<0.000000e+00> : vector<48x32xf32>
    %61 = tpu.matmul %55, %60, %cst_28 {dimension_numbers = #tpu.dot_dimension_numbers<[1], [0], [0], [1], [0, 0, 1, 1], [], []>} : vector<48x32xf32>, vector<32x32xf32>, vector<48x32xf32> -> vector<48x32xf32>
    %c0_29 = arith.constant 0 : index
    %c0_30 = arith.constant 0 : index
    %c0_31 = arith.constant 0 : index
    %62 = vector.load %arg8[%c0_29, %c0_30, %c0_31] : memref<2x32x32xf32, #tpu.memory_space<vmem>>, vector<1x32x32xf32>
    %63 = vector.shape_cast %62 : vector<1x32x32xf32> to vector<32x32xf32>
    %cst_32 = arith.constant dense<0.000000e+00> : vector<48x32xf32>
    %64 = tpu.matmul %55, %63, %cst_32 {dimension_numbers = #tpu.dot_dimension_numbers<[1], [0], [0], [1], [0, 0, 1, 1], [], []>} : vector<48x32xf32>, vector<32x32xf32>, vector<48x32xf32> -> vector<48x32xf32>
    %65 = vector.extract_strided_slice %58 {offsets = [0, 0], sizes = [48, 8], strides = [1, 1]} : vector<48x32xf32> to vector<48x8xf32>
    %66 = vector.shape_cast %65 : vector<48x8xf32> to vector<2x24x8xf32>
    %67 = vector.extract_strided_slice %61 {offsets = [0, 0], sizes = [48, 8], strides = [1, 1]} : vector<48x32xf32> to vector<48x8xf32>
    %68 = vector.shape_cast %67 : vector<48x8xf32> to vector<2x24x8xf32>
    %69 = vector.extract_strided_slice %64 {offsets = [0, 0], sizes = [48, 8], strides = [1, 1]} : vector<48x32xf32> to vector<48x8xf32>
    %70 = vector.shape_cast %69 : vector<48x8xf32> to vector<2x24x8xf32>
    "tpu.trace_start"() <{level = 10 : i32, message = "bqd,bkd->bqk"}> : () -> ()
    %cst_33 = arith.constant dense<0.000000e+00> : vector<2x24x24xf32>
    %71 = tpu.matmul %66, %68, %cst_33 {dimension_numbers = #tpu.dot_dimension_numbers<[2], [2], [1], [1], [0, 0, 0, 1, 1, 1], [0], [0]>} : vector<2x24x8xf32>, vector<2x24x8xf32>, vector<2x24x24xf32> -> vector<2x24x24xf32>
    "tpu.trace_stop"() : () -> ()
    %cst_34 = arith.constant 0.353553385 : f32
    %72 = vector.broadcast %cst_34 : f32 to vector<2x24x24xf32>
    %73 = arith.mulf %71, %72 : vector<2x24x24xf32>
    %74 = vector.broadcast %14 : vector<1x1x24xf32> to vector<2x24x24xf32>
    %75 = arith.addf %73, %74 : vector<2x24x24xf32>
    %cst_35 = arith.constant dense<0xFF800000> : vector<2x24xf32>
    %76 = vector.multi_reduction <maximumf>, %75, %cst_35 [2] : vector<2x24x24xf32> to vector<2x24xf32>
    %77 = vector.shape_cast %76 : vector<2x24xf32> to vector<2x24x1xf32>
    %78 = vector.broadcast %77 : vector<2x24x1xf32> to vector<2x24x24xf32>
    %79 = arith.subf %75, %78 : vector<2x24x24xf32>
    %80 = math.exp %79 : vector<2x24x24xf32>
    %cst_36 = arith.constant dense<0.000000e+00> : vector<2x24xf32>
    %81 = vector.multi_reduction <add>, %80, %cst_36 [2] : vector<2x24x24xf32> to vector<2x24xf32>
    %82 = vector.shape_cast %81 : vector<2x24xf32> to vector<2x24x1xf32>
    %83 = tpu.reciprocal %82 {approx = true} : vector<2x24x1xf32> -> vector<2x24x1xf32>
    %84 = vector.broadcast %83 : vector<2x24x1xf32> to vector<2x24x24xf32>
    %85 = arith.mulf %80, %84 : vector<2x24x24xf32>
    "tpu.trace_start"() <{level = 10 : i32, message = "bqk,bkd->bqd"}> : () -> ()
    %cst_37 = arith.constant dense<0.000000e+00> : vector<2x24x8xf32>
    %86 = tpu.matmul %85, %70, %cst_37 {dimension_numbers = #tpu.dot_dimension_numbers<[2], [1], [1], [2], [0, 0, 0, 1, 1, 2], [0], [0]>} : vector<2x24x24xf32>, vector<2x24x8xf32>, vector<2x24x8xf32> -> vector<2x24x8xf32>
    "tpu.trace_stop"() : () -> ()
    %87 = vector.shape_cast %86 : vector<2x24x8xf32> to vector<48x8xf32>
    %88 = vector.extract_strided_slice %58 {offsets = [0, 8], sizes = [48, 8], strides = [1, 1]} : vector<48x32xf32> to vector<48x8xf32>
    %89 = vector.shape_cast %88 : vector<48x8xf32> to vector<2x24x8xf32>
    %90 = vector.extract_strided_slice %61 {offsets = [0, 8], sizes = [48, 8], strides = [1, 1]} : vector<48x32xf32> to vector<48x8xf32>
    %91 = vector.shape_cast %90 : vector<48x8xf32> to vector<2x24x8xf32>
    %92 = vector.extract_strided_slice %64 {offsets = [0, 8], sizes = [48, 8], strides = [1, 1]} : vector<48x32xf32> to vector<48x8xf32>
    %93 = vector.shape_cast %92 : vector<48x8xf32> to vector<2x24x8xf32>
    "tpu.trace_start"() <{level = 10 : i32, message = "bqd,bkd->bqk"}> : () -> ()
    %cst_38 = arith.constant dense<0.000000e+00> : vector<2x24x24xf32>
    %94 = tpu.matmul %89, %91, %cst_38 {dimension_numbers = #tpu.dot_dimension_numbers<[2], [2], [1], [1], [0, 0, 0, 1, 1, 1], [0], [0]>} : vector<2x24x8xf32>, vector<2x24x8xf32>, vector<2x24x24xf32> -> vector<2x24x24xf32>
    "tpu.trace_stop"() : () -> ()
    %cst_39 = arith.constant 0.353553385 : f32
    %95 = vector.broadcast %cst_39 : f32 to vector<2x24x24xf32>
    %96 = arith.mulf %94, %95 : vector<2x24x24xf32>
    %97 = vector.broadcast %14 : vector<1x1x24xf32> to vector<2x24x24xf32>
    %98 = arith.addf %96, %97 : vector<2x24x24xf32>
    %cst_40 = arith.constant dense<0xFF800000> : vector<2x24xf32>
    %99 = vector.multi_reduction <maximumf>, %98, %cst_40 [2] : vector<2x24x24xf32> to vector<2x24xf32>
    %100 = vector.shape_cast %99 : vector<2x24xf32> to vector<2x24x1xf32>
    %101 = vector.broadcast %100 : vector<2x24x1xf32> to vector<2x24x24xf32>
    %102 = arith.subf %98, %101 : vector<2x24x24xf32>
    %103 = math.exp %102 : vector<2x24x24xf32>
    %cst_41 = arith.constant dense<0.000000e+00> : vector<2x24xf32>
    %104 = vector.multi_reduction <add>, %103, %cst_41 [2] : vector<2x24x24xf32> to vector<2x24xf32>
    %105 = vector.shape_cast %104 : vector<2x24xf32> to vector<2x24x1xf32>
    %106 = tpu.reciprocal %105 {approx = true} : vector<2x24x1xf32> -> vector<2x24x1xf32>
    %107 = vector.broadcast %106 : vector<2x24x1xf32> to vector<2x24x24xf32>
    %108 = arith.mulf %103, %107 : vector<2x24x24xf32>
    "tpu.trace_start"() <{level = 10 : i32, message = "bqk,bkd->bqd"}> : () -> ()
    %cst_42 = arith.constant dense<0.000000e+00> : vector<2x24x8xf32>
    %109 = tpu.matmul %108, %93, %cst_42 {dimension_numbers = #tpu.dot_dimension_numbers<[2], [1], [1], [2], [0, 0, 0, 1, 1, 2], [0], [0]>} : vector<2x24x24xf32>, vector<2x24x8xf32>, vector<2x24x8xf32> -> vector<2x24x8xf32>
    "tpu.trace_stop"() : () -> ()
    %110 = vector.shape_cast %109 : vector<2x24x8xf32> to vector<48x8xf32>
    %111 = vector.extract_strided_slice %58 {offsets = [0, 16], sizes = [48, 8], strides = [1, 1]} : vector<48x32xf32> to vector<48x8xf32>
    %112 = vector.shape_cast %111 : vector<48x8xf32> to vector<2x24x8xf32>
    %113 = vector.extract_strided_slice %61 {offsets = [0, 16], sizes = [48, 8], strides = [1, 1]} : vector<48x32xf32> to vector<48x8xf32>
    %114 = vector.shape_cast %113 : vector<48x8xf32> to vector<2x24x8xf32>
    %115 = vector.extract_strided_slice %64 {offsets = [0, 16], sizes = [48, 8], strides = [1, 1]} : vector<48x32xf32> to vector<48x8xf32>
    %116 = vector.shape_cast %115 : vector<48x8xf32> to vector<2x24x8xf32>
    "tpu.trace_start"() <{level = 10 : i32, message = "bqd,bkd->bqk"}> : () -> ()
    %cst_43 = arith.constant dense<0.000000e+00> : vector<2x24x24xf32>
    %117 = tpu.matmul %112, %114, %cst_43 {dimension_numbers = #tpu.dot_dimension_numbers<[2], [2], [1], [1], [0, 0, 0, 1, 1, 1], [0], [0]>} : vector<2x24x8xf32>, vector<2x24x8xf32>, vector<2x24x24xf32> -> vector<2x24x24xf32>
    "tpu.trace_stop"() : () -> ()
    %cst_44 = arith.constant 0.353553385 : f32
    %118 = vector.broadcast %cst_44 : f32 to vector<2x24x24xf32>
    %119 = arith.mulf %117, %118 : vector<2x24x24xf32>
    %120 = vector.broadcast %14 : vector<1x1x24xf32> to vector<2x24x24xf32>
    %121 = arith.addf %119, %120 : vector<2x24x24xf32>
    %cst_45 = arith.constant dense<0xFF800000> : vector<2x24xf32>
    %122 = vector.multi_reduction <maximumf>, %121, %cst_45 [2] : vector<2x24x24xf32> to vector<2x24xf32>
    %123 = vector.shape_cast %122 : vector<2x24xf32> to vector<2x24x1xf32>
    %124 = vector.broadcast %123 : vector<2x24x1xf32> to vector<2x24x24xf32>
    %125 = arith.subf %121, %124 : vector<2x24x24xf32>
    %126 = math.exp %125 : vector<2x24x24xf32>
    %cst_46 = arith.constant dense<0.000000e+00> : vector<2x24xf32>
    %127 = vector.multi_reduction <add>, %126, %cst_46 [2] : vector<2x24x24xf32> to vector<2x24xf32>
    %128 = vector.shape_cast %127 : vector<2x24xf32> to vector<2x24x1xf32>
    %129 = tpu.reciprocal %128 {approx = true} : vector<2x24x1xf32> -> vector<2x24x1xf32>
    %130 = vector.broadcast %129 : vector<2x24x1xf32> to vector<2x24x24xf32>
    %131 = arith.mulf %126, %130 : vector<2x24x24xf32>
    "tpu.trace_start"() <{level = 10 : i32, message = "bqk,bkd->bqd"}> : () -> ()
    %cst_47 = arith.constant dense<0.000000e+00> : vector<2x24x8xf32>
    %132 = tpu.matmul %131, %116, %cst_47 {dimension_numbers = #tpu.dot_dimension_numbers<[2], [1], [1], [2], [0, 0, 0, 1, 1, 2], [0], [0]>} : vector<2x24x24xf32>, vector<2x24x8xf32>, vector<2x24x8xf32> -> vector<2x24x8xf32>
    "tpu.trace_stop"() : () -> ()
    %133 = vector.shape_cast %132 : vector<2x24x8xf32> to vector<48x8xf32>
    %134 = vector.extract_strided_slice %58 {offsets = [0, 24], sizes = [48, 8], strides = [1, 1]} : vector<48x32xf32> to vector<48x8xf32>
    %135 = vector.shape_cast %134 : vector<48x8xf32> to vector<2x24x8xf32>
    %136 = vector.extract_strided_slice %61 {offsets = [0, 24], sizes = [48, 8], strides = [1, 1]} : vector<48x32xf32> to vector<48x8xf32>
    %137 = vector.shape_cast %136 : vector<48x8xf32> to vector<2x24x8xf32>
    %138 = vector.extract_strided_slice %64 {offsets = [0, 24], sizes = [48, 8], strides = [1, 1]} : vector<48x32xf32> to vector<48x8xf32>
    %139 = vector.shape_cast %138 : vector<48x8xf32> to vector<2x24x8xf32>
    "tpu.trace_start"() <{level = 10 : i32, message = "bqd,bkd->bqk"}> : () -> ()
    %cst_48 = arith.constant dense<0.000000e+00> : vector<2x24x24xf32>
    %140 = tpu.matmul %135, %137, %cst_48 {dimension_numbers = #tpu.dot_dimension_numbers<[2], [2], [1], [1], [0, 0, 0, 1, 1, 1], [0], [0]>} : vector<2x24x8xf32>, vector<2x24x8xf32>, vector<2x24x24xf32> -> vector<2x24x24xf32>
    "tpu.trace_stop"() : () -> ()
    %cst_49 = arith.constant 0.353553385 : f32
    %141 = vector.broadcast %cst_49 : f32 to vector<2x24x24xf32>
    %142 = arith.mulf %140, %141 : vector<2x24x24xf32>
    %143 = vector.broadcast %14 : vector<1x1x24xf32> to vector<2x24x24xf32>
    %144 = arith.addf %142, %143 : vector<2x24x24xf32>
    %cst_50 = arith.constant dense<0xFF800000> : vector<2x24xf32>
    %145 = vector.multi_reduction <maximumf>, %144, %cst_50 [2] : vector<2x24x24xf32> to vector<2x24xf32>
    %146 = vector.shape_cast %145 : vector<2x24xf32> to vector<2x24x1xf32>
    %147 = vector.broadcast %146 : vector<2x24x1xf32> to vector<2x24x24xf32>
    %148 = arith.subf %144, %147 : vector<2x24x24xf32>
    %149 = math.exp %148 : vector<2x24x24xf32>
    %cst_51 = arith.constant dense<0.000000e+00> : vector<2x24xf32>
    %150 = vector.multi_reduction <add>, %149, %cst_51 [2] : vector<2x24x24xf32> to vector<2x24xf32>
    %151 = vector.shape_cast %150 : vector<2x24xf32> to vector<2x24x1xf32>
    %152 = tpu.reciprocal %151 {approx = true} : vector<2x24x1xf32> -> vector<2x24x1xf32>
    %153 = vector.broadcast %152 : vector<2x24x1xf32> to vector<2x24x24xf32>
    %154 = arith.mulf %149, %153 : vector<2x24x24xf32>
    "tpu.trace_start"() <{level = 10 : i32, message = "bqk,bkd->bqd"}> : () -> ()
    %cst_52 = arith.constant dense<0.000000e+00> : vector<2x24x8xf32>
    %155 = tpu.matmul %154, %139, %cst_52 {dimension_numbers = #tpu.dot_dimension_numbers<[2], [1], [1], [2], [0, 0, 0, 1, 1, 2], [0], [0]>} : vector<2x24x24xf32>, vector<2x24x8xf32>, vector<2x24x8xf32> -> vector<2x24x8xf32>
    "tpu.trace_stop"() : () -> ()
    %156 = vector.shape_cast %155 : vector<2x24x8xf32> to vector<48x8xf32>
    %157 = tpu.concatenate %87, %110, %133, %156 in 1 : vector<48x8xf32>, vector<48x8xf32>, vector<48x8xf32>, vector<48x8xf32> -> vector<48x32xf32>
    %c0_53 = arith.constant 0 : index
    %c0_54 = arith.constant 0 : index
    %c0_55 = arith.constant 0 : index
    %158 = vector.load %arg9[%c0_53, %c0_54, %c0_55] : memref<2x32x32xf32, #tpu.memory_space<vmem>>, vector<1x32x32xf32>
    %159 = vector.shape_cast %158 : vector<1x32x32xf32> to vector<32x32xf32>
    %cst_56 = arith.constant dense<0.000000e+00> : vector<48x32xf32>
    %160 = tpu.matmul %157, %159, %cst_56 {dimension_numbers = #tpu.dot_dimension_numbers<[1], [0], [0], [1], [0, 0, 1, 1], [], []>} : vector<48x32xf32>, vector<32x32xf32>, vector<48x32xf32> -> vector<48x32xf32>
    %161 = arith.addf %8, %160 : vector<48x32xf32>
    %c0_57 = arith.constant 0 : index
    %c0_58 = arith.constant 0 : index
    %c0_59 = arith.constant 0 : index
    %162 = vector.load %arg10[%c0_57, %c0_58, %c0_59] : memref<2x1x32xf32, #tpu.memory_space<vmem>>, vector<1x1x32xf32>
    %163 = vector.shape_cast %162 : vector<1x1x32xf32> to vector<1x32xf32>
    %164 = vector.broadcast %163 : vector<1x32xf32> to vector<48x32xf32>
    %165 = arith.addf %161, %164 : vector<48x32xf32>
    %c0_60 = arith.constant 0 : index
    %c0_61 = arith.constant 0 : index
    %c0_62 = arith.constant 0 : index
    %166 = vector.load %arg11[%c0_60, %c0_61, %c0_62] : memref<2x1x32xf32, #tpu.memory_space<vmem>>, vector<1x1x32xf32>
    %167 = vector.shape_cast %166 : vector<1x1x32xf32> to vector<1x32xf32>
    %c0_63 = arith.constant 0 : index
    %c0_64 = arith.constant 0 : index
    %c0_65 = arith.constant 0 : index
    %168 = vector.load %arg12[%c0_63, %c0_64, %c0_65] : memref<2x1x32xf32, #tpu.memory_space<vmem>>, vector<1x1x32xf32>
    %169 = vector.shape_cast %168 : vector<1x1x32xf32> to vector<1x32xf32>
    %cst_66 = arith.constant dense<0.000000e+00> : vector<48xf32>
    %170 = vector.multi_reduction <add>, %165, %cst_66 [1] : vector<48x32xf32> to vector<48xf32>
    %171 = vector.shape_cast %170 : vector<48xf32> to vector<48x1xf32>
    %cst_67 = arith.constant 3.200000e+01 : f32
    %172 = vector.broadcast %cst_67 : f32 to vector<48x1xf32>
    %173 = arith.divf %171, %172 : vector<48x1xf32>
    %174 = vector.broadcast %173 : vector<48x1xf32> to vector<48x32xf32>
    %175 = arith.subf %165, %174 : vector<48x32xf32>
    %176 = arith.mulf %175, %175 : vector<48x32xf32>
    %cst_68 = arith.constant dense<0.000000e+00> : vector<48xf32>
    %177 = vector.multi_reduction <add>, %176, %cst_68 [1] : vector<48x32xf32> to vector<48xf32>
    %178 = vector.shape_cast %177 : vector<48xf32> to vector<48x1xf32>
    %cst_69 = arith.constant 3.200000e+01 : f32
    %179 = vector.broadcast %cst_69 : f32 to vector<48x1xf32>
    %180 = arith.divf %178, %179 : vector<48x1xf32>
    %cst_70 = arith.constant 9.99999974E-6 : f32
    %181 = vector.broadcast %cst_70 : f32 to vector<48x1xf32>
    %182 = arith.addf %180, %181 : vector<48x1xf32>
    %183 = math.rsqrt %182 : vector<48x1xf32>
    %184 = vector.broadcast %183 : vector<48x1xf32> to vector<48x32xf32>
    %185 = arith.mulf %175, %184 : vector<48x32xf32>
    %186 = vector.broadcast %167 : vector<1x32xf32> to vector<48x32xf32>
    %187 = arith.mulf %185, %186 : vector<48x32xf32>
    %188 = vector.broadcast %169 : vector<1x32xf32> to vector<48x32xf32>
    %189 = arith.addf %187, %188 : vector<48x32xf32>
    %c0_71 = arith.constant 0 : index
    %c0_72 = arith.constant 0 : index
    %c0_73 = arith.constant 0 : index
    %190 = vector.load %arg13[%c0_71, %c0_72, %c0_73] : memref<2x32x128xf32, #tpu.memory_space<vmem>>, vector<1x32x128xf32>
    %191 = vector.shape_cast %190 : vector<1x32x128xf32> to vector<32x128xf32>
    %cst_74 = arith.constant dense<0.000000e+00> : vector<48x128xf32>
    %192 = tpu.matmul %189, %191, %cst_74 {dimension_numbers = #tpu.dot_dimension_numbers<[1], [0], [0], [1], [0, 0, 1, 1], [], []>} : vector<48x32xf32>, vector<32x128xf32>, vector<48x128xf32> -> vector<48x128xf32>
    %c0_75 = arith.constant 0 : index
    %c0_76 = arith.constant 0 : index
    %c0_77 = arith.constant 0 : index
    %193 = vector.load %arg14[%c0_75, %c0_76, %c0_77] : memref<2x1x128xf32, #tpu.memory_space<vmem>>, vector<1x1x128xf32>
    %194 = vector.shape_cast %193 : vector<1x1x128xf32> to vector<1x128xf32>
    %195 = vector.broadcast %194 : vector<1x128xf32> to vector<48x128xf32>
    %196 = arith.addf %192, %195 : vector<48x128xf32>
    %cst_78 = arith.constant 5.000000e-01 : f32
    %197 = vector.broadcast %cst_78 : f32 to vector<48x128xf32>
    %198 = arith.mulf %196, %197 : vector<48x128xf32>
    %cst_79 = arith.constant 0.707106769 : f32
    %199 = vector.broadcast %cst_79 : f32 to vector<48x128xf32>
    %200 = arith.mulf %196, %199 : vector<48x128xf32>
    %cst_80 = arith.constant 0.000000e+00 : f32
    %201 = vector.broadcast %cst_80 : f32 to vector<48x128xf32>
    %202 = arith.cmpf oge, %200, %201 : vector<48x128xf32>
    %cst_81 = arith.constant 1.000000e+00 : f32
    %cst_82 = arith.constant -1.000000e+00 : f32
    %203 = vector.broadcast %cst_81 : f32 to vector<48x128xf32>
    %204 = vector.broadcast %cst_82 : f32 to vector<48x128xf32>
    %205 = arith.select %202, %203, %204 : vector<48x128xi1>, vector<48x128xf32>
    %206 = math.absf %200 : vector<48x128xf32>
    %cst_83 = arith.constant 0.327591091 : f32
    %207 = vector.broadcast %cst_83 : f32 to vector<48x128xf32>
    %208 = arith.mulf %207, %206 : vector<48x128xf32>
    %cst_84 = arith.constant 1.000000e+00 : f32
    %209 = vector.broadcast %cst_84 : f32 to vector<48x128xf32>
    %210 = arith.addf %209, %208 : vector<48x128xf32>
    %cst_85 = arith.constant 1.000000e+00 : f32
    %211 = vector.broadcast %cst_85 : f32 to vector<48x128xf32>
    %212 = arith.divf %211, %210 : vector<48x128xf32>
    %cst_86 = arith.constant 1.06140542 : f32
    %213 = vector.broadcast %cst_86 : f32 to vector<48x128xf32>
    %214 = arith.mulf %213, %212 : vector<48x128xf32>
    %cst_87 = arith.constant -1.45315206 : f32
    %215 = vector.broadcast %cst_87 : f32 to vector<48x128xf32>
    %216 = arith.addf %214, %215 : vector<48x128xf32>
    %217 = arith.mulf %216, %212 : vector<48x128xf32>
    %cst_88 = arith.constant 1.42141378 : f32
    %218 = vector.broadcast %cst_88 : f32 to vector<48x128xf32>
    %219 = arith.addf %217, %218 : vector<48x128xf32>
    %220 = arith.mulf %219, %212 : vector<48x128xf32>
    %cst_89 = arith.constant -0.284496725 : f32
    %221 = vector.broadcast %cst_89 : f32 to vector<48x128xf32>
    %222 = arith.addf %220, %221 : vector<48x128xf32>
    %223 = arith.mulf %222, %212 : vector<48x128xf32>
    %cst_90 = arith.constant 0.254829586 : f32
    %224 = vector.broadcast %cst_90 : f32 to vector<48x128xf32>
    %225 = arith.addf %223, %224 : vector<48x128xf32>
    %226 = arith.mulf %225, %212 : vector<48x128xf32>
    %cst_91 = arith.constant 0.000000e+00 : f32
    %227 = vector.broadcast %cst_91 : f32 to vector<48x128xf32>
    %228 = arith.subf %227, %206 : vector<48x128xf32>
    %229 = arith.mulf %228, %206 : vector<48x128xf32>
    %230 = math.exp %229 : vector<48x128xf32>
    %231 = arith.mulf %226, %230 : vector<48x128xf32>
    %cst_92 = arith.constant 1.000000e+00 : f32
    %232 = vector.broadcast %cst_92 : f32 to vector<48x128xf32>
    %233 = arith.subf %232, %231 : vector<48x128xf32>
    %234 = arith.mulf %205, %233 : vector<48x128xf32>
    %cst_93 = arith.constant 1.000000e+00 : f32
    %235 = vector.broadcast %cst_93 : f32 to vector<48x128xf32>
    %236 = arith.addf %235, %234 : vector<48x128xf32>
    %237 = arith.mulf %198, %236 : vector<48x128xf32>
    %c0_94 = arith.constant 0 : index
    %c0_95 = arith.constant 0 : index
    %c0_96 = arith.constant 0 : index
    %238 = vector.load %arg15[%c0_94, %c0_95, %c0_96] : memref<2x128x32xf32, #tpu.memory_space<vmem>>, vector<1x128x32xf32>
    %239 = vector.shape_cast %238 : vector<1x128x32xf32> to vector<128x32xf32>
    %cst_97 = arith.constant dense<0.000000e+00> : vector<48x32xf32>
    %240 = tpu.matmul %237, %239, %cst_97 {dimension_numbers = #tpu.dot_dimension_numbers<[1], [0], [0], [1], [0, 0, 1, 1], [], []>} : vector<48x128xf32>, vector<128x32xf32>, vector<48x32xf32> -> vector<48x32xf32>
    %c0_98 = arith.constant 0 : index
    %c0_99 = arith.constant 0 : index
    %c0_100 = arith.constant 0 : index
    %241 = vector.load %arg16[%c0_98, %c0_99, %c0_100] : memref<2x1x32xf32, #tpu.memory_space<vmem>>, vector<1x1x32xf32>
    %242 = vector.shape_cast %241 : vector<1x1x32xf32> to vector<1x32xf32>
    %243 = vector.broadcast %242 : vector<1x32xf32> to vector<48x32xf32>
    %244 = arith.addf %240, %243 : vector<48x32xf32>
    %245 = arith.addf %165, %244 : vector<48x32xf32>
    %c1 = arith.constant 1 : index
    %c0_101 = arith.constant 0 : index
    %c0_102 = arith.constant 0 : index
    %246 = vector.load %arg4[%c1, %c0_101, %c0_102] : memref<2x1x32xf32, #tpu.memory_space<vmem>>, vector<1x1x32xf32>
    %247 = vector.shape_cast %246 : vector<1x1x32xf32> to vector<1x32xf32>
    %c1_103 = arith.constant 1 : index
    %c0_104 = arith.constant 0 : index
    %c0_105 = arith.constant 0 : index
    %248 = vector.load %arg5[%c1_103, %c0_104, %c0_105] : memref<2x1x32xf32, #tpu.memory_space<vmem>>, vector<1x1x32xf32>
    %249 = vector.shape_cast %248 : vector<1x1x32xf32> to vector<1x32xf32>
    %cst_106 = arith.constant dense<0.000000e+00> : vector<48xf32>
    %250 = vector.multi_reduction <add>, %245, %cst_106 [1] : vector<48x32xf32> to vector<48xf32>
    %251 = vector.shape_cast %250 : vector<48xf32> to vector<48x1xf32>
    %cst_107 = arith.constant 3.200000e+01 : f32
    %252 = vector.broadcast %cst_107 : f32 to vector<48x1xf32>
    %253 = arith.divf %251, %252 : vector<48x1xf32>
    %254 = vector.broadcast %253 : vector<48x1xf32> to vector<48x32xf32>
    %255 = arith.subf %245, %254 : vector<48x32xf32>
    %256 = arith.mulf %255, %255 : vector<48x32xf32>
    %cst_108 = arith.constant dense<0.000000e+00> : vector<48xf32>
    %257 = vector.multi_reduction <add>, %256, %cst_108 [1] : vector<48x32xf32> to vector<48xf32>
    %258 = vector.shape_cast %257 : vector<48xf32> to vector<48x1xf32>
    %cst_109 = arith.constant 3.200000e+01 : f32
    %259 = vector.broadcast %cst_109 : f32 to vector<48x1xf32>
    %260 = arith.divf %258, %259 : vector<48x1xf32>
    %cst_110 = arith.constant 9.99999974E-6 : f32
    %261 = vector.broadcast %cst_110 : f32 to vector<48x1xf32>
    %262 = arith.addf %260, %261 : vector<48x1xf32>
    %263 = math.rsqrt %262 : vector<48x1xf32>
    %264 = vector.broadcast %263 : vector<48x1xf32> to vector<48x32xf32>
    %265 = arith.mulf %255, %264 : vector<48x32xf32>
    %266 = vector.broadcast %247 : vector<1x32xf32> to vector<48x32xf32>
    %267 = arith.mulf %265, %266 : vector<48x32xf32>
    %268 = vector.broadcast %249 : vector<1x32xf32> to vector<48x32xf32>
    %269 = arith.addf %267, %268 : vector<48x32xf32>
    %c1_111 = arith.constant 1 : index
    %c0_112 = arith.constant 0 : index
    %c0_113 = arith.constant 0 : index
    %270 = vector.load %arg7[%c1_111, %c0_112, %c0_113] : memref<2x32x32xf32, #tpu.memory_space<vmem>>, vector<1x32x32xf32>
    %271 = vector.shape_cast %270 : vector<1x32x32xf32> to vector<32x32xf32>
    %cst_114 = arith.constant dense<0.000000e+00> : vector<48x32xf32>
    %272 = tpu.matmul %269, %271, %cst_114 {dimension_numbers = #tpu.dot_dimension_numbers<[1], [0], [0], [1], [0, 0, 1, 1], [], []>} : vector<48x32xf32>, vector<32x32xf32>, vector<48x32xf32> -> vector<48x32xf32>
    %c1_115 = arith.constant 1 : index
    %c0_116 = arith.constant 0 : index
    %c0_117 = arith.constant 0 : index
    %273 = vector.load %arg8[%c1_115, %c0_116, %c0_117] : memref<2x32x32xf32, #tpu.memory_space<vmem>>, vector<1x32x32xf32>
    %274 = vector.shape_cast %273 : vector<1x32x32xf32> to vector<32x32xf32>
    %cst_118 = arith.constant dense<0.000000e+00> : vector<48x32xf32>
    %275 = tpu.matmul %269, %274, %cst_118 {dimension_numbers = #tpu.dot_dimension_numbers<[1], [0], [0], [1], [0, 0, 1, 1], [], []>} : vector<48x32xf32>, vector<32x32xf32>, vector<48x32xf32> -> vector<48x32xf32>
    %cst_119 = arith.constant dense<0.000000e+00> : vector<2x32xf32>
    %276 = tpu.matmul %23, %245, %cst_119 {dimension_numbers = #tpu.dot_dimension_numbers<[1], [0], [0], [1], [0, 0, 1, 1], [], []>} : vector<2x48xf32>, vector<48x32xf32>, vector<2x32xf32> -> vector<2x32xf32>
    %c1_120 = arith.constant 1 : index
    %c0_121 = arith.constant 0 : index
    %c0_122 = arith.constant 0 : index
    %277 = vector.load %arg4[%c1_120, %c0_121, %c0_122] : memref<2x1x32xf32, #tpu.memory_space<vmem>>, vector<1x1x32xf32>
    %278 = vector.shape_cast %277 : vector<1x1x32xf32> to vector<1x32xf32>
    %c1_123 = arith.constant 1 : index
    %c0_124 = arith.constant 0 : index
    %c0_125 = arith.constant 0 : index
    %279 = vector.load %arg5[%c1_123, %c0_124, %c0_125] : memref<2x1x32xf32, #tpu.memory_space<vmem>>, vector<1x1x32xf32>
    %280 = vector.shape_cast %279 : vector<1x1x32xf32> to vector<1x32xf32>
    %cst_126 = arith.constant dense<0.000000e+00> : vector<2xf32>
    %281 = vector.multi_reduction <add>, %276, %cst_126 [1] : vector<2x32xf32> to vector<2xf32>
    %282 = vector.shape_cast %281 : vector<2xf32> to vector<2x1xf32>
    %cst_127 = arith.constant 3.200000e+01 : f32
    %283 = vector.broadcast %cst_127 : f32 to vector<2x1xf32>
    %284 = arith.divf %282, %283 : vector<2x1xf32>
    %285 = vector.broadcast %284 : vector<2x1xf32> to vector<2x32xf32>
    %286 = arith.subf %276, %285 : vector<2x32xf32>
    %287 = arith.mulf %286, %286 : vector<2x32xf32>
    %cst_128 = arith.constant dense<0.000000e+00> : vector<2xf32>
    %288 = vector.multi_reduction <add>, %287, %cst_128 [1] : vector<2x32xf32> to vector<2xf32>
    %289 = vector.shape_cast %288 : vector<2xf32> to vector<2x1xf32>
    %cst_129 = arith.constant 3.200000e+01 : f32
    %290 = vector.broadcast %cst_129 : f32 to vector<2x1xf32>
    %291 = arith.divf %289, %290 : vector<2x1xf32>
    %cst_130 = arith.constant 9.99999974E-6 : f32
    %292 = vector.broadcast %cst_130 : f32 to vector<2x1xf32>
    %293 = arith.addf %291, %292 : vector<2x1xf32>
    %294 = math.rsqrt %293 : vector<2x1xf32>
    %295 = vector.broadcast %294 : vector<2x1xf32> to vector<2x32xf32>
    %296 = arith.mulf %286, %295 : vector<2x32xf32>
    %297 = vector.broadcast %278 : vector<1x32xf32> to vector<2x32xf32>
    %298 = arith.mulf %296, %297 : vector<2x32xf32>
    %299 = vector.broadcast %280 : vector<1x32xf32> to vector<2x32xf32>
    %300 = arith.addf %298, %299 : vector<2x32xf32>
    %c1_131 = arith.constant 1 : index
    %c0_132 = arith.constant 0 : index
    %c0_133 = arith.constant 0 : index
    %301 = vector.load %arg6[%c1_131, %c0_132, %c0_133] : memref<2x32x32xf32, #tpu.memory_space<vmem>>, vector<1x32x32xf32>
    %302 = vector.shape_cast %301 : vector<1x32x32xf32> to vector<32x32xf32>
    %cst_134 = arith.constant dense<0.000000e+00> : vector<2x32xf32>
    %303 = tpu.matmul %300, %302, %cst_134 {dimension_numbers = #tpu.dot_dimension_numbers<[1], [0], [0], [1], [0, 0, 1, 1], [], []>} : vector<2x32xf32>, vector<32x32xf32>, vector<2x32xf32> -> vector<2x32xf32>
    %304 = vector.extract_strided_slice %303 {offsets = [0, 0], sizes = [2, 8], strides = [1, 1]} : vector<2x32xf32> to vector<2x8xf32>
    %305 = vector.extract_strided_slice %272 {offsets = [0, 0], sizes = [48, 8], strides = [1, 1]} : vector<48x32xf32> to vector<48x8xf32>
    "tpu.trace_start"() <{level = 10 : i32, message = "qd,kd->qk"}> : () -> ()
    %cst_135 = arith.constant dense<0.000000e+00> : vector<2x48xf32>
    %306 = tpu.matmul %304, %305, %cst_135 {dimension_numbers = #tpu.dot_dimension_numbers<[1], [1], [0], [0], [0, 0, 1, 0], [], []>} : vector<2x8xf32>, vector<48x8xf32>, vector<2x48xf32> -> vector<2x48xf32>
    "tpu.trace_stop"() : () -> ()
    %cst_136 = arith.constant 0.353553385 : f32
    %307 = vector.broadcast %cst_136 : f32 to vector<2x48xf32>
    %308 = arith.mulf %306, %307 : vector<2x48xf32>
    %309 = arith.addf %308, %31 : vector<2x48xf32>
    %cst_137 = arith.constant dense<0xFF800000> : vector<2xf32>
    %310 = vector.multi_reduction <maximumf>, %309, %cst_137 [1] : vector<2x48xf32> to vector<2xf32>
    %311 = vector.shape_cast %310 : vector<2xf32> to vector<2x1xf32>
    %312 = vector.broadcast %311 : vector<2x1xf32> to vector<2x48xf32>
    %313 = arith.subf %309, %312 : vector<2x48xf32>
    %314 = math.exp %313 : vector<2x48xf32>
    %cst_138 = arith.constant dense<0.000000e+00> : vector<2xf32>
    %315 = vector.multi_reduction <add>, %314, %cst_138 [1] : vector<2x48xf32> to vector<2xf32>
    %316 = vector.shape_cast %315 : vector<2xf32> to vector<2x1xf32>
    %317 = tpu.reciprocal %316 {approx = true} : vector<2x1xf32> -> vector<2x1xf32>
    %318 = vector.broadcast %317 : vector<2x1xf32> to vector<2x48xf32>
    %319 = arith.mulf %314, %318 : vector<2x48xf32>
    %320 = vector.extract_strided_slice %275 {offsets = [0, 0], sizes = [48, 8], strides = [1, 1]} : vector<48x32xf32> to vector<48x8xf32>
    %cst_139 = arith.constant dense<0.000000e+00> : vector<2x8xf32>
    %321 = tpu.matmul %319, %320, %cst_139 {dimension_numbers = #tpu.dot_dimension_numbers<[1], [0], [0], [1], [0, 0, 1, 1], [], []>} : vector<2x48xf32>, vector<48x8xf32>, vector<2x8xf32> -> vector<2x8xf32>
    %322 = vector.extract_strided_slice %303 {offsets = [0, 8], sizes = [2, 8], strides = [1, 1]} : vector<2x32xf32> to vector<2x8xf32>
    %323 = vector.extract_strided_slice %272 {offsets = [0, 8], sizes = [48, 8], strides = [1, 1]} : vector<48x32xf32> to vector<48x8xf32>
    "tpu.trace_start"() <{level = 10 : i32, message = "qd,kd->qk"}> : () -> ()
    %cst_140 = arith.constant dense<0.000000e+00> : vector<2x48xf32>
    %324 = tpu.matmul %322, %323, %cst_140 {dimension_numbers = #tpu.dot_dimension_numbers<[1], [1], [0], [0], [0, 0, 1, 0], [], []>} : vector<2x8xf32>, vector<48x8xf32>, vector<2x48xf32> -> vector<2x48xf32>
    "tpu.trace_stop"() : () -> ()
    %cst_141 = arith.constant 0.353553385 : f32
    %325 = vector.broadcast %cst_141 : f32 to vector<2x48xf32>
    %326 = arith.mulf %324, %325 : vector<2x48xf32>
    %327 = arith.addf %326, %31 : vector<2x48xf32>
    %cst_142 = arith.constant dense<0xFF800000> : vector<2xf32>
    %328 = vector.multi_reduction <maximumf>, %327, %cst_142 [1] : vector<2x48xf32> to vector<2xf32>
    %329 = vector.shape_cast %328 : vector<2xf32> to vector<2x1xf32>
    %330 = vector.broadcast %329 : vector<2x1xf32> to vector<2x48xf32>
    %331 = arith.subf %327, %330 : vector<2x48xf32>
    %332 = math.exp %331 : vector<2x48xf32>
    %cst_143 = arith.constant dense<0.000000e+00> : vector<2xf32>
    %333 = vector.multi_reduction <add>, %332, %cst_143 [1] : vector<2x48xf32> to vector<2xf32>
    %334 = vector.shape_cast %333 : vector<2xf32> to vector<2x1xf32>
    %335 = tpu.reciprocal %334 {approx = true} : vector<2x1xf32> -> vector<2x1xf32>
    %336 = vector.broadcast %335 : vector<2x1xf32> to vector<2x48xf32>
    %337 = arith.mulf %332, %336 : vector<2x48xf32>
    %338 = vector.extract_strided_slice %275 {offsets = [0, 8], sizes = [48, 8], strides = [1, 1]} : vector<48x32xf32> to vector<48x8xf32>
    %cst_144 = arith.constant dense<0.000000e+00> : vector<2x8xf32>
    %339 = tpu.matmul %337, %338, %cst_144 {dimension_numbers = #tpu.dot_dimension_numbers<[1], [0], [0], [1], [0, 0, 1, 1], [], []>} : vector<2x48xf32>, vector<48x8xf32>, vector<2x8xf32> -> vector<2x8xf32>
    %340 = vector.extract_strided_slice %303 {offsets = [0, 16], sizes = [2, 8], strides = [1, 1]} : vector<2x32xf32> to vector<2x8xf32>
    %341 = vector.extract_strided_slice %272 {offsets = [0, 16], sizes = [48, 8], strides = [1, 1]} : vector<48x32xf32> to vector<48x8xf32>
    "tpu.trace_start"() <{level = 10 : i32, message = "qd,kd->qk"}> : () -> ()
    %cst_145 = arith.constant dense<0.000000e+00> : vector<2x48xf32>
    %342 = tpu.matmul %340, %341, %cst_145 {dimension_numbers = #tpu.dot_dimension_numbers<[1], [1], [0], [0], [0, 0, 1, 0], [], []>} : vector<2x8xf32>, vector<48x8xf32>, vector<2x48xf32> -> vector<2x48xf32>
    "tpu.trace_stop"() : () -> ()
    %cst_146 = arith.constant 0.353553385 : f32
    %343 = vector.broadcast %cst_146 : f32 to vector<2x48xf32>
    %344 = arith.mulf %342, %343 : vector<2x48xf32>
    %345 = arith.addf %344, %31 : vector<2x48xf32>
    %cst_147 = arith.constant dense<0xFF800000> : vector<2xf32>
    %346 = vector.multi_reduction <maximumf>, %345, %cst_147 [1] : vector<2x48xf32> to vector<2xf32>
    %347 = vector.shape_cast %346 : vector<2xf32> to vector<2x1xf32>
    %348 = vector.broadcast %347 : vector<2x1xf32> to vector<2x48xf32>
    %349 = arith.subf %345, %348 : vector<2x48xf32>
    %350 = math.exp %349 : vector<2x48xf32>
    %cst_148 = arith.constant dense<0.000000e+00> : vector<2xf32>
    %351 = vector.multi_reduction <add>, %350, %cst_148 [1] : vector<2x48xf32> to vector<2xf32>
    %352 = vector.shape_cast %351 : vector<2xf32> to vector<2x1xf32>
    %353 = tpu.reciprocal %352 {approx = true} : vector<2x1xf32> -> vector<2x1xf32>
    %354 = vector.broadcast %353 : vector<2x1xf32> to vector<2x48xf32>
    %355 = arith.mulf %350, %354 : vector<2x48xf32>
    %356 = vector.extract_strided_slice %275 {offsets = [0, 16], sizes = [48, 8], strides = [1, 1]} : vector<48x32xf32> to vector<48x8xf32>
    %cst_149 = arith.constant dense<0.000000e+00> : vector<2x8xf32>
    %357 = tpu.matmul %355, %356, %cst_149 {dimension_numbers = #tpu.dot_dimension_numbers<[1], [0], [0], [1], [0, 0, 1, 1], [], []>} : vector<2x48xf32>, vector<48x8xf32>, vector<2x8xf32> -> vector<2x8xf32>
    %358 = vector.extract_strided_slice %303 {offsets = [0, 24], sizes = [2, 8], strides = [1, 1]} : vector<2x32xf32> to vector<2x8xf32>
    %359 = vector.extract_strided_slice %272 {offsets = [0, 24], sizes = [48, 8], strides = [1, 1]} : vector<48x32xf32> to vector<48x8xf32>
    "tpu.trace_start"() <{level = 10 : i32, message = "qd,kd->qk"}> : () -> ()
    %cst_150 = arith.constant dense<0.000000e+00> : vector<2x48xf32>
    %360 = tpu.matmul %358, %359, %cst_150 {dimension_numbers = #tpu.dot_dimension_numbers<[1], [1], [0], [0], [0, 0, 1, 0], [], []>} : vector<2x8xf32>, vector<48x8xf32>, vector<2x48xf32> -> vector<2x48xf32>
    "tpu.trace_stop"() : () -> ()
    %cst_151 = arith.constant 0.353553385 : f32
    %361 = vector.broadcast %cst_151 : f32 to vector<2x48xf32>
    %362 = arith.mulf %360, %361 : vector<2x48xf32>
    %363 = arith.addf %362, %31 : vector<2x48xf32>
    %cst_152 = arith.constant dense<0xFF800000> : vector<2xf32>
    %364 = vector.multi_reduction <maximumf>, %363, %cst_152 [1] : vector<2x48xf32> to vector<2xf32>
    %365 = vector.shape_cast %364 : vector<2xf32> to vector<2x1xf32>
    %366 = vector.broadcast %365 : vector<2x1xf32> to vector<2x48xf32>
    %367 = arith.subf %363, %366 : vector<2x48xf32>
    %368 = math.exp %367 : vector<2x48xf32>
    %cst_153 = arith.constant dense<0.000000e+00> : vector<2xf32>
    %369 = vector.multi_reduction <add>, %368, %cst_153 [1] : vector<2x48xf32> to vector<2xf32>
    %370 = vector.shape_cast %369 : vector<2xf32> to vector<2x1xf32>
    %371 = tpu.reciprocal %370 {approx = true} : vector<2x1xf32> -> vector<2x1xf32>
    %372 = vector.broadcast %371 : vector<2x1xf32> to vector<2x48xf32>
    %373 = arith.mulf %368, %372 : vector<2x48xf32>
    %374 = vector.extract_strided_slice %275 {offsets = [0, 24], sizes = [48, 8], strides = [1, 1]} : vector<48x32xf32> to vector<48x8xf32>
    %cst_154 = arith.constant dense<0.000000e+00> : vector<2x8xf32>
    %375 = tpu.matmul %373, %374, %cst_154 {dimension_numbers = #tpu.dot_dimension_numbers<[1], [0], [0], [1], [0, 0, 1, 1], [], []>} : vector<2x48xf32>, vector<48x8xf32>, vector<2x8xf32> -> vector<2x8xf32>
    %376 = tpu.concatenate %321, %339, %357, %375 in 1 : vector<2x8xf32>, vector<2x8xf32>, vector<2x8xf32>, vector<2x8xf32> -> vector<2x32xf32>
    %c1_155 = arith.constant 1 : index
    %c0_156 = arith.constant 0 : index
    %c0_157 = arith.constant 0 : index
    %377 = vector.load %arg9[%c1_155, %c0_156, %c0_157] : memref<2x32x32xf32, #tpu.memory_space<vmem>>, vector<1x32x32xf32>
    %378 = vector.shape_cast %377 : vector<1x32x32xf32> to vector<32x32xf32>
    %cst_158 = arith.constant dense<0.000000e+00> : vector<2x32xf32>
    %379 = tpu.matmul %376, %378, %cst_158 {dimension_numbers = #tpu.dot_dimension_numbers<[1], [0], [0], [1], [0, 0, 1, 1], [], []>} : vector<2x32xf32>, vector<32x32xf32>, vector<2x32xf32> -> vector<2x32xf32>
    %380 = arith.addf %276, %379 : vector<2x32xf32>
    %c1_159 = arith.constant 1 : index
    %c0_160 = arith.constant 0 : index
    %c0_161 = arith.constant 0 : index
    %381 = vector.load %arg10[%c1_159, %c0_160, %c0_161] : memref<2x1x32xf32, #tpu.memory_space<vmem>>, vector<1x1x32xf32>
    %382 = vector.shape_cast %381 : vector<1x1x32xf32> to vector<1x32xf32>
    %383 = vector.broadcast %382 : vector<1x32xf32> to vector<2x32xf32>
    %384 = arith.addf %380, %383 : vector<2x32xf32>
    %c1_162 = arith.constant 1 : index
    %c0_163 = arith.constant 0 : index
    %c0_164 = arith.constant 0 : index
    %385 = vector.load %arg11[%c1_162, %c0_163, %c0_164] : memref<2x1x32xf32, #tpu.memory_space<vmem>>, vector<1x1x32xf32>
    %386 = vector.shape_cast %385 : vector<1x1x32xf32> to vector<1x32xf32>
    %c1_165 = arith.constant 1 : index
    %c0_166 = arith.constant 0 : index
    %c0_167 = arith.constant 0 : index
    %387 = vector.load %arg12[%c1_165, %c0_166, %c0_167] : memref<2x1x32xf32, #tpu.memory_space<vmem>>, vector<1x1x32xf32>
    %388 = vector.shape_cast %387 : vector<1x1x32xf32> to vector<1x32xf32>
    %cst_168 = arith.constant dense<0.000000e+00> : vector<2xf32>
    %389 = vector.multi_reduction <add>, %384, %cst_168 [1] : vector<2x32xf32> to vector<2xf32>
    %390 = vector.shape_cast %389 : vector<2xf32> to vector<2x1xf32>
    %cst_169 = arith.constant 3.200000e+01 : f32
    %391 = vector.broadcast %cst_169 : f32 to vector<2x1xf32>
    %392 = arith.divf %390, %391 : vector<2x1xf32>
    %393 = vector.broadcast %392 : vector<2x1xf32> to vector<2x32xf32>
    %394 = arith.subf %384, %393 : vector<2x32xf32>
    %395 = arith.mulf %394, %394 : vector<2x32xf32>
    %cst_170 = arith.constant dense<0.000000e+00> : vector<2xf32>
    %396 = vector.multi_reduction <add>, %395, %cst_170 [1] : vector<2x32xf32> to vector<2xf32>
    %397 = vector.shape_cast %396 : vector<2xf32> to vector<2x1xf32>
    %cst_171 = arith.constant 3.200000e+01 : f32
    %398 = vector.broadcast %cst_171 : f32 to vector<2x1xf32>
    %399 = arith.divf %397, %398 : vector<2x1xf32>
    %cst_172 = arith.constant 9.99999974E-6 : f32
    %400 = vector.broadcast %cst_172 : f32 to vector<2x1xf32>
    %401 = arith.addf %399, %400 : vector<2x1xf32>
    %402 = math.rsqrt %401 : vector<2x1xf32>
    %403 = vector.broadcast %402 : vector<2x1xf32> to vector<2x32xf32>
    %404 = arith.mulf %394, %403 : vector<2x32xf32>
    %405 = vector.broadcast %386 : vector<1x32xf32> to vector<2x32xf32>
    %406 = arith.mulf %404, %405 : vector<2x32xf32>
    %407 = vector.broadcast %388 : vector<1x32xf32> to vector<2x32xf32>
    %408 = arith.addf %406, %407 : vector<2x32xf32>
    %c1_173 = arith.constant 1 : index
    %c0_174 = arith.constant 0 : index
    %c0_175 = arith.constant 0 : index
    %409 = vector.load %arg13[%c1_173, %c0_174, %c0_175] : memref<2x32x128xf32, #tpu.memory_space<vmem>>, vector<1x32x128xf32>
    %410 = vector.shape_cast %409 : vector<1x32x128xf32> to vector<32x128xf32>
    %cst_176 = arith.constant dense<0.000000e+00> : vector<2x128xf32>
    %411 = tpu.matmul %408, %410, %cst_176 {dimension_numbers = #tpu.dot_dimension_numbers<[1], [0], [0], [1], [0, 0, 1, 1], [], []>} : vector<2x32xf32>, vector<32x128xf32>, vector<2x128xf32> -> vector<2x128xf32>
    %c1_177 = arith.constant 1 : index
    %c0_178 = arith.constant 0 : index
    %c0_179 = arith.constant 0 : index
    %412 = vector.load %arg14[%c1_177, %c0_178, %c0_179] : memref<2x1x128xf32, #tpu.memory_space<vmem>>, vector<1x1x128xf32>
    %413 = vector.shape_cast %412 : vector<1x1x128xf32> to vector<1x128xf32>
    %414 = vector.broadcast %413 : vector<1x128xf32> to vector<2x128xf32>
    %415 = arith.addf %411, %414 : vector<2x128xf32>
    %cst_180 = arith.constant 5.000000e-01 : f32
    %416 = vector.broadcast %cst_180 : f32 to vector<2x128xf32>
    %417 = arith.mulf %415, %416 : vector<2x128xf32>
    %cst_181 = arith.constant 0.707106769 : f32
    %418 = vector.broadcast %cst_181 : f32 to vector<2x128xf32>
    %419 = arith.mulf %415, %418 : vector<2x128xf32>
    %cst_182 = arith.constant 0.000000e+00 : f32
    %420 = vector.broadcast %cst_182 : f32 to vector<2x128xf32>
    %421 = arith.cmpf oge, %419, %420 : vector<2x128xf32>
    %cst_183 = arith.constant 1.000000e+00 : f32
    %cst_184 = arith.constant -1.000000e+00 : f32
    %422 = vector.broadcast %cst_183 : f32 to vector<2x128xf32>
    %423 = vector.broadcast %cst_184 : f32 to vector<2x128xf32>
    %424 = arith.select %421, %422, %423 : vector<2x128xi1>, vector<2x128xf32>
    %425 = math.absf %419 : vector<2x128xf32>
    %cst_185 = arith.constant 0.327591091 : f32
    %426 = vector.broadcast %cst_185 : f32 to vector<2x128xf32>
    %427 = arith.mulf %426, %425 : vector<2x128xf32>
    %cst_186 = arith.constant 1.000000e+00 : f32
    %428 = vector.broadcast %cst_186 : f32 to vector<2x128xf32>
    %429 = arith.addf %428, %427 : vector<2x128xf32>
    %cst_187 = arith.constant 1.000000e+00 : f32
    %430 = vector.broadcast %cst_187 : f32 to vector<2x128xf32>
    %431 = arith.divf %430, %429 : vector<2x128xf32>
    %cst_188 = arith.constant 1.06140542 : f32
    %432 = vector.broadcast %cst_188 : f32 to vector<2x128xf32>
    %433 = arith.mulf %432, %431 : vector<2x128xf32>
    %cst_189 = arith.constant -1.45315206 : f32
    %434 = vector.broadcast %cst_189 : f32 to vector<2x128xf32>
    %435 = arith.addf %433, %434 : vector<2x128xf32>
    %436 = arith.mulf %435, %431 : vector<2x128xf32>
    %cst_190 = arith.constant 1.42141378 : f32
    %437 = vector.broadcast %cst_190 : f32 to vector<2x128xf32>
    %438 = arith.addf %436, %437 : vector<2x128xf32>
    %439 = arith.mulf %438, %431 : vector<2x128xf32>
    %cst_191 = arith.constant -0.284496725 : f32
    %440 = vector.broadcast %cst_191 : f32 to vector<2x128xf32>
    %441 = arith.addf %439, %440 : vector<2x128xf32>
    %442 = arith.mulf %441, %431 : vector<2x128xf32>
    %cst_192 = arith.constant 0.254829586 : f32
    %443 = vector.broadcast %cst_192 : f32 to vector<2x128xf32>
    %444 = arith.addf %442, %443 : vector<2x128xf32>
    %445 = arith.mulf %444, %431 : vector<2x128xf32>
    %cst_193 = arith.constant 0.000000e+00 : f32
    %446 = vector.broadcast %cst_193 : f32 to vector<2x128xf32>
    %447 = arith.subf %446, %425 : vector<2x128xf32>
    %448 = arith.mulf %447, %425 : vector<2x128xf32>
    %449 = math.exp %448 : vector<2x128xf32>
    %450 = arith.mulf %445, %449 : vector<2x128xf32>
    %cst_194 = arith.constant 1.000000e+00 : f32
    %451 = vector.broadcast %cst_194 : f32 to vector<2x128xf32>
    %452 = arith.subf %451, %450 : vector<2x128xf32>
    %453 = arith.mulf %424, %452 : vector<2x128xf32>
    %cst_195 = arith.constant 1.000000e+00 : f32
    %454 = vector.broadcast %cst_195 : f32 to vector<2x128xf32>
    %455 = arith.addf %454, %453 : vector<2x128xf32>
    %456 = arith.mulf %417, %455 : vector<2x128xf32>
    %c1_196 = arith.constant 1 : index
    %c0_197 = arith.constant 0 : index
    %c0_198 = arith.constant 0 : index
    %457 = vector.load %arg15[%c1_196, %c0_197, %c0_198] : memref<2x128x32xf32, #tpu.memory_space<vmem>>, vector<1x128x32xf32>
    %458 = vector.shape_cast %457 : vector<1x128x32xf32> to vector<128x32xf32>
    %cst_199 = arith.constant dense<0.000000e+00> : vector<2x32xf32>
    %459 = tpu.matmul %456, %458, %cst_199 {dimension_numbers = #tpu.dot_dimension_numbers<[1], [0], [0], [1], [0, 0, 1, 1], [], []>} : vector<2x128xf32>, vector<128x32xf32>, vector<2x32xf32> -> vector<2x32xf32>
    %c1_200 = arith.constant 1 : index
    %c0_201 = arith.constant 0 : index
    %c0_202 = arith.constant 0 : index
    %460 = vector.load %arg16[%c1_200, %c0_201, %c0_202] : memref<2x1x32xf32, #tpu.memory_space<vmem>>, vector<1x1x32xf32>
    %461 = vector.shape_cast %460 : vector<1x1x32xf32> to vector<1x32xf32>
    %462 = vector.broadcast %461 : vector<1x32xf32> to vector<2x32xf32>
    %463 = arith.addf %459, %462 : vector<2x32xf32>
    %464 = arith.addf %384, %463 : vector<2x32xf32>
    %c0_203 = arith.constant 0 : index
    %c0_204 = arith.constant 0 : index
    %465 = vector.load %arg17[%c0_203, %c0_204] : memref<1x32xf32, #tpu.memory_space<vmem>>, vector<1x32xf32>
    %c0_205 = arith.constant 0 : index
    %c0_206 = arith.constant 0 : index
    %466 = vector.load %arg18[%c0_205, %c0_206] : memref<1x32xf32, #tpu.memory_space<vmem>>, vector<1x32xf32>
    %cst_207 = arith.constant dense<0.000000e+00> : vector<2xf32>
    %467 = vector.multi_reduction <add>, %464, %cst_207 [1] : vector<2x32xf32> to vector<2xf32>
    %468 = vector.shape_cast %467 : vector<2xf32> to vector<2x1xf32>
    %cst_208 = arith.constant 3.200000e+01 : f32
    %469 = vector.broadcast %cst_208 : f32 to vector<2x1xf32>
    %470 = arith.divf %468, %469 : vector<2x1xf32>
    %471 = vector.broadcast %470 : vector<2x1xf32> to vector<2x32xf32>
    %472 = arith.subf %464, %471 : vector<2x32xf32>
    %473 = arith.mulf %472, %472 : vector<2x32xf32>
    %cst_209 = arith.constant dense<0.000000e+00> : vector<2xf32>
    %474 = vector.multi_reduction <add>, %473, %cst_209 [1] : vector<2x32xf32> to vector<2xf32>
    %475 = vector.shape_cast %474 : vector<2xf32> to vector<2x1xf32>
    %cst_210 = arith.constant 3.200000e+01 : f32
    %476 = vector.broadcast %cst_210 : f32 to vector<2x1xf32>
    %477 = arith.divf %475, %476 : vector<2x1xf32>
    %cst_211 = arith.constant 9.99999974E-6 : f32
    %478 = vector.broadcast %cst_211 : f32 to vector<2x1xf32>
    %479 = arith.addf %477, %478 : vector<2x1xf32>
    %480 = math.rsqrt %479 : vector<2x1xf32>
    %481 = vector.broadcast %480 : vector<2x1xf32> to vector<2x32xf32>
    %482 = arith.mulf %472, %481 : vector<2x32xf32>
    %483 = vector.broadcast %465 : vector<1x32xf32> to vector<2x32xf32>
    %484 = arith.mulf %482, %483 : vector<2x32xf32>
    %485 = vector.broadcast %466 : vector<1x32xf32> to vector<2x32xf32>
    %486 = arith.addf %484, %485 : vector<2x32xf32>
    %c0_212 = arith.constant 0 : index
    %c0_213 = arith.constant 0 : index
    %487 = vector.load %arg19[%c0_212, %c0_213] : memref<32x128xf32, #tpu.memory_space<vmem>>, vector<32x128xf32>
    %cst_214 = arith.constant dense<0.000000e+00> : vector<2x128xf32>
    %488 = tpu.matmul %486, %487, %cst_214 {dimension_numbers = #tpu.dot_dimension_numbers<[1], [0], [0], [1], [0, 0, 1, 1], [], []>} : vector<2x32xf32>, vector<32x128xf32>, vector<2x128xf32> -> vector<2x128xf32>
    %c0_215 = arith.constant 0 : index
    %c0_216 = arith.constant 0 : index
    %489 = vector.load %arg20[%c0_215, %c0_216] : memref<1x128xf32, #tpu.memory_space<vmem>>, vector<1x128xf32>
    %490 = vector.broadcast %489 : vector<1x128xf32> to vector<2x128xf32>
    %491 = arith.addf %488, %490 : vector<2x128xf32>
    %c0_217 = arith.constant 0 : index
    %c0_218 = arith.constant 0 : index
    %492 = vector.load %arg21[%c0_217, %c0_218] : memref<2x128xf32, #tpu.memory_space<vmem>>, vector<2x128xf32>
    tpu.vector_store %arg21[%c0_217, %c0_218], %491 {strides = array<i32>} : memref<2x128xf32, #tpu.memory_space<vmem>>, vector<2x128xf32>,
    return
  }
  func.func @transform_0(%arg0: i32) -> (i32, i32) {
    %c0_i32 = arith.constant 0 : i32
    %c0_i32_0 = arith.constant 0 : i32
    return %arg0, %c0_i32 : i32, i32
  }
  func.func @transform_1(%arg0: i32) -> (i32, i32) {
    %c0_i32 = arith.constant 0 : i32
    %c0_i32_0 = arith.constant 0 : i32
    %c0_i32_1 = arith.constant 0 : i32
    return %c0_i32, %c0_i32_0 : i32, i32
  }
  func.func @transform_2(%arg0: i32) -> (i32, i32) {
    %c0_i32 = arith.constant 0 : i32
    %c0_i32_0 = arith.constant 0 : i32
    %c0_i32_1 = arith.constant 0 : i32
    return %c0_i32, %c0_i32_0 : i32, i32
  }
  func.func @transform_3(%arg0: i32) -> (i32, i32, i32) {
    %c0_i32 = arith.constant 0 : i32
    %c0_i32_0 = arith.constant 0 : i32
    %c0_i32_1 = arith.constant 0 : i32
    %c0_i32_2 = arith.constant 0 : i32
    return %c0_i32, %c0_i32_0, %c0_i32_1 : i32, i32, i32
  }
  func.func @transform_4(%arg0: i32) -> (i32, i32, i32) {
    %c0_i32 = arith.constant 0 : i32
    %c0_i32_0 = arith.constant 0 : i32
    %c0_i32_1 = arith.constant 0 : i32
    %c0_i32_2 = arith.constant 0 : i32
    return %c0_i32, %c0_i32_0, %c0_i32_1 : i32, i32, i32
  }
  func.func @transform_5(%arg0: i32) -> (i32, i32, i32) {
    %c0_i32 = arith.constant 0 : i32
    %c0_i32_0 = arith.constant 0 : i32
    %c0_i32_1 = arith.constant 0 : i32
    %c0_i32_2 = arith.constant 0 : i32
    return %c0_i32, %c0_i32_0, %c0_i32_1 : i32, i32, i32
  }
  func.func @transform_6(%arg0: i32) -> (i32, i32, i32) {
    %c0_i32 = arith.constant 0 : i32
    %c0_i32_0 = arith.constant 0 : i32
    %c0_i32_1 = arith.constant 0 : i32
    %c0_i32_2 = arith.constant 0 : i32
    return %c0_i32, %c0_i32_0, %c0_i32_1 : i32, i32, i32
  }
  func.func @transform_7(%arg0: i32) -> (i32, i32, i32) {
    %c0_i32 = arith.constant 0 : i32
    %c0_i32_0 = arith.constant 0 : i32
    %c0_i32_1 = arith.constant 0 : i32
    %c0_i32_2 = arith.constant 0 : i32
    return %c0_i32, %c0_i32_0, %c0_i32_1 : i32, i32, i32
  }
  func.func @transform_8(%arg0: i32) -> (i32, i32, i32) {
    %c0_i32 = arith.constant 0 : i32
    %c0_i32_0 = arith.constant 0 : i32
    %c0_i32_1 = arith.constant 0 : i32
    %c0_i32_2 = arith.constant 0 : i32
    return %c0_i32, %c0_i32_0, %c0_i32_1 : i32, i32, i32
  }
  func.func @transform_9(%arg0: i32) -> (i32, i32, i32) {
    %c0_i32 = arith.constant 0 : i32
    %c0_i32_0 = arith.constant 0 : i32
    %c0_i32_1 = arith.constant 0 : i32
    %c0_i32_2 = arith.constant 0 : i32
    return %c0_i32, %c0_i32_0, %c0_i32_1 : i32, i32, i32
  }
  func.func @transform_10(%arg0: i32) -> (i32, i32, i32) {
    %c0_i32 = arith.constant 0 : i32
    %c0_i32_0 = arith.constant 0 : i32
    %c0_i32_1 = arith.constant 0 : i32
    %c0_i32_2 = arith.constant 0 : i32
    return %c0_i32, %c0_i32_0, %c0_i32_1 : i32, i32, i32
  }
  func.func @transform_11(%arg0: i32) -> (i32, i32, i32) {
    %c0_i32 = arith.constant 0 : i32
    %c0_i32_0 = arith.constant 0 : i32
    %c0_i32_1 = arith.constant 0 : i32
    %c0_i32_2 = arith.constant 0 : i32
    return %c0_i32, %c0_i32_0, %c0_i32_1 : i32, i32, i32
  }
  func.func @transform_12(%arg0: i32) -> (i32, i32, i32) {
    %c0_i32 = arith.constant 0 : i32
    %c0_i32_0 = arith.constant 0 : i32
    %c0_i32_1 = arith.constant 0 : i32
    %c0_i32_2 = arith.constant 0 : i32
    return %c0_i32, %c0_i32_0, %c0_i32_1 : i32, i32, i32
  }
  func.func @transform_13(%arg0: i32) -> (i32, i32, i32) {
    %c0_i32 = arith.constant 0 : i32
    %c0_i32_0 = arith.constant 0 : i32
    %c0_i32_1 = arith.constant 0 : i32
    %c0_i32_2 = arith.constant 0 : i32
    return %c0_i32, %c0_i32_0, %c0_i32_1 : i32, i32, i32
  }
  func.func @transform_14(%arg0: i32) -> (i32, i32, i32) {
    %c0_i32 = arith.constant 0 : i32
    %c0_i32_0 = arith.constant 0 : i32
    %c0_i32_1 = arith.constant 0 : i32
    %c0_i32_2 = arith.constant 0 : i32
    return %c0_i32, %c0_i32_0, %c0_i32_1 : i32, i32, i32
  }
  func.func @transform_15(%arg0: i32) -> (i32, i32, i32) {
    %c0_i32 = arith.constant 0 : i32
    %c0_i32_0 = arith.constant 0 : i32
    %c0_i32_1 = arith.constant 0 : i32
    %c0_i32_2 = arith.constant 0 : i32
    return %c0_i32, %c0_i32_0, %c0_i32_1 : i32, i32, i32
  }
  func.func @transform_16(%arg0: i32) -> (i32, i32) {
    %c0_i32 = arith.constant 0 : i32
    %c0_i32_0 = arith.constant 0 : i32
    %c0_i32_1 = arith.constant 0 : i32
    return %c0_i32, %c0_i32_0 : i32, i32
  }
  func.func @transform_17(%arg0: i32) -> (i32, i32) {
    %c0_i32 = arith.constant 0 : i32
    %c0_i32_0 = arith.constant 0 : i32
    %c0_i32_1 = arith.constant 0 : i32
    return %c0_i32, %c0_i32_0 : i32, i32
  }
  func.func @transform_18(%arg0: i32) -> (i32, i32) {
    %c0_i32 = arith.constant 0 : i32
    %c0_i32_0 = arith.constant 0 : i32
    %c0_i32_1 = arith.constant 0 : i32
    return %c0_i32, %c0_i32_0 : i32, i32
  }
  func.func @transform_19(%arg0: i32) -> (i32, i32) {
    %c0_i32 = arith.constant 0 : i32
    %c0_i32_0 = arith.constant 0 : i32
    %c0_i32_1 = arith.constant 0 : i32
    return %c0_i32, %c0_i32_0 : i32, i32
  }
  func.func @transform_20(%arg0: i32) -> (i32, i32) {
    %c0_i32 = arith.constant 0 : i32
    %c0_i32_0 = arith.constant 0 : i32
    return %arg0, %c0_i32 : i32, i32
  }
}

</mosaic_0001>

<bundles_post_ra>
// kernel: discriminator_forward.1
= control target key start
LH: loop header
LB: loop body
LE: loop exit
PB: predicated region body
PF: predicated region fallthrough
CT: control target
= control target key end

     0   :  { %vm77_vm0 = vcmask 392192   ;;  %vm157_vm1 = vcmask 261120   ;;  %v3658_v33 = vmov 32.0   ;;  %s3660_s25 = smov 112   ;;  %s5213_s26 = smov 16   ;;  %s5187_s1 = inlined_call_operand.vmem [shape: f32[48,32], index: 1, kind: input, shape index: {}]   ;;  %s5188_s0 = inlined_call_operand.vmem [shape: f32[48,48], index: 0, kind: input, shape index: {}]   ;;  %s5189_s2 = inlined_call_operand.vmem [shape: f32[24,32], index: 2, kind: input, shape index: {}]   ;;  %s5190_s3 = inlined_call_operand.vmem [shape: f32[2,1,32], index: 3, kind: input, shape index: {}]   ;;  %s5191_s4 = inlined_call_operand.vmem [shape: f32[2,1,32], index: 4, kind: input, shape index: {}]   ;;  %s5192_s5 = inlined_call_operand.vmem [shape: f32[2,32,32], index: 5, kind: input, shape index: {}]   ;;  %s5193_s6 = inlined_call_operand.vmem [shape: f32[2,32,32], index: 6, kind: input, shape index: {}]   ;;  %s5194_s7 = inlined_call_operand.vmem [shape: f32[2,32,32], index: 7, kind: input, shape index: {}]   ;;  %s5195_s8 = inlined_call_operand.vmem [shape: f32[2,32,32], index: 8, kind: input, shape index: {}]   ;;  %s5196_s9 = inlined_call_operand.vmem [shape: f32[2,1,32], index: 9, kind: input, shape index: {}]   ;;  %s5197_s10 = inlined_call_operand.vmem [shape: f32[2,1,32], index: 10, kind: input, shape index: {}]   ;;  %s5198_s11 = inlined_call_operand.vmem [shape: f32[2,1,32], index: 11, kind: input, shape index: {}]   ;;  %s5199_s12 = inlined_call_operand.vmem [shape: f32[2,32,128], index: 12, kind: input, shape index: {}]   ;;  %s5200_s13 = inlined_call_operand.vmem [shape: f32[2,1,128], index: 13, kind: input, shape index: {}]   ;;  %s5201_s14 = inlined_call_operand.vmem [shape: f32[2,128,32], index: 14, kind: input, shape index: {}]   ;;  %s5202_s15 = inlined_call_operand.vmem [shape: f32[2,1,32], index: 15, kind: input, shape index: {}]   ;;  %s5203_s16 = inlined_call_operand.vmem [shape: f32[1,32], index: 16, kind: input, shape index: {}]   ;;  %s5204_s17 = inlined_call_operand.vmem [shape: f32[1,32], index: 17, kind: input, shape index: {}]   ;;  %s5205_s19 = inlined_call_operand.vmem [shape: f32[1,128], index: 19, kind: input, shape index: {}]   ;;  %s5206_s18 = inlined_call_operand.vmem [shape: f32[32,128], index: 18, kind: input, shape index: {}]   ;;  %s5207_s20 = inlined_call_operand.vmem [shape: f32[2,128], index: 20, kind: output, shape index: {}]  }
   0x1   :  { %5216 = sst [smem:[#allocation2_spill]] %s5187_s1  ;;  %3474 = vrcp.f32 %v3658_v33  ;;  %s5214_s27 = smov 24  }
   0x2   :  { %5217 = sst [smem:[#allocation3_spill]] %s5188_s0 }
   0x3   :  { %5218 = sst [smem:[#allocation4_spill]] %s5189_s2  ;;  %s3659_s2 = smov 120  }
   0x4   :  { %5219 = sst [smem:[#allocation5_spill]] %s5190_s3  ;;  %s5215_s3 = smov 8  }
   0x5   :  { %5220 = sst [smem:[#allocation6_spill]] %s5191_s4 }
   0x6   :  { %s5221_s23 = sld [smem:[#allocation2_spill]] }
   0x7   :  { %s5222_s0 = sld [smem:[#allocation3_spill]]  ;;  %v3475_v34 = vpop.eup %3474 }
   0x8   :  { %s5223_s1 = sld [smem:[#allocation4_spill]]  ;;  %v177_v35 = vmul.f32 32.0, %v3475_v34  ;;  %vm181_vm2 = vweird.f32 %v3475_v34 }
   0x9   :  { %s5224_s21 = sld [smem:[#allocation5_spill]] }
   0xa   :  { %v178_v36 = vsub.f32 1.0, %v177_v35  ;;  %s5225_s24 = sld [smem:[#allocation6_spill]] }
   0xc   :  { %v76_v0 = vld [vmem:[%s5221_s23 + $0x28] sm:$0xff]  ;;  %v75_v1 = vld [vmem:[%s5221_s23 + $0x20] sm:$0xff]  ;;  %v74_v2 = vld [vmem:[%s5221_s23 + $0x18] sm:$0xff]  ;;  %v179_v37 = vmul.f32 %v3475_v34, %v178_v36 }
   0xd   :  { %106 = vmatpush.msra.mxu0 %v76_v0  ;;  %v73_v3 = vld [vmem:[%s5221_s23 + $0x10] sm:$0xff]  ;;  %v72_v4 = vld [vmem:[%s5221_s23 + $0x8] sm:$0xff]  ;;  %v71_v5 = vld [vmem:[%s5221_s23] sm:$0xff]  ;;  %s3661_s23 = smov 104  }
   0xe   :  { %v65_v6 = vld [vmem:[%s5222_s0] sm:$0xff]  ;;  %v66_v7 = vld [vmem:[%s5222_s0 + $0x8] sm:$0xff]  ;;  %v67_v8 = vld [vmem:[%s5222_s0 + $0x10] sm:$0xff]  ;;  %v180_v38 = vadd.f32 %v3475_v34, %v179_v37 }
   0xf   :  { %107 = vmatpush.msra.mxu0 %v75_v1  ;;  %v68_v9 = vld [vmem:[%s5222_s0 + $0x18] sm:$0xff]  ;;  %v69_v10 = vld [vmem:[%s5222_s0 + $0x20] sm:$0xff]  ;;  %v70_v11 = vld [vmem:[%s5222_s0 + $0x28] sm:$0xff] }
  0x10   :  { %v131_v12 = vld [vmem:[%s5223_s1] sm:$0xff]  ;;  %v132_v16 = vld [vmem:[%s5223_s1 + $0x8] sm:$0xff]  ;;  %v133_v20 = vld [vmem:[%s5223_s1 + $0x10] sm:$0xff]  ;;  %v3848_v39 = vsel %vm181_vm2, %v3475_v34, %v180_v38 }
  0x11   :  { %108 = vmatpush.msra.mxu0 %v74_v2 }
  0x13   :  { %109 = vmatpush.msra.mxu0 %v73_v3 }
  0x15   :  { %110 = vmatpush.msra.mxu0 %v72_v4 }
  0x17   :  { %111 = vmatpush.msra.mxu0 %v71_v5 }
  0x18   :  { %3156 = vmatmul.msk.f32.vlgmr.msra.gmra.mxu0 %vm77_vm0, %v65_v6  ;;  %v318_v6 = vld [vmem:[%s5192_s5 + $0x18] sm:$0xff] }
  0x19   :  { %349 = vmatpush.msra.mxu1 %v318_v6 }
  0x20   :  { %3157 = vmatmul.msk.f32.gmra.mxu0 %vm77_vm0, %v66_v7  ;;  %v375_v7 = vld [vmem:[%s5193_s6 + $0x18] sm:$0xff] }
  0x21   :  { %388 = vmatpush.msra.mxu2 %v375_v7 }
  0x28   :  { %3158 = vmatmul.msk.f32.gmra.mxu0 %vm77_vm0, %v67_v8  ;;  %v414_v8 = vld [vmem:[%s5194_s7 + $0x18] sm:$0xff] }
  0x29   :  { %427 = vmatpush.msra.mxu3 %v414_v8 }
  0x30   :  { %3159 = vmatmul.msk.f32.gmra.mxu0 %vm77_vm0, %v68_v9  ;;  %v317_v9 = vld [vmem:[%s5192_s5 + $0x10] sm:$0xff] }
  0x31   :  { %350 = vmatpush.msra.mxu1 %v317_v9 }
  0x38   :  { %3160 = vmatmul.msk.f32.gmra.mxu0 %vm77_vm0, %v69_v10  ;;  %v374_v10 = vld [vmem:[%s5193_s6 + $0x10] sm:$0xff] }
  0x39   :  { %389 = vmatpush.msra.mxu2 %v374_v10 }
  0x40   :  { %3161 = vmatmul.msk.f32.gmra.mxu0 %vm77_vm0, %v70_v11  ;;  %v413_v11 = vld [vmem:[%s5194_s7 + $0x10] sm:$0xff] }
  0x41   :  { %428 = vmatpush.msra.mxu3 %v413_v11 }
  0x95   :  { %v113_v13 = vpop.f32.mrf.mxu0 }
  0x96   :  { %v3818_v14 = vadd.f32 %v131_v12, %v113_v13  ;;  %v373_v13 = vld [vmem:[%s5193_s6 + $0x8] sm:$0xff] }
  0x97   :  { %390 = vmatpush.msra.mxu2 %v373_v13 }
  0x98   :  { %v158_v15 = vsel %vm157_vm1, %v3818_v14, 0.0 }
  0x99   :  { %159 = vadd.xlane.f32.xlu0 %v158_v15  ;;  %v412_v15 = vld [vmem:[%s5194_s7 + $0x8] sm:$0xff] }
  0x9a   :  { %429 = vmatpush.msra.mxu3 %v412_v15 }
  0x9d   :  { %v116_v17 = vpop.f32.mrf.mxu0 }
  0x9e   :  { %v3825_v18 = vadd.f32 %v132_v16, %v116_v17  ;;  %v372_v17 = vld [vmem:[%s5193_s6] sm:$0xff] }
  0x9f   :  { %391 = vmatpush.msra.mxu2 %v372_v17 }
  0xa0   :  { %v161_v19 = vsel %vm157_vm1, %v3825_v18, 0.0 }
  0xa1   :  { %162 = vadd.xlane.f32.xlu0 %v161_v19  ;;  %v411_v19 = vld [vmem:[%s5194_s7] sm:$0xff] }
  0xa2   :  { %430 = vmatpush.msra.mxu3 %v411_v19 }
  0xa5   :  { %v119_v21 = vpop.f32.mrf.mxu0 }
  0xa6   :  { %v3832_v22 = vadd.f32 %v133_v20, %v119_v21 }
  0xa8   :  { %v164_v23 = vsel %vm157_vm1, %v3832_v22, 0.0 }
  0xa9   :  { %165 = vadd.xlane.f32.xlu1 %v164_v23 }
  0xad   :  { %v122_v24 = vpop.f32.mrf.mxu0 }
  0xae   :  { %v3836_v25 = vadd.f32 %v131_v12, %v122_v24  ;;  %v316_v12 = vld [vmem:[%s5192_s5 + $0x8] sm:$0xff] }
  0xaf   :  { %351 = vmatpush.msra.mxu1 %v316_v12 }
  0xb0   :  { %v167_v26 = vsel %vm157_vm1, %v3836_v25, 0.0 }
  0xb1   :  { %168 = vadd.xlane.f32.xlu1 %v167_v26 }
  0xb5   :  { %v125_v27 = vpop.f32.mrf.mxu0 }
  0xb6   :  { %v3840_v28 = vadd.f32 %v132_v16, %v125_v27  ;;  %v315_v16 = vld [vmem:[%s5192_s5] sm:$0xff] }
  0xb7   :  { %352 = vmatpush.msra.mxu1 %v315_v16 }
  0xb8   :  { %v170_v29 = vsel %vm157_vm1, %v3840_v28, 0.0 }
  0xb9   :  { %171 = vadd.xlane.f32.xlu2 %v170_v29 }
  0xbd   :  { %v128_v30 = vpop.f32.mrf.mxu0 }
  0xbe   :  { %v3844_v31 = vadd.f32 %v133_v20, %v128_v30 }
  0xc0   :  { %v173_v32 = vsel %vm157_vm1, %v3844_v31, 0.0 }
  0xc1   :  { %174 = vadd.xlane.f32.xlu2 %v173_v32 }
 0x10c   :  { %v160_v40 = vpop.xlane.xlu0 %159 }
 0x10d   :  { %v183_v41 = vmul.f32 %v3848_v39, %v160_v40 }
 0x10f   :  { %v3852_v42 = vsub.f32 %v3818_v14, %v183_v41 }
 0x111   :  { %v195_v43 = vmul.f32 %v3852_v42, %v3852_v42 }
 0x113   :  { %v201_v44 = vsel %vm157_vm1, %v195_v43, 0.0  ;;  %v3934_v43 = vld [vmem:[%s5224_s21] ss:$0 sm:$0xff] }
 0x114   :  { %202 = vadd.xlane.f32.xlu0 %v201_v44  ;;  %v163_v45 = vpop.xlane.xlu0 %162 }
 0x115   :  { %v184_v46 = vmul.f32 %v3848_v39, %v163_v45 }
 0x117   :  { %v3859_v47 = vsub.f32 %v3825_v18, %v184_v46 }
 0x119   :  { %v196_v48 = vmul.f32 %v3859_v47, %v3859_v47 }
 0x11b   :  { %v204_v49 = vsel %vm157_vm1, %v196_v48, 0.0  ;;  %v3940_v48 = vld [vmem:[%s5225_s24] ss:$0 sm:$0xff] }
 0x11c   :  { %v166_v50 = vpop.xlane.xlu1 %165  ;;  %205 = vadd.xlane.f32.xlu1 %v204_v49 }
 0x11d   :  { %v185_v51 = vmul.f32 %v3848_v39, %v166_v50 }
 0x11f   :  { %v3866_v52 = vsub.f32 %v3832_v22, %v185_v51 }
 0x121   :  { %v197_v53 = vmul.f32 %v3866_v52, %v3866_v52 }
 0x123   :  { %v207_v54 = vsel %vm157_vm1, %v197_v53, 0.0 }
 0x124   :  { %v169_v55 = vpop.xlane.xlu1 %168  ;;  %208 = vadd.xlane.f32.xlu2 %v207_v54 }
 0x125   :  { %v186_v56 = vmul.f32 %v3848_v39, %v169_v55 }
 0x127   :  { %v3873_v57 = vsub.f32 %v3836_v25, %v186_v56 }
 0x129   :  { %v198_v58 = vmul.f32 %v3873_v57, %v3873_v57 }
 0x12b   :  { %v210_v59 = vsel %vm157_vm1, %v198_v58, 0.0 }
 0x12c   :  { %211 = vadd.xlane.f32.xlu0 %v210_v59  ;;  %v172_v60 = vpop.xlane.xlu2 %171 }
 0x12d   :  { %v187_v61 = vmul.f32 %v3848_v39, %v172_v60 }
 0x12f   :  { %v3880_v62 = vsub.f32 %v3840_v28, %v187_v61 }
 0x131   :  { %v199_v63 = vmul.f32 %v3880_v62, %v3880_v62 }
 0x133   :  { %v213_v0 = vsel %vm157_vm1, %v199_v63, 0.0 }
 0x134   :  { %214 = vadd.xlane.f32.xlu1 %v213_v0  ;;  %v175_v1 = vpop.xlane.xlu2 %174 }
 0x135   :  { %v188_v2 = vmul.f32 %v3848_v39, %v175_v1 }
 0x137   :  { %v3887_v3 = vsub.f32 %v3844_v31, %v188_v2 }
 0x139   :  { %v200_v4 = vmul.f32 %v3887_v3, %v3887_v3 }
 0x13b   :  { %v216_v5 = vsel %vm157_vm1, %v200_v4, 0.0 }
 0x13c   :  { %217 = vadd.xlane.f32.xlu2 %v216_v5 }
 0x187   :  { %v203_v20 = vpop.xlane.xlu0 %202 }
 0x188   :  { %v219_v21 = vmul.f32 %v203_v20, %v3848_v39 }
 0x18a   :  { %v225_v23 = vadd.f32 1e-05, %v219_v21 }
 0x18c   :  { %3476 = vrsqrt.f32 %v225_v23  ;;  %vm237_vm4 = vweird.f32 %v225_v23 }
 0x18f   :  { %v206_v24 = vpop.xlane.xlu1 %205 }
 0x190   :  { %v220_v26 = vmul.f32 %v206_v24, %v3848_v39 }
 0x192   :  { %v3477_v27 = vpop.eup %3476  ;;  %v226_v29 = vadd.f32 1e-05, %v220_v26 }
 0x193   :  { %v232_v30 = vmul.f32 %v3477_v27, %v225_v23  ;;  %vm238_vm3 = vweird.f32 %v3477_v27 }
 0x194   :  { %3478 = vrsqrt.f32 %v226_v29  ;;  %vm239_vm5 = vmor %vm237_vm4, %vm238_vm3  ;;  %vm247_vm7 = vweird.f32 %v226_v29 }
 0x195   :  { %v233_v32 = vmul.f32 %v3477_v27, %v232_v30 }
 0x197   :  { %v234_v33 = vmul.f32 0.5, %v233_v32  ;;  %v209_v34 = vpop.xlane.xlu2 %208 }
 0x198   :  { %v221_v35 = vmul.f32 %v209_v34, %v3848_v39 }
 0x199   :  { %v235_v36 = vsub.f32 1.5, %v234_v33 }
 0x19a   :  { %v3479_v37 = vpop.eup %3478  ;;  %v227_v38 = vadd.f32 1e-05, %v221_v35 }
 0x19b   :  { %v236_v40 = vmul.f32 %v3477_v27, %v235_v36  ;;  %v242_v41 = vmul.f32 %v3479_v37, %v226_v29  ;;  %vm248_vm6 = vweird.f32 %v3479_v37 }
 0x19c   :  { %3480 = vrsqrt.f32 %v227_v38  ;;  %vm249_vm8 = vmor %vm247_vm7, %vm248_vm6  ;;  %vm257_vm10 = vweird.f32 %v227_v38  ;;  %vm450_vm7 = vcmask 64512  }
 0x19d   :  { %v243_v44 = vmul.f32 %v3479_v37, %v242_v41  ;;  %v240_v45 = vsel %vm239_vm5, %v3477_v27, %v236_v40 }
 0x19e   :  { %v291_v46 = vmul.f32 %v240_v45, %v3852_v42 }
 0x19f   :  { %v244_v49 = vmul.f32 0.5, %v243_v44  ;;  %v212_v50 = vpop.xlane.xlu0 %211 }
 0x1a0   :  { %v222_v51 = vmul.f32 %v212_v50, %v3848_v39  ;;  %v300_v53 = vmul.f32 %v3934_v43, %v291_v46 }
 0x1a1   :  { %v245_v54 = vsub.f32 1.5, %v244_v49 }
 0x1a2   :  { %v3481_v55 = vpop.eup %3480  ;;  %v228_v56 = vadd.f32 1e-05, %v222_v51  ;;  %v309_v58 = vadd.f32 %v3940_v48, %v300_v53 }
 0x1a3   :  { %v246_v59 = vmul.f32 %v3479_v37, %v245_v54  ;;  %v252_v42 = vmul.f32 %v3481_v55, %v227_v38  ;;  %vm258_vm9 = vweird.f32 %v3481_v55 }
 0x1a4   :  { %3482 = vrsqrt.f32 %v228_v56  ;;  %3163 = vmatmul.msk.f32.vlgmr.msra.gmra.mxu1 %vm157_vm1, %v309_v58  ;;  %3169 = vmatmul.msk.f32.vlgmr.msra.gmra.mxu2 %vm157_vm1, %v309_v58  ;;  %vm259_vm11 = vmor %vm257_vm10, %vm258_vm9  ;;  %vm267_vm13 = vweird.f32 %v228_v56  ;;  %vm551_vm9 = vcmask 195584   ;;  %vm1570_vm10 = vcmask 130048  }
 0x1a5   :  { %v253_v60 = vmul.f32 %v3481_v55, %v252_v42  ;;  %3175 = vmatmul.msk.f32.vlgmr.msra.gmra.mxu3 %vm157_vm1, %v309_v58  ;;  %v250_v61 = vsel %vm249_vm8, %v3479_v37, %v246_v59 }
 0x1a6   :  { %v292_v63 = vmul.f32 %v250_v61, %v3859_v47 }
 0x1a7   :  { %v254_v0 = vmul.f32 0.5, %v253_v60  ;;  %v215_v1 = vpop.xlane.xlu1 %214 }
 0x1a8   :  { %v223_v2 = vmul.f32 %v215_v1, %v3848_v39  ;;  %v301_v4 = vmul.f32 %v3934_v43, %v292_v63 }
 0x1a9   :  { %v255_v5 = vsub.f32 1.5, %v254_v0 }
 0x1aa   :  { %v3483_v6 = vpop.eup %3482  ;;  %v229_v7 = vadd.f32 1e-05, %v223_v2  ;;  %v310_v8 = vadd.f32 %v3940_v48, %v301_v4 }
 0x1ab   :  { %v256_v9 = vmul.f32 %v3481_v55, %v255_v5  ;;  %v262_v10 = vmul.f32 %v3483_v6, %v228_v56  ;;  %vm268_vm12 = vweird.f32 %v3483_v6 }
 0x1ac   :  { %3484 = vrsqrt.f32 %v229_v7  ;;  %3164 = vmatmul.msk.f32.gmra.mxu1 %vm157_vm1, %v310_v8  ;;  %3170 = vmatmul.msk.f32.gmra.mxu2 %vm157_vm1, %v310_v8  ;;  %vm269_vm14 = vmor %vm267_vm13, %vm268_vm12  ;;  %vm277_vm2 = vweird.f32 %v229_v7 }
 0x1ad   :  { %v263_v47 = vmul.f32 %v3483_v6, %v262_v10  ;;  %3176 = vmatmul.msk.f32.gmra.mxu3 %vm157_vm1, %v310_v8  ;;  %v260_v11 = vsel %vm259_vm11, %v3481_v55, %v256_v9 }
 0x1ae   :  { %v293_v12 = vmul.f32 %v260_v11, %v3866_v52 }
 0x1af   :  { %v264_v13 = vmul.f32 0.5, %v263_v47  ;;  %v218_v15 = vpop.xlane.xlu2 %217 }
 0x1b0   :  { %v224_v16 = vmul.f32 %v218_v15, %v3848_v39  ;;  %v302_v17 = vmul.f32 %v3934_v43, %v293_v12 }
 0x1b1   :  { %v265_v19 = vsub.f32 1.5, %v264_v13 }
 0x1b2   :  { %v3485_v20 = vpop.eup %3484  ;;  %v230_v21 = vadd.f32 1e-05, %v224_v16  ;;  %v311_v23 = vadd.f32 %v3940_v48, %v302_v17 }
 0x1b3   :  { %v266_v24 = vmul.f32 %v3483_v6, %v265_v19  ;;  %v272_v26 = vmul.f32 %v3485_v20, %v229_v7  ;;  %vm278_vm15 = vweird.f32 %v3485_v20 }
 0x1b4   :  { %3486 = vrsqrt.f32 %v230_v21  ;;  %3165 = vmatmul.msk.f32.gmra.mxu1 %vm157_vm1, %v311_v23  ;;  %3171 = vmatmul.msk.f32.gmra.mxu2 %vm157_vm1, %v311_v23  ;;  %vm279_vm3 = vmor %vm277_vm2, %vm278_vm15  ;;  %vm287_vm5 = vweird.f32 %v230_v21 }
 0x1b5   :  { %v273_v52 = vmul.f32 %v3485_v20, %v272_v26  ;;  %3177 = vmatmul.msk.f32.gmra.mxu3 %vm157_vm1, %v311_v23  ;;  %v270_v27 = vsel %vm269_vm14, %v3483_v6, %v266_v24  ;;  %v140_v26 = vlaneseq }
 0x1b6   :  { %v294_v29 = vmul.f32 %v270_v27, %v3873_v57 }
 0x1b7   :  { %v274_v30 = vmul.f32 0.5, %v273_v52 }
 0x1b8   :  { %v303_v32 = vmul.f32 %v3934_v43, %v294_v29 }
 0x1b9   :  { %v275_v33 = vsub.f32 1.5, %v274_v30  ;;  %v4059_v30 = vand.u32 127, %v140_v26 }
 0x1ba   :  { %v3487_v34 = vpop.eup %3486  ;;  %v312_v35 = vadd.f32 %v3940_v48, %v303_v32 }
 0x1bb   :  { %v276_v36 = vmul.f32 %v3485_v20, %v275_v33  ;;  %v282_v37 = vmul.f32 %v3487_v34, %v230_v21  ;;  %vm288_vm4 = vweird.f32 %v3487_v34  ;;  %vm142_vm8 = vcmp.lt.s32.totalorder %v4059_v30, 17 }
 0x1bc   :  { %3166 = vmatmul.msk.f32.gmra.mxu1 %vm157_vm1, %v312_v35  ;;  %3172 = vmatmul.msk.f32.gmra.mxu2 %vm157_vm1, %v312_v35  ;;  %vm289_vm6 = vmor %vm287_vm5, %vm288_vm4 }
 0x1bd   :  { %v283_v38 = vmul.f32 %v3487_v34, %v282_v37  ;;  %3178 = vmatmul.msk.f32.gmra.mxu3 %vm157_vm1, %v312_v35  ;;  %v280_v57 = vsel %vm279_vm3, %v3485_v20, %v276_v36 }
 0x1be   :  { %v295_v40 = vmul.f32 %v280_v57, %v3880_v62 }
 0x1bf   :  { %v284_v41 = vmul.f32 0.5, %v283_v38 }
 0x1c0   :  { %v304_v44 = vmul.f32 %v3934_v43, %v295_v40 }
 0x1c1   :  { %v285_v45 = vsub.f32 1.5, %v284_v41 }
 0x1c2   :  { %v313_v46 = vadd.f32 %v3940_v48, %v304_v44 }
 0x1c3   :  { %v286_v49 = vmul.f32 %v3487_v34, %v285_v45 }
 0x1c4   :  { %3167 = vmatmul.msk.f32.gmra.mxu1 %vm157_vm1, %v313_v46  ;;  %3173 = vmatmul.msk.f32.gmra.mxu2 %vm157_vm1, %v313_v46 }
 0x1c5   :  { %3179 = vmatmul.msk.f32.gmra.mxu3 %vm157_vm1, %v313_v46  ;;  %v290_v50 = vsel %vm289_vm6, %v3487_v34, %v286_v49  ;;  %v3662_v34 = vmov -1e+30  }
 0x1c6   :  { %v296_v51 = vmul.f32 %v290_v50, %v3887_v3  ;;  %v4065_v35 = vsel %vm142_vm8, 0.0, %v3662_v34 }
 0x1c8   :  { %v305_v62 = vmul.f32 %v3934_v43, %v296_v51 }
 0x1ca   :  { %v314_v53 = vadd.f32 %v3940_v48, %v305_v62 }
 0x1cc   :  { %3168 = vmatmul.msk.f32.gmra.mxu1 %vm157_vm1, %v314_v53  ;;  %3174 = vmatmul.msk.f32.gmra.mxu2 %vm157_vm1, %v314_v53 }
 0x1cd   :  { %3180 = vmatmul.msk.f32.gmra.mxu3 %vm157_vm1, %v314_v53 }
 0x221   :  { %v354_v54 = vpop.f32.mrf.mxu1 }
 0x222   :  { %688 = vrot.lane.b32.xlu0 %v354_v54, %s3659_s2 }
 0x227   :  { %v393_v55 = vpop.f32.mrf.mxu2 }
 0x228   :  { %v3981_v56 = vpop.f32.mrf.mxu3  ;;  %694 = vrot.lane.b32.xlu2 %v393_v55, %s3659_s2 }
 0x229   :  { %v357_v3 = vpop.f32.mrf.mxu1 }
 0x22f   :  { %v396_v58 = vpop.f32.mrf.mxu2 }
 0x230   :  { %v3984_v43 = vpop.f32.mrf.mxu3  ;;  %968 = vrot.lane.b32.xlu0 %v396_v58, %s3660_s25  ;;  %696 = vrot.lane.b32.xlu1 %v396_v58, %s3659_s2 }
 0x231   :  { %690 = vrot.lane.b32.xlu2 %v357_v3, %s3659_s2  ;;  %v360_v42 = vpop.f32.mrf.mxu1 }
 0x237   :  { %v399_v48 = vpop.f32.mrf.mxu2 }
 0x238   :  { %v438_v59 = vpop.f32.mrf.mxu3  ;;  %966 = vrot.lane.b32.xlu1 %v393_v55, %s3660_s25  ;;  %698 = vrot.lane.b32.xlu0 %v399_v48, %s3659_s2 }
 0x239   :  { %960 = vrot.lane.b32.xlu2 %v354_v54, %s3660_s25  ;;  %640 = vmatpush.msrb.mxu3 %v438_v59  ;;  %v363_v63 = vpop.f32.mrf.mxu1  ;;  %v4033_v8 = vpack.i.bf16 %v3984_v43, %v438_v59 }
 0x23a   :  { %3181 = vmatpush.xpose.msk.msrb.mxu1 %vm450_vm7, %v399_v48 }
 0x23b   :  { %641 = vmatpush.msrb.mxu3 %v3984_v43 }
 0x23d   :  { %642 = vmatpush.msrb.mxu3 %v3981_v56 }
 0x23e   :  { %3182 = vmatpush.xpose.msk.msrb.mxu1 %vm450_vm7, %v396_v58 }
 0x23f   :  { %v402_v60 = vpop.f32.mrf.mxu2 }
 0x240   :  { %v441_v61 = vpop.f32.mrf.mxu3  ;;  %970 = vrot.lane.b32.xlu0 %v399_v48, %s3660_s25 }
 0x241   :  { %692 = vrot.lane.b32.xlu2 %v360_v42, %s3659_s2  ;;  %v366_v2 = vpop.f32.mrf.mxu1 }
 0x242   :  { %3183 = vmatpush.xpose.msk.msrb.mxu1 %vm450_vm7, %v393_v55 }
 0x245   :  { %3184 = vmatmul.msk.f32.vlgmr.msrb.gmra.mxu1 %vm450_vm7, %v354_v54 }
 0x247   :  { %v405_v0 = vpop.f32.mrf.mxu2 }
 0x248   :  { %v444_v1 = vpop.f32.mrf.mxu3  ;;  %746 = vrot.lane.b32.xlu1 %v405_v0, %s3659_s2  ;;  %738 = vrot.lane.b32.xlu0 %v363_v63, %s3659_s2 }
 0x249   :  { %744 = vrot.lane.b32.xlu2 %v402_v60, %s3659_s2  ;;  %v369_v6 = vpop.f32.mrf.mxu1  ;;  %v4040_v10 = vpack.i.bf16 %v441_v61, %v444_v1 }
 0x24d   :  { %3185 = vmatmul.msk.f32.gmra.mxu1 %vm450_vm7, %v357_v3 }
 0x24f   :  { %v408_v4 = vpop.f32.mrf.mxu2 }
 0x250   :  { %v447_v5 = vpop.f32.mrf.mxu3  ;;  %962 = vrot.lane.b32.xlu0 %v357_v3, %s3660_s25  ;;  %748 = vrot.lane.b32.xlu1 %v408_v4, %s3659_s2 }
 0x251   :  { %964 = vrot.lane.b32.xlu2 %v360_v42, %s3660_s25  ;;  %675 = vmatpush.msrb.mxu0 %v447_v5  ;;  %v4046_v11 = vpack.i.bf16 %v447_v5, %v3981_v56 }
 0x252   :  { %3187 = vmatpush.xpose.msk.msrb.mxu2 %vm450_vm7, %v408_v4 }
 0x253   :  { %676 = vmatpush.msrb.mxu0 %v444_v1 }
 0x255   :  { %3186 = vmatmul.msk.f32.gmra.mxu1 %vm450_vm7, %v360_v42  ;;  %677 = vmatpush.msrb.mxu0 %v441_v61 }
 0x256   :  { %3188 = vmatpush.xpose.msk.msrb.mxu2 %vm450_vm7, %v405_v0 }
 0x258   :  { %740 = vrot.lane.b32.xlu1 %v366_v2, %s3659_s2  ;;  %742 = vrot.lane.b32.xlu0 %v369_v6, %s3659_s2 }
 0x259   :  { %1020 = vrot.lane.b32.xlu2 %v408_v4, %s3660_s25 }
 0x25a   :  { %3189 = vmatpush.xpose.msk.msrb.mxu2 %vm450_vm7, %v402_v60 }
 0x25d   :  { %3190 = vmatmul.msk.f32.vlgmr.msrb.gmra.mxu2 %vm450_vm7, %v363_v63 }
 0x260   :  { %1236 = vrot.lane.b32.xlu1 %v399_v48, %s3661_s23  ;;  %1234 = vrot.lane.b32.xlu0 %v396_v58, %s3661_s23 }
 0x261   :  { %1016 = vrot.lane.b32.xlu2 %v402_v60, %s3660_s25 }
 0x265   :  { %3191 = vmatmul.msk.f32.gmra.mxu2 %vm450_vm7, %v366_v2 }
 0x268   :  { %1018 = vrot.lane.b32.xlu1 %v405_v0, %s3660_s25  ;;  %1010 = vrot.lane.b32.xlu0 %v363_v63, %s3660_s25 }
 0x269   :  { %1226 = vrot.lane.b32.xlu2 %v354_v54, %s3661_s23 }
 0x26d   :  { %3192 = vmatmul.msk.f32.gmra.mxu2 %vm450_vm7, %v369_v6 }
 0x270   :  { %1232 = vrot.lane.b32.xlu1 %v393_v55, %s3661_s23  ;;  %1228 = vrot.lane.b32.xlu0 %v357_v3, %s3661_s23 }
 0x271   :  { %1286 = vrot.lane.b32.xlu2 %v408_v4, %s3661_s23 }
 0x278   :  { %1012 = vrot.lane.b32.xlu1 %v366_v2, %s3660_s25  ;;  %1230 = vrot.lane.b32.xlu0 %v360_v42, %s3661_s23 }
 0x279   :  { %1284 = vrot.lane.b32.xlu2 %v405_v0, %s3661_s23 }
 0x280   :  { %1014 = vrot.lane.b32.xlu1 %v369_v6, %s3660_s25  ;;  %1276 = vrot.lane.b32.xlu0 %v363_v63, %s3661_s23 }
 0x281   :  { %1278 = vrot.lane.b32.xlu2 %v366_v2, %s3661_s23 }
 0x282   :  { %v695_v7 = vpop.permute.xlu2 %694 }
 0x288   :  { %1282 = vrot.lane.b32.xlu1 %v402_v60, %s3661_s23  ;;  %3373 = vrot.lane.b32.xlu0 %v4033_v8, %s3660_s25 }
 0x289   :  { %3368 = vrot.lane.b32.xlu2 %v4033_v8, %s3659_s2 }
 0x28b   :  { %v691_v9 = vpop.permute.xlu2 %690 }
 0x290   :  { %1280 = vrot.lane.b32.xlu1 %v369_v6, %s3661_s23 }
 0x291   :  { %3378 = vrot.lane.b32.xlu2 %v4040_v10, %s3659_s2 }
 0x293   :  { %v961_v47 = vpop.permute.xlu2 %960 }
 0x294   :  { %v689_v12 = vpop.permute.xlu0 %688 }
 0x298   :  { %3383 = vrot.lane.b32.xlu1 %v4046_v11, %s3659_s2 }
 0x29b   :  { %v693_v13 = vpop.permute.xlu2 %692 }
 0x2a0   :  { %3388 = vrot.lane.b32.xlu1 %v4046_v11, %s3660_s25 }
 0x2a2   :  { %v969_v15 = vpop.permute.xlu0 %968  ;;  %v697_v17 = vpop.permute.xlu1 %696 }
 0x2a3   :  { %v745_v16 = vpop.permute.xlu2 %744 }
 0x2aa   :  { %v699_v19 = vpop.permute.xlu0 %698  ;;  %v967_v21 = vpop.permute.xlu1 %966 }
 0x2ab   :  { %v965_v20 = vpop.permute.xlu2 %964  ;;  %3199 = vmatpush.xpose.msk.msra.mxu1 %vm450_vm7, %v699_v19 }
 0x2af   :  { %3200 = vmatpush.xpose.msk.msra.mxu1 %vm450_vm7, %v697_v17 }
 0x2b2   :  { %v971_v23 = vpop.permute.xlu0 %970 }
 0x2b3   :  { %v1021_v24 = vpop.permute.xlu2 %1020  ;;  %3201 = vmatpush.xpose.msk.msra.mxu1 %vm450_vm7, %v695_v7 }
 0x2b6   :  { %3202 = vmatmul.msk.f32.vlgmr.msra.gmra.mxu1 %vm450_vm7, %v689_v12 }
 0x2b7   :  { %3217 = vmatpush.xpose.msk.msrb.mxu1 %vm450_vm7, %v971_v23 }
 0x2ba   :  { %v747_v52 = vpop.permute.xlu1 %746  ;;  %v739_v27 = vpop.permute.xlu0 %738 }
 0x2bb   :  { %3218 = vmatpush.xpose.msk.msrb.mxu1 %vm450_vm7, %v969_v15  ;;  %v1017_v29 = vpop.permute.xlu2 %1016 }
 0x2be   :  { %3203 = vmatmul.msk.f32.gmra.mxu1 %vm450_vm7, %v691_v9 }
 0x2bf   :  { %3219 = vmatpush.xpose.msk.msrb.mxu1 %vm450_vm7, %v967_v21 }
 0x2c2   :  { %v486_v32 = vpop.f32.mrf.mxu1  ;;  %v963_v33 = vpop.permute.xlu0 %962 }
 0x2c3   :  { %v539_v36 = vmul.f32 0.35355338, %v486_v32  ;;  %v749_v37 = vpop.permute.xlu1 %748  ;;  %v1227_v38 = vpop.permute.xlu2 %1226 }
 0x2c4   :  { %3205 = vmatpush.xpose.msk.msra.mxu2 %vm450_vm7, %v749_v37 }
 0x2c5   :  { %v4069_v57 = vadd.f32 %v539_v36, %v4065_v35 }
 0x2c6   :  { %3204 = vmatmul.msk.f32.gmra.mxu1 %vm450_vm7, %v693_v13 }
 0x2c7   :  { %v552_v40 = vsel %vm551_vm9, %v4069_v57, -inf }
 0x2c8   :  { %553 = vmax.xlane.f32.xlu0 %v552_v40  ;;  %3206 = vmatpush.xpose.msk.msra.mxu2 %vm450_vm7, %v747_v52 }
 0x2ca   :  { %v489_v41 = vpop.f32.mrf.mxu1  ;;  %v743_v49 = vpop.permute.xlu0 %742 }
 0x2cb   :  { %v540_v44 = vmul.f32 0.35355338, %v489_v41  ;;  %v741_v45 = vpop.permute.xlu1 %740  ;;  %v1287_v46 = vpop.permute.xlu2 %1286 }
 0x2cc   :  { %3207 = vmatpush.xpose.msk.msra.mxu2 %vm450_vm7, %v745_v16 }
 0x2cd   :  { %v4078_v50 = vadd.f32 %v540_v44, %v4065_v35 }
 0x2ce   :  { %3220 = vmatmul.msk.f32.vlgmr.msrb.gmra.mxu1 %vm450_vm7, %v961_v47 }
 0x2cf   :  { %v555_v51 = vsel %vm551_vm9, %v4078_v50, -inf  ;;  %3208 = vmatmul.msk.f32.vlgmr.msra.gmra.mxu2 %vm450_vm7, %v739_v27 }
 0x2d0   :  { %3223 = vmatpush.xpose.msk.msrb.mxu2 %vm450_vm7, %v1021_v24  ;;  %556 = vmax.xlane.f32.xlu2 %v555_v51 }
 0x2d2   :  { %v492_v62 = vpop.f32.mrf.mxu1  ;;  %v1235_v3 = vpop.permute.xlu0 %1234 }
 0x2d3   :  { %v541_v53 = vmul.f32 0.35355338, %v492_v62  ;;  %v1237_v54 = vpop.permute.xlu1 %1236  ;;  %v1285_v55 = vpop.permute.xlu2 %1284 }
 0x2d4   :  { %3235 = vmatpush.xpose.msk.msra.mxu1 %vm450_vm7, %v1237_v54 }
 0x2d5   :  { %v4086_v56 = vadd.f32 %v541_v53, %v4065_v35 }
 0x2d6   :  { %3221 = vmatmul.msk.f32.gmra.mxu1 %vm450_vm7, %v963_v33 }
 0x2d7   :  { %v558_v58 = vsel %vm551_vm9, %v4086_v56, -inf  ;;  %3209 = vmatmul.msk.f32.gmra.mxu2 %vm450_vm7, %v741_v45 }
 0x2d8   :  { %559 = vmax.xlane.f32.xlu1 %v558_v58  ;;  %3236 = vmatpush.xpose.msk.msra.mxu1 %vm450_vm7, %v1235_v3 }
 0x2da   :  { %v1011_v59 = vpop.permute.xlu0 %1010 }
 0x2db   :  { %v1019_v43 = vpop.permute.xlu1 %1018  ;;  %v1279_v48 = vpop.permute.xlu2 %1278 }
 0x2dc   :  { %3224 = vmatpush.xpose.msk.msrb.mxu2 %vm450_vm7, %v1019_v43 }
 0x2de   :  { %3222 = vmatmul.msk.f32.gmra.mxu1 %vm450_vm7, %v965_v20 }
 0x2df   :  { %3210 = vmatmul.msk.f32.gmra.mxu2 %vm450_vm7, %v743_v49 }
 0x2e0   :  { %v530_v42 = vpop.f32.mrf.mxu2  ;;  %3225 = vmatpush.xpose.msk.msrb.mxu2 %vm450_vm7, %v1017_v29 }
 0x2e1   :  { %v542_v60 = vmul.f32 0.35355338, %v530_v42 }
 0x2e2   :  { %v1229_v7 = vpop.permute.xlu0 %1228 }
 0x2e3   :  { %v1233_v61 = vpop.permute.xlu1 %1232  ;;  %v3369_v63 = vpop.permute.xlu2 %3368  ;;  %v4099_v0 = vadd.f32 %v542_v60, %v4065_v35 }
 0x2e4   :  { %3241 = vmatpush.xpose.msk.msra.mxu2 %vm450_vm7, %v1287_v46  ;;  %v3370_v1 = vunpack.i.l.bf16 %v3369_v63  ;;  %3237 = vmatpush.xpose.msk.msra.mxu1 %vm450_vm7, %v1233_v61  ;;  %v3371_v4 = vunpack.i.h.bf16 %v3369_v63 }
 0x2e5   :  { %v561_v2 = vsel %vm551_vm9, %v4099_v0, -inf }
 0x2e6   :  { %562 = vmax.xlane.f32.xlu2 %v561_v2  ;;  %900 = vmatpush.msra.mxu3 %v3370_v1 }
 0x2e7   :  { %3226 = vmatmul.msk.f32.vlgmr.msrb.gmra.mxu2 %vm450_vm7, %v1011_v59  ;;  %3238 = vmatmul.msk.f32.vlgmr.msra.gmra.mxu1 %vm450_vm7, %v1227_v38 }
 0x2e8   :  { %3242 = vmatpush.xpose.msk.msra.mxu2 %vm450_vm7, %v1285_v55  ;;  %v533_v5 = vpop.f32.mrf.mxu2  ;;  %901 = vmatpush.msra.mxu3 %v3371_v4 }
 0x2e9   :  { %v543_v6 = vmul.f32 0.35355338, %v533_v5 }
 0x2ea   :  { %v1231_v19 = vpop.permute.xlu0 %1230 }
 0x2eb   :  { %v1013_v9 = vpop.permute.xlu1 %1012  ;;  %v4108_v47 = vadd.f32 %v543_v6, %v4065_v35  ;;  %v3379_v52 = vpop.permute.xlu2 %3378 }
 0x2ec   :  { %v3380_v33 = vunpack.i.l.bf16 %v3379_v52  ;;  %v3381_v36 = vunpack.i.h.bf16 %v3379_v52 }
 0x2ed   :  { %v564_v12 = vsel %vm551_vm9, %v4108_v47, -inf }
 0x2ee   :  { %565 = vmax.xlane.f32.xlu0 %v564_v12 }
 0x2ef   :  { %3227 = vmatmul.msk.f32.gmra.mxu2 %vm450_vm7, %v1013_v9  ;;  %3239 = vmatmul.msk.f32.gmra.mxu1 %vm450_vm7, %v1229_v7 }
 0x2f0   :  { %v536_v13 = vpop.f32.mrf.mxu2 }
 0x2f1   :  { %v544_v15 = vmul.f32 0.35355338, %v536_v13 }
 0x2f2   :  { %v1277_v23 = vpop.permute.xlu0 %1276 }
 0x2f3   :  { %v1015_v16 = vpop.permute.xlu1 %1014  ;;  %v4115_v17 = vadd.f32 %v544_v15, %v4065_v35 }
 0x2f5   :  { %v567_v20 = vsel %vm551_vm9, %v4115_v17, -inf }
 0x2f6   :  { %568 = vmax.xlane.f32.xlu1 %v567_v20 }
 0x2f7   :  { %3228 = vmatmul.msk.f32.gmra.mxu2 %vm450_vm7, %v1015_v16  ;;  %3240 = vmatmul.msk.f32.gmra.mxu1 %vm450_vm7, %v1231_v19 }
 0x2fa   :  { %v4125_v37 = vpop.permute.xlu0 %3373 }
 0x2fb   :  { %v1283_v21 = vpop.permute.xlu1 %1282 }
 0x2fc   :  { %3243 = vmatpush.xpose.msk.msra.mxu2 %vm450_vm7, %v1283_v21 }
 0x2ff   :  { %3244 = vmatmul.msk.f32.vlgmr.msra.gmra.mxu2 %vm450_vm7, %v1277_v23 }
 0x303   :  { %v1281_v24 = vpop.permute.xlu1 %1280 }
 0x307   :  { %3245 = vmatmul.msk.f32.gmra.mxu2 %vm450_vm7, %v1279_v48 }
 0x30b   :  { %v3384_v27 = vpop.permute.xlu1 %3383 }
 0x30c   :  { %v3386_v29 = vunpack.i.h.bf16 %v3384_v27  ;;  %v3385_v32 = vunpack.i.l.bf16 %v3384_v27 }
 0x30e   :  { %902 = vmatpush.msra.mxu3 %v3385_v32  ;;  %947 = vmatpush.msra.mxu0 %v3386_v29 }
 0x30f   :  { %3246 = vmatmul.msk.f32.gmra.mxu2 %vm450_vm7, %v1281_v24 }
 0x310   :  { %948 = vmatpush.msra.mxu0 %v3380_v33 }
 0x312   :  { %949 = vmatpush.msra.mxu0 %v3381_v36 }
 0x313   :  { %v4138_v55 = vpop.permute.xlu1 %3388 }
 0x333   :  { %v729_v38 = vpop.f32.mrf.mxu1 }
 0x334   :  { %v788_v40 = vmul.f32 0.35355338, %v729_v38 }
 0x336   :  { %v4128_v41 = vadd.f32 %v788_v40, %v4065_v35 }
 0x338   :  { %v800_v44 = vsel %vm551_vm9, %v4128_v41, -inf }
 0x339   :  { %801 = vmax.xlane.f32.xlu0 %v800_v44 }
 0x33b   :  { %v554_v45 = vpop.xlane.xlu0 %553  ;;  %v732_v46 = vpop.f32.mrf.mxu1 }
 0x33c   :  { %v570_v49 = vsub.f32 %v4069_v57, %v554_v45  ;;  %v789_v51 = vmul.f32 0.35355338, %v732_v46 }
 0x33e   :  { %v576_v62 = vmul.f32 1.442695, %v570_v49  ;;  %v4134_v53 = vadd.f32 %v789_v51, %v4065_v35 }
 0x340   :  { %3488 = vpow2.f32 %v576_v62  ;;  %v803_v54 = vsel %vm551_vm9, %v4134_v53, -inf }
 0x341   :  { %804 = vmax.xlane.f32.xlu1 %v803_v54 }
 0x343   :  { %v557_v3 = vpop.xlane.xlu2 %556  ;;  %v735_v58 = vpop.f32.mrf.mxu1 }
 0x344   :  { %v571_v48 = vsub.f32 %v4078_v50, %v557_v3  ;;  %v790_v59 = vmul.f32 0.35355338, %v735_v58 }
 0x346   :  { %v4140_v43 = vpop.eup %3488  ;;  %v578_v42 = vmul.f32 1.442695, %v571_v48  ;;  %v4146_v63 = vadd.f32 %v790_v59, %v4065_v35 }
 0x347   :  { %v588_v57 = vsel %vm551_vm9, %v4140_v43, 0.0 }
 0x348   :  { %589 = vadd.xlane.f32.xlu2 %v588_v57  ;;  %3490 = vpow2.f32 %v578_v42  ;;  %v806_v50 = vsel %vm551_vm9, %v4146_v63, -inf }
 0x34b   :  { %v560_v60 = vpop.xlane.xlu1 %559  ;;  %v1001_v61 = vpop.f32.mrf.mxu1 }
 0x34c   :  { %v1060_v1 = vmul.f32 0.35355338, %v1001_v61  ;;  %v572_v2 = vsub.f32 %v4086_v56, %v560_v60 }
 0x34e   :  { %v4150_v4 = vadd.f32 %v1060_v1, %v4065_v35  ;;  %v580_v6 = vmul.f32 1.442695, %v572_v2  ;;  %v4156_v13 = vpop.eup %3490 }
 0x34f   :  { %v591_v19 = vsel %vm551_vm9, %v4156_v13, 0.0 }
 0x350   :  { %807 = vmax.xlane.f32.xlu2 %v806_v50  ;;  %v1072_v5 = vsel %vm551_vm9, %v4150_v4, -inf  ;;  %3492 = vpow2.f32 %v580_v6 }
 0x351   :  { %1073 = vmax.xlane.f32.xlu0 %v1072_v5 }
 0x352   :  { %v779_v7 = vpop.f32.mrf.mxu2 }
 0x353   :  { %v791_v9 = vmul.f32 0.35355338, %v779_v7  ;;  %v1004_v12 = vpop.f32.mrf.mxu1 }
 0x354   :  { %v1061_v15 = vmul.f32 0.35355338, %v1004_v12 }
 0x355   :  { %v4159_v56 = vadd.f32 %v791_v9, %v4065_v35 }
 0x356   :  { %v4162_v16 = vadd.f32 %v1061_v15, %v4065_v35  ;;  %v4171_v32 = vpop.eup %3492 }
 0x357   :  { %v809_v20 = vsel %vm551_vm9, %v4159_v56, -inf  ;;  %v594_v44 = vsel %vm551_vm9, %v4171_v32, 0.0 }
 0x358   :  { %592 = vadd.xlane.f32.xlu2 %v591_v19  ;;  %810 = vmax.xlane.f32.xlu1 %v809_v20  ;;  %v1075_v21 = vsel %vm551_vm9, %v4162_v16, -inf }
 0x359   :  { %v563_v23 = vpop.xlane.xlu2 %562  ;;  %1076 = vmax.xlane.f32.xlu0 %v1075_v21 }
 0x35a   :  { %v573_v24 = vsub.f32 %v4099_v0, %v563_v23  ;;  %v782_v52 = vpop.f32.mrf.mxu2 }
 0x35b   :  { %v792_v27 = vmul.f32 0.35355338, %v782_v52  ;;  %v1007_v29 = vpop.f32.mrf.mxu1 }
 0x35c   :  { %v582_v33 = vmul.f32 1.442695, %v573_v24  ;;  %v1062_v36 = vmul.f32 0.35355338, %v1007_v29 }
 0x35d   :  { %v4174_v38 = vadd.f32 %v792_v27, %v4065_v35 }
 0x35e   :  { %3494 = vpow2.f32 %v582_v33  ;;  %v4177_v40 = vadd.f32 %v1062_v36, %v4065_v35 }
 0x35f   :  { %v812_v0 = vsel %vm551_vm9, %v4174_v38, -inf }
 0x360   :  { %595 = vadd.xlane.f32.xlu2 %v594_v44  ;;  %813 = vmax.xlane.f32.xlu1 %v812_v0  ;;  %v1078_v45 = vsel %vm551_vm9, %v4177_v40, -inf }
 0x361   :  { %v566_v46 = vpop.xlane.xlu0 %565  ;;  %1079 = vmax.xlane.f32.xlu0 %v1078_v45 }
 0x362   :  { %v574_v49 = vsub.f32 %v4108_v47, %v566_v46  ;;  %v785_v51 = vpop.f32.mrf.mxu2 }
 0x363   :  { %v793_v48 = vmul.f32 0.35355338, %v785_v51 }
 0x364   :  { %v4186_v62 = vpop.eup %3494  ;;  %v584_v54 = vmul.f32 1.442695, %v574_v49  ;;  %v1267_v3 = vpop.f32.mrf.mxu1 }
 0x365   :  { %v1326_v58 = vmul.f32 0.35355338, %v1267_v3  ;;  %v597_v59 = vsel %vm551_vm9, %v4186_v62, 0.0  ;;  %v4197_v1 = vadd.f32 %v793_v48, %v4065_v35 }
 0x366   :  { %3496 = vpow2.f32 %v584_v54 }
 0x367   :  { %v4191_v57 = vadd.f32 %v1326_v58, %v4065_v35  ;;  %v815_v12 = vsel %vm551_vm9, %v4197_v1, -inf }
 0x368   :  { %598 = vadd.xlane.f32.xlu1 %v597_v59 }
 0x369   :  { %v569_v42 = vpop.xlane.xlu1 %568  ;;  %v1338_v60 = vsel %vm551_vm9, %v4191_v57, -inf }
 0x36a   :  { %v575_v47 = vsub.f32 %v4115_v17, %v569_v42  ;;  %v1051_v61 = vpop.f32.mrf.mxu2  ;;  %1339 = vmax.xlane.f32.xlu0 %v1338_v60 }
 0x36b   :  { %v1063_v9 = vmul.f32 0.35355338, %v1051_v61 }
 0x36c   :  { %v4199_v2 = vpop.eup %3496  ;;  %v586_v50 = vmul.f32 1.442695, %v575_v47  ;;  %v1270_v5 = vpop.f32.mrf.mxu1 }
 0x36d   :  { %v1327_v6 = vmul.f32 0.35355338, %v1270_v5  ;;  %v600_v7 = vsel %vm551_vm9, %v4199_v2, 0.0  ;;  %v4211_v20 = vadd.f32 %v1063_v9, %v4065_v35 }
 0x36e   :  { %601 = vadd.xlane.f32.xlu2 %v600_v7  ;;  %3498 = vpow2.f32 %v586_v50 }
 0x36f   :  { %v4206_v17 = vadd.f32 %v1327_v6, %v4065_v35  ;;  %v1081_v23 = vsel %vm551_vm9, %v4211_v20, -inf }
 0x370   :  { %816 = vmax.xlane.f32.xlu1 %v815_v12 }
 0x371   :  { %v1341_v15 = vsel %vm551_vm9, %v4206_v17, -inf }
 0x372   :  { %v1054_v19 = vpop.f32.mrf.mxu2  ;;  %1342 = vmax.xlane.f32.xlu0 %v1341_v15 }
 0x373   :  { %v1064_v24 = vmul.f32 0.35355338, %v1054_v19 }
 0x374   :  { %v4213_v21 = vpop.eup %3498  ;;  %v1273_v44 = vpop.f32.mrf.mxu1 }
 0x375   :  { %v603_v52 = vsel %vm551_vm9, %v4213_v21, 0.0  ;;  %v4223_v36 = vadd.f32 %v1064_v24, %v4065_v35  ;;  %v1328_v45 = vmul.f32 0.35355338, %v1273_v44 }
 0x377   :  { %v1084_v46 = vsel %vm551_vm9, %v4223_v36, -inf  ;;  %v4230_v51 = vadd.f32 %v1328_v45, %v4065_v35 }
 0x378   :  { %1082 = vmax.xlane.f32.xlu1 %v1081_v23 }
 0x379   :  { %v1344_v3 = vsel %vm551_vm9, %v4230_v51, -inf }
 0x37a   :  { %v1057_v27 = vpop.f32.mrf.mxu2  ;;  %604 = vadd.xlane.f32.xlu0 %v603_v52 }
 0x37b   :  { %v1065_v29 = vmul.f32 0.35355338, %v1057_v27 }
 0x37d   :  { %v4220_v33 = vadd.f32 %v1065_v29, %v4065_v35 }
 0x37f   :  { %v1087_v0 = vsel %vm551_vm9, %v4220_v33, -inf }
 0x380   :  { %1088 = vmax.xlane.f32.xlu1 %v1087_v0  ;;  %v3375_v0 = vunpack.i.l.bf16 %v4125_v37 }
 0x382   :  { %1085 = vmax.xlane.f32.xlu0 %v1084_v46  ;;  %v1317_v49 = vpop.f32.mrf.mxu2 }
 0x383   :  { %v1329_v54 = vmul.f32 0.35355338, %v1317_v49  ;;  %v3376_v49 = vunpack.i.h.bf16 %v4125_v37 }
 0x385   :  { %v4235_v48 = vadd.f32 %v1329_v54, %v4065_v35 }
 0x387   :  { %v1347_v42 = vsel %vm551_vm9, %v4235_v48, -inf }
 0x38a   :  { %1345 = vmax.xlane.f32.xlu0 %v1344_v3  ;;  %v1320_v58 = vpop.f32.mrf.mxu2 }
 0x38b   :  { %v1330_v59 = vmul.f32 0.35355338, %v1320_v58  ;;  %v3390_v58 = vunpack.i.l.bf16 %v4138_v55 }
 0x38d   :  { %v4240_v60 = vadd.f32 %v1330_v59, %v4065_v35 }
 0x38f   :  { %v1350_v50 = vsel %vm551_vm9, %v4240_v60, -inf }
 0x392   :  { %1348 = vmax.xlane.f32.xlu0 %v1347_v42  ;;  %v1323_v47 = vpop.f32.mrf.mxu2 }
 0x393   :  { %v1331_v61 = vmul.f32 0.35355338, %v1323_v47 }
 0x395   :  { %v4245_v5 = vadd.f32 %v1331_v61, %v4065_v35 }
 0x397   :  { %v1353_v6 = vsel %vm551_vm9, %v4245_v5, -inf }
 0x39a   :  { %1351 = vmax.xlane.f32.xlu0 %v1350_v50 }
 0x3a2   :  { %1354 = vmax.xlane.f32.xlu0 %v1353_v6 }
 0x3ac   :  { %v802_v7 = vpop.xlane.xlu0 %801 }
 0x3ad   :  { %v818_v9 = vsub.f32 %v4128_v41, %v802_v7 }
 0x3af   :  { %v824_v12 = vmul.f32 1.442695, %v818_v9 }
 0x3b1   :  { %3500 = vpow2.f32 %v824_v12 }
 0x3b4   :  { %v805_v15 = vpop.xlane.xlu1 %804 }
 0x3b5   :  { %v819_v19 = vsub.f32 %v4134_v53, %v805_v15 }
 0x3b7   :  { %v4251_v23 = vpop.eup %3500  ;;  %v826_v24 = vmul.f32 1.442695, %v819_v19 }
 0x3b8   :  { %v836_v52 = vsel %vm551_vm9, %v4251_v23, 0.0 }
 0x3b9   :  { %3502 = vpow2.f32 %v826_v24  ;;  %837 = vadd.xlane.f32.xlu2 %v836_v52 }
 0x3bb   :  { %v590_v35 = vpop.xlane.xlu2 %589 }
 0x3bc   :  { %3504 = vrcp.f32 %v590_v35 }
 0x3bf   :  { %v4255_v27 = vpop.eup %3502 }
 0x3c0   :  { %v839_v41 = vsel %vm551_vm9, %v4255_v27, 0.0 }
 0x3c1   :  { %840 = vadd.xlane.f32.xlu0 %v839_v41 }
 0x3c2   :  { %v3505_v29 = vpop.eup %3504 }
 0x3c3   :  { %v808_v44 = vpop.xlane.xlu2 %807  ;;  %v612_v53 = vmul.f32 %v3505_v29, %v4140_v43 }
 0x3c4   :  { %v820_v45 = vsub.f32 %v4146_v63, %v808_v44  ;;  %v1074_v46 = vpop.xlane.xlu0 %1073 }
 0x3c5   :  { %3193 = vmatmul.msk.f32.vlgmr.msrb.gmra.mxu3 %vm551_vm9, %v612_v53  ;;  %v1090_v3 = vsub.f32 %v4150_v4, %v1074_v46 }
 0x3c6   :  { %v828_v54 = vmul.f32 1.442695, %v820_v45  ;;  %1169 = vmatpush.msrb.mxu3 %v3375_v0 }
 0x3c7   :  { %v1096_v59 = vmul.f32 1.442695, %v1090_v3 }
 0x3c8   :  { %3506 = vpow2.f32 %v828_v54  ;;  %1170 = vmatpush.msrb.mxu3 %v3376_v49 }
 0x3ca   :  { %1171 = vmatpush.msrb.mxu3 %v3390_v58 }
 0x3cb   :  { %v593_v43 = vpop.xlane.xlu2 %592  ;;  %v811_v42 = vpop.xlane.xlu1 %810 }
 0x3cc   :  { %3508 = vrcp.f32 %v593_v43  ;;  %v821_v63 = vsub.f32 %v4159_v56, %v811_v42  ;;  %v1077_v47 = vpop.xlane.xlu0 %1076  ;;  %v3391_v43 = vunpack.i.h.bf16 %v4138_v55 }
 0x3cd   :  { %3510 = vpow2.f32 %v1096_v59  ;;  %v1091_v50 = vsub.f32 %v4162_v16, %v1077_v47 }
 0x3ce   :  { %v4267_v61 = vpop.eup %3506  ;;  %v830_v37 = vmul.f32 1.442695, %v821_v63 }
 0x3cf   :  { %v842_v4 = vsel %vm551_vm9, %v4267_v61, 0.0  ;;  %v1098_v7 = vmul.f32 1.442695, %v1091_v50 }
 0x3d0   :  { %3512 = vpow2.f32 %v830_v37  ;;  %843 = vadd.xlane.f32.xlu0 %v842_v4 }
 0x3d2   :  { %v3509_v6 = vpop.eup %3508 }
 0x3d3   :  { %v596_v9 = vpop.xlane.xlu2 %595  ;;  %v814_v12 = vpop.xlane.xlu1 %813  ;;  %v613_v15 = vmul.f32 %v3509_v6, %v4156_v13 }
 0x3d4   :  { %v4273_v19 = vpop.eup %3510  ;;  %3514 = vrcp.f32 %v596_v9  ;;  %v822_v56 = vsub.f32 %v4174_v38, %v814_v12  ;;  %v1080_v24 = vpop.xlane.xlu0 %1079 }
 0x3d5   :  { %3194 = vmatmul.msk.f32.gmra.mxu3 %vm551_vm9, %v613_v15  ;;  %3516 = vpow2.f32 %v1098_v7  ;;  %v1092_v35 = vsub.f32 %v4177_v40, %v1080_v24  ;;  %v1108_v41 = vsel %vm551_vm9, %v4273_v19, 0.0 }
 0x3d6   :  { %v4277_v16 = vpop.eup %3512  ;;  %v832_v52 = vmul.f32 1.442695, %v822_v56 }
 0x3d7   :  { %v845_v13 = vsel %vm551_vm9, %v4277_v16, 0.0  ;;  %v1100_v38 = vmul.f32 1.442695, %v1092_v35 }
 0x3d8   :  { %3518 = vpow2.f32 %v832_v52  ;;  %1109 = vadd.xlane.f32.xlu0 %v1108_v41  ;;  %846 = vadd.xlane.f32.xlu2 %v845_v13 }
 0x3da   :  { %v3515_v29 = vpop.eup %3514 }
 0x3db   :  { %v599_v44 = vpop.xlane.xlu1 %598  ;;  %v614_v53 = vmul.f32 %v3515_v29, %v4171_v32  ;;  %v4285_v0 = vpop.eup %3516 }
 0x3dc   :  { %3520 = vrcp.f32 %v599_v44  ;;  %v1111_v46 = vsel %vm551_vm9, %v4285_v0, 0.0 }
 0x3dd   :  { %3195 = vmatmul.msk.f32.gmra.mxu3 %vm551_vm9, %v614_v53  ;;  %v1340_v40 = vpop.xlane.xlu0 %1339  ;;  %3522 = vpow2.f32 %v1100_v38 }
 0x3de   :  { %v4288_v45 = vpop.eup %3518  ;;  %v1356_v63 = vsub.f32 %v4191_v57, %v1340_v40 }
 0x3df   :  { %v848_v49 = vsel %vm551_vm9, %v4288_v45, 0.0 }
 0x3e0   :  { %1112 = vadd.xlane.f32.xlu2 %v1111_v46  ;;  %849 = vadd.xlane.f32.xlu1 %v848_v49 }
 0x3e1   :  { %v602_v54 = vpop.xlane.xlu2 %601 }
 0x3e2   :  { %v3521_v3 = vpop.eup %3520  ;;  %3524 = vrcp.f32 %v602_v54 }
 0x3e3   :  { %v817_v32 = vpop.xlane.xlu1 %816  ;;  %v615_v58 = vmul.f32 %v3521_v3, %v4186_v62  ;;  %v4295_v59 = vpop.eup %3522  ;;  %v1362_v62 = vmul.f32 1.442695, %v1356_v63 }
 0x3e4   :  { %v823_v42 = vsub.f32 %v4197_v1, %v817_v32  ;;  %v1114_v50 = vsel %vm551_vm9, %v4295_v59, 0.0 }
 0x3e5   :  { %v1343_v47 = vpop.xlane.xlu0 %1342  ;;  %3196 = vmatmul.msk.f32.vlgmr.msrb.gmra.mxu0 %vm551_vm9, %v615_v58 }
 0x3e6   :  { %v834_v37 = vmul.f32 1.442695, %v823_v42  ;;  %1213 = vmatpush.msrb.mxu0 %v3391_v43 }
 0x3e8   :  { %3526 = vpow2.f32 %v834_v37  ;;  %1115 = vadd.xlane.f32.xlu2 %v1114_v50  ;;  %v3525_v4 = vpop.eup %3524 }
 0x3e9   :  { %v616_v7 = vmul.f32 %v3525_v4, %v4199_v2  ;;  %3528 = vpow2.f32 %v1362_v62 }
 0x3eb   :  { %v1083_v6 = vpop.xlane.xlu1 %1082 }
 0x3ec   :  { %v1093_v55 = vsub.f32 %v4211_v20, %v1083_v6 }
 0x3ed   :  { %v605_v1 = vpop.xlane.xlu0 %604  ;;  %3197 = vmatmul.msk.f32.gmra.mxu0 %vm551_vm9, %v616_v7 }
 0x3ee   :  { %v4306_v57 = vpop.eup %3526  ;;  %v1102_v9 = vmul.f32 1.442695, %v1093_v55  ;;  %3530 = vrcp.f32 %v605_v1 }
 0x3ef   :  { %v851_v12 = vsel %vm551_vm9, %v4306_v57, 0.0  ;;  %v4310_v15 = vpop.eup %3528 }
 0x3f0   :  { %3532 = vpow2.f32 %v1102_v9  ;;  %852 = vadd.xlane.f32.xlu0 %v851_v12  ;;  %v1374_v52 = vsel %vm551_vm9, %v4310_v15, 0.0 }
 0x3f3   :  { %v1089_v49 = vpop.xlane.xlu1 %1088 }
 0x3f4   :  { %v3531_v56 = vpop.eup %3530  ;;  %v1095_v3 = vsub.f32 %v4220_v33, %v1089_v49 }
 0x3f5   :  { %v617_v2 = vmul.f32 %v3531_v56, %v4213_v21  ;;  %v1086_v35 = vpop.xlane.xlu0 %1085 }
 0x3f6   :  { %v4313_v24 = vpop.eup %3532  ;;  %v1094_v21 = vsub.f32 %v4223_v36, %v1086_v35  ;;  %v1106_v58 = vmul.f32 1.442695, %v1095_v3 }
 0x3f7   :  { %3198 = vmatmul.msk.f32.gmra.mxu0 %vm551_vm9, %v617_v2  ;;  %v1117_v20 = vsel %vm551_vm9, %v4313_v24, 0.0 }
 0x3f8   :  { %1118 = vadd.xlane.f32.xlu2 %v1117_v20  ;;  %1375 = vadd.xlane.f32.xlu0 %v1374_v52  ;;  %v1104_v29 = vmul.f32 1.442695, %v1094_v21 }
 0x3f9   :  { %3393 = vrot.lane.b32.xlu1 %v4033_v8, %s3661_s23 }
 0x3fa   :  { %3534 = vpow2.f32 %v1104_v29 }
 0x3fd   :  { %v1346_v41 = vpop.xlane.xlu0 %1345 }
 0x400   :  { %v4328_v40 = vpop.eup %3534 }
 0x401   :  { %v1120_v46 = vsel %vm551_vm9, %v4328_v40, 0.0 }
 0x405   :  { %v1349_v13 = vpop.xlane.xlu0 %1348 }
 0x406   :  { %v1359_v38 = vsub.f32 %v4235_v48, %v1349_v13 }
 0x408   :  { %v1368_v44 = vmul.f32 1.442695, %v1359_v38 }
 0x40a   :  { %3536 = vpow2.f32 %v1368_v44 }
 0x40c   :  { %3403 = vrot.lane.b32.xlu0 %v4040_v10, %s3660_s25 }
 0x40d   :  { %v1352_v53 = vpop.xlane.xlu0 %1351 }
 0x40e   :  { %v1360_v8 = vsub.f32 %v4240_v60, %v1352_v53  ;;  %v1358_v60 = vsub.f32 %v4230_v51, %v1346_v41 }
 0x410   :  { %3398 = vrot.lane.b32.xlu2 %v4046_v11, %s3661_s23  ;;  %v1357_v11 = vsub.f32 %v4206_v17, %v1343_v47  ;;  %v1370_v36 = vmul.f32 1.442695, %v1360_v8  ;;  %v4334_v54 = vpop.eup %3536  ;;  %v1366_v47 = vmul.f32 1.442695, %v1358_v60 }
 0x411   :  { %v1383_v32 = vsel %vm551_vm9, %v4334_v54, 0.0 }
 0x412   :  { %v1364_v48 = vmul.f32 1.442695, %v1357_v11  ;;  %3538 = vpow2.f32 %v1370_v36 }
 0x414   :  { %3540 = vpow2.f32 %v1364_v48 }
 0x415   :  { %v1355_v43 = vpop.xlane.xlu0 %1354 }
 0x416   :  { %v1361_v63 = vsub.f32 %v4245_v5, %v1355_v43 }
 0x418   :  { %v4340_v17 = vpop.eup %3538  ;;  %v1372_v4 = vmul.f32 1.442695, %v1361_v63 }
 0x419   :  { %v1386_v37 = vsel %vm551_vm9, %v4340_v17, 0.0 }
 0x41a   :  { %v4343_v33 = vpop.eup %3540 }
 0x41b   :  { %v1377_v7 = vsel %vm551_vm9, %v4343_v33, 0.0 }
 0x423   :  { %1121 = vadd.xlane.f32.xlu1 %v1120_v46 }
 0x42b   :  { %1384 = vadd.xlane.f32.xlu1 %v1383_v32 }
 0x42c   :  { %v838_v42 = vpop.xlane.xlu2 %837 }
 0x42d   :  { %3542 = vrcp.f32 %v838_v42 }
 0x42e   :  { %3544 = vpow2.f32 %v1106_v58 }
 0x42f   :  { %3546 = vpow2.f32 %v1366_v47 }
 0x433   :  { %v3543_v50 = vpop.eup %3542  ;;  %1387 = vadd.xlane.f32.xlu1 %v1386_v37 }
 0x434   :  { %v860_v51 = vmul.f32 %v3543_v50, %v4251_v23  ;;  %v841_v62 = vpop.xlane.xlu0 %840  ;;  %v4348_v6 = vpop.eup %3544 }
 0x435   :  { %3548 = vrcp.f32 %v841_v62  ;;  %v1123_v5 = vsel %vm551_vm9, %v4348_v6, 0.0  ;;  %v4355_v55 = vpop.eup %3546 }
 0x436   :  { %1378 = vadd.xlane.f32.xlu0 %v1377_v7  ;;  %3211 = vmatmul.msk.f32.vlgmr.msra.gmra.mxu3 %vm551_vm9, %v860_v51  ;;  %3550 = vpow2.f32 %v1372_v4  ;;  %v1380_v12 = vsel %vm551_vm9, %v4355_v55, 0.0 }
 0x439   :  { %1124 = vadd.xlane.f32.xlu2 %v1123_v5 }
 0x43b   :  { %v3549_v1 = vpop.eup %3548 }
 0x43c   :  { %v861_v23 = vmul.f32 %v3549_v1, %v4255_v27  ;;  %v4358_v9 = vpop.eup %3550 }
 0x43d   :  { %v1389_v56 = vsel %vm551_vm9, %v4358_v9, 0.0 }
 0x43e   :  { %1381 = vadd.xlane.f32.xlu0 %v1380_v12  ;;  %3212 = vmatmul.msk.f32.gmra.mxu3 %vm551_vm9, %v861_v23 }
 0x441   :  { %1390 = vadd.xlane.f32.xlu2 %v1389_v56 }
 0x443   :  { %v844_v2 = vpop.xlane.xlu0 %843 }
 0x444   :  { %3552 = vrcp.f32 %v844_v2 }
 0x448   :  { %v4386_v62 = vpop.f32.mrf.mxu3 }
 0x44a   :  { %v3553_v20 = vpop.eup %3552 }
 0x44b   :  { %v1110_v52 = vpop.xlane.xlu0 %1109  ;;  %v847_v35 = vpop.xlane.xlu2 %846  ;;  %v862_v41 = vmul.f32 %v3553_v20, %v4267_v61 }
 0x44c   :  { %3554 = vrcp.f32 %v1110_v52 }
 0x44d   :  { %3556 = vrcp.f32 %v847_v35  ;;  %3213 = vmatmul.msk.f32.gmra.mxu3 %vm551_vm9, %v862_v41 }
 0x452   :  { %v3555_v27 = vpop.eup %3554  ;;  %3408 = vrot.lane.b32.xlu0 %v4040_v10, %s3661_s23 }
 0x453   :  { %v3557_v21 = vpop.eup %3556  ;;  %v1132_v13 = vmul.f32 %v3555_v27, %v4273_v19  ;;  %v850_v29 = vpop.xlane.xlu1 %849 }
 0x454   :  { %v1113_v38 = vpop.xlane.xlu2 %1112  ;;  %v863_v44 = vmul.f32 %v3557_v21, %v4277_v16  ;;  %3558 = vrcp.f32 %v850_v29 }
 0x455   :  { %3560 = vrcp.f32 %v1113_v38  ;;  %3229 = vmatmul.msk.f32.vlgmr.msrb.gmra.mxu3 %vm551_vm9, %v1132_v13 }
 0x456   :  { %3214 = vmatmul.msk.f32.vlgmr.msra.gmra.mxu0 %vm551_vm9, %v863_v44 }
 0x458   :  { %v4389_v7 = vpop.f32.mrf.mxu3 }
 0x45a   :  { %v3559_v61 = vpop.eup %3558 }
 0x45b   :  { %v3561_v53 = vpop.eup %3560  ;;  %v864_v46 = vmul.f32 %v3559_v61, %v4288_v45 }
 0x45c   :  { %v1116_v8 = vpop.xlane.xlu2 %1115  ;;  %v1133_v10 = vmul.f32 %v3561_v53, %v4285_v0 }
 0x45d   :  { %3562 = vrcp.f32 %v1116_v8 }
 0x45e   :  { %3215 = vmatmul.msk.f32.gmra.mxu0 %vm551_vm9, %v864_v46  ;;  %3230 = vmatmul.msk.f32.gmra.mxu3 %vm551_vm9, %v1133_v10 }
 0x460   :  { %v4391_v23 = vpop.f32.mrf.mxu3 }
 0x462   :  { %v4402_v61 = vpop.f32.mrf.mxu0 }
 0x463   :  { %v3563_v19 = vpop.eup %3562  ;;  %v853_v16 = vpop.xlane.xlu0 %852 }
 0x464   :  { %v1134_v11 = vmul.f32 %v3563_v19, %v4295_v59  ;;  %3564 = vrcp.f32 %v853_v16 }
 0x466   :  { %3231 = vmatmul.msk.f32.gmra.mxu3 %vm551_vm9, %v1134_v11 }
 0x46a   :  { %v3565_v49 = vpop.eup %3564  ;;  %v4406_v10 = vpop.f32.mrf.mxu0 }
 0x46b   :  { %v3394_v36 = vpop.permute.xlu1 %3393  ;;  %v1376_v3 = vpop.xlane.xlu0 %1375  ;;  %v865_v48 = vmul.f32 %v3565_v49, %v4306_v57 }
 0x46c   :  { %v3395_v45 = vunpack.i.l.bf16 %v3394_v36  ;;  %v1119_v32 = vpop.xlane.xlu2 %1118  ;;  %3566 = vrcp.f32 %v1376_v3  ;;  %v3396_v0 = vunpack.i.h.bf16 %v3394_v36 }
 0x46d   :  { %3216 = vmatmul.msk.f32.gmra.mxu0 %vm551_vm9, %v865_v48  ;;  %3568 = vrcp.f32 %v1119_v32 }
 0x46e   :  { %1435 = vmatpush.msra.mxu3 %v3395_v45 }
 0x470   :  { %1436 = vmatpush.msra.mxu3 %v3396_v0 }
 0x472   :  { %v3567_v58 = vpop.eup %3566 }
 0x473   :  { %v1398_v59 = vmul.f32 %v3567_v58, %v4310_v15  ;;  %v3569_v63 = vpop.eup %3568  ;;  %v1586_v58 = vld [vmem:[%s5195_s8 + $0x18] sm:$0xff] }
 0x474   :  { %v3399_v60 = vpop.permute.xlu2 %3398  ;;  %v1135_v37 = vmul.f32 %v3569_v63, %v4313_v24  ;;  %v4411_v16 = vpop.f32.mrf.mxu0  ;;  %1617 = vmatpush.msrb.mxu1 %v1586_v58 }
 0x475   :  { %v3400_v43 = vunpack.i.l.bf16 %v3399_v60  ;;  %v3401_v50 = vunpack.i.h.bf16 %v3399_v60  ;;  %v1585_v60 = vld [vmem:[%s5195_s8 + $0x10] sm:$0xff] }
 0x476   :  { %1618 = vmatpush.msrb.mxu1 %v1585_v60 }
 0x477   :  { %1437 = vmatpush.msra.mxu3 %v3400_v43 }
 0x478   :  { %3247 = vmatmul.msk.f32.vlgmr.msra.gmra.mxu3 %vm551_vm9, %v1398_v59  ;;  %v1584_v59 = vld [vmem:[%s5195_s8 + $0x8] sm:$0xff] }
 0x479   :  { %1619 = vmatpush.msrb.mxu1 %v1584_v59 }
 0x47e   :  { %v3404_v42 = vpop.permute.xlu0 %3403 }
 0x47f   :  { %v3405_v57 = vunpack.i.l.bf16 %v3404_v42  ;;  %v3406_v47 = vunpack.i.h.bf16 %v3404_v42 }
 0x481   :  { %1214 = vmatpush.msrb.mxu0 %v3405_v57  ;;  %v1583_v57 = vld [vmem:[%s5195_s8] sm:$0xff] }
 0x482   :  { %1620 = vmatpush.msrb.mxu1 %v1583_v57 }
 0x483   :  { %1215 = vmatpush.msrb.mxu0 %v3406_v47 }
 0x484   :  { %3232 = vmatmul.msk.f32.vlgmr.msrb.gmra.mxu0 %vm551_vm9, %v1135_v37 }
 0x485   :  { %1479 = vmatpush.msra.mxu0 %v3401_v50 }
 0x496   :  { %v1122_v4 = vpop.xlane.xlu1 %1121 }
 0x497   :  { %3570 = vrcp.f32 %v1122_v4 }
 0x49d   :  { %v3571_v51 = vpop.eup %3570 }
 0x49e   :  { %v1136_v15 = vmul.f32 %v3571_v51, %v4328_v40  ;;  %v1385_v41 = vpop.xlane.xlu1 %1384 }
 0x4a0   :  { %3233 = vmatmul.msk.f32.gmra.mxu0 %vm551_vm9, %v1136_v15 }
 0x4a9   :  { %v1379_v5 = vpop.xlane.xlu0 %1378 }
 0x4aa   :  { %3572 = vrcp.f32 %v1379_v5 }
 0x4ac   :  { %v1125_v1 = vpop.xlane.xlu2 %1124 }
 0x4ad   :  { %3574 = vrcp.f32 %v1125_v1 }
 0x4b0   :  { %v3573_v24 = vpop.eup %3572 }
 0x4b1   :  { %v1382_v12 = vpop.xlane.xlu0 %1381  ;;  %v1399_v56 = vmul.f32 %v3573_v24, %v4343_v33  ;;  %v1388_v33 = vpop.xlane.xlu1 %1387 }
 0x4b2   :  { %3576 = vrcp.f32 %v1382_v12 }
 0x4b3   :  { %v3575_v2 = vpop.eup %3574  ;;  %3248 = vmatmul.msk.f32.gmra.mxu3 %vm551_vm9, %v1399_v56  ;;  %3578 = vrcp.f32 %v1385_v41 }
 0x4b4   :  { %v1137_v40 = vmul.f32 %v3575_v2, %v4348_v6  ;;  %3580 = vrcp.f32 %v1388_v33 }
 0x4b6   :  { %3234 = vmatmul.msk.f32.gmra.mxu0 %vm551_vm9, %v1137_v40 }
 0x4b8   :  { %v3577_v20 = vpop.eup %3576 }
 0x4b9   :  { %v904_v52 = vpop.f32.mrf.mxu3  ;;  %v1400_v35 = vmul.f32 %v3577_v20, %v4355_v55  ;;  %v3579_v21 = vpop.eup %3578 }
 0x4ba   :  { %1498 = vrot.lane.b32.xlu1 %v904_v52, %s5215_s3  ;;  %v1401_v6 = vmul.f32 %v3579_v21, %v4334_v54  ;;  %v1391_v55 = vpop.xlane.xlu2 %1390  ;;  %v3581_v44 = vpop.eup %3580 }
 0x4bb   :  { %3249 = vmatmul.msk.f32.gmra.mxu3 %vm551_vm9, %v1400_v35  ;;  %3582 = vrcp.f32 %v1391_v55  ;;  %v1402_v8 = vmul.f32 %v3581_v44, %v4340_v17 }
 0x4c1   :  { %v907_v38 = vpop.f32.mrf.mxu3  ;;  %v3583_v46 = vpop.eup %3582 }
 0x4c2   :  { %v1403_v54 = vmul.f32 %v3583_v46, %v4358_v9 }
 0x4c4   :  { %v3409_v27 = vpop.permute.xlu0 %3408 }
 0x4c5   :  { %v3410_v13 = vunpack.i.l.bf16 %v3409_v27  ;;  %v3411_v29 = vunpack.i.h.bf16 %v3409_v27 }
 0x4c7   :  { %1480 = vmatpush.msra.mxu0 %v3410_v13 }
 0x4c9   :  { %1481 = vmatpush.msra.mxu0 %v3411_v29 }
 0x4ca   :  { %3250 = vmatmul.msk.f32.vlgmr.msra.gmra.mxu0 %vm551_vm9, %v1401_v6 }
 0x4d0   :  { %v910_v53 = vpop.f32.mrf.mxu3 }
 0x4d2   :  { %3251 = vmatmul.msk.f32.gmra.mxu0 %vm551_vm9, %v1402_v8 }
 0x4d3   :  { %v951_v49 = vpop.f32.mrf.mxu0 }
 0x4d8   :  { %v1173_v19 = vpop.f32.mrf.mxu3 }
 0x4d9   :  { %1522 = vrot.lane.b32.xlu2 %v1173_v19, %s5213_s26 }
 0x4da   :  { %3252 = vmatmul.msk.f32.gmra.mxu0 %vm551_vm9, %v1403_v54 }
 0x4db   :  { %v954_v36 = vpop.f32.mrf.mxu0 }
 0x4e1   :  { %v1176_v11 = vpop.f32.mrf.mxu3 }
 0x4e2   :  { %1524 = vrot.lane.b32.xlu2 %v1176_v11, %s5213_s26 }
 0x4e9   :  { %v1179_v17 = vpop.f32.mrf.mxu3 }
 0x4ea   :  { %1526 = vrot.lane.b32.xlu2 %v1179_v17, %s5213_s26  ;;  %v957_v3 = vpop.f32.mrf.mxu0 }
 0x4fb   :  { %v1439_v48 = vpop.f32.mrf.mxu3 }
 0x4fc   :  { %1546 = vrot.lane.b32.xlu0 %v1439_v48, %s5214_s27 }
 0x501   :  { %v1217_v9 = vpop.f32.mrf.mxu0 }
 0x502   :  { %1528 = vrot.lane.b32.xlu2 %v1217_v9, %s5213_s26 }
 0x504   :  { %1500 = vrot.lane.b32.xlu0 %v907_v38, %s5215_s3 }
 0x50c   :  { %1502 = vrot.lane.b32.xlu0 %v910_v53, %s5215_s3 }
 0x514   :  { %1504 = vrot.lane.b32.xlu0 %v951_v49, %s5215_s3 }
 0x51c   :  { %1506 = vrot.lane.b32.xlu0 %v954_v36, %s5215_s3 }
 0x51d   :  { %v1220_v45 = vpop.f32.mrf.mxu0 }
 0x51e   :  { %1530 = vrot.lane.b32.xlu2 %v1220_v45, %s5213_s26 }
 0x524   :  { %1508 = vrot.lane.b32.xlu0 %v957_v3, %s5215_s3 }
 0x52c   :  { %v1499_v37 = vpop.permute.xlu1 %1498 }
 0x52d   :  { %v1564_v4 = vsel %vm450_vm7, %v4386_v62, %v1499_v37 }
 0x533   :  { %v1223_v32 = vpop.f32.mrf.mxu0  ;;  %v1523_v50 = vpop.permute.xlu2 %1522 }
 0x534   :  { %1532 = vrot.lane.b32.xlu2 %v1223_v32, %s5213_s26  ;;  %v1571_v51 = vsel %vm1570_vm10, %v1564_v4, %v1523_v50 }
 0x536   :  { %v1442_v0 = vpop.f32.mrf.mxu3 }
 0x537   :  { %1548 = vrot.lane.b32.xlu1 %v1442_v0, %s5214_s27 }
 0x53c   :  { %v1525_v24 = vpop.permute.xlu2 %1524 }
 0x53e   :  { %v1445_v43 = vpop.f32.mrf.mxu3 }
 0x53f   :  { %1550 = vrot.lane.b32.xlu1 %v1445_v43, %s5214_s27 }
 0x544   :  { %v1527_v52 = vpop.permute.xlu2 %1526 }
 0x547   :  { %v1483_v42 = vpop.f32.mrf.mxu0 }
 0x548   :  { %1552 = vrot.lane.b32.xlu1 %v1483_v42, %s5214_s27 }
 0x54f   :  { %v1486_v63 = vpop.f32.mrf.mxu0 }
 0x550   :  { %1554 = vrot.lane.b32.xlu1 %v1486_v63, %s5214_s27 }
 0x557   :  { %v1489_v47 = vpop.f32.mrf.mxu0 }
 0x558   :  { %1556 = vrot.lane.b32.xlu1 %v1489_v47, %s5214_s27 }
 0x55c   :  { %v1529_v21 = vpop.permute.xlu2 %1528 }
 0x56e   :  { %v1547_v15 = vpop.permute.xlu0 %1546 }
 0x56f   :  { %v1577_v5 = vsel %vm551_vm9, %v1571_v51, %v1547_v15 }
 0x570   :  { %3253 = vmatmul.msk.f32.vlgmr.msrb.gmra.mxu1 %vm157_vm1, %v1577_v5 }
 0x576   :  { %v1501_v1 = vpop.permute.xlu0 %1500 }
 0x577   :  { %v1565_v12 = vsel %vm450_vm7, %v4389_v7, %v1501_v1 }
 0x578   :  { %v1572_v40 = vsel %vm1570_vm10, %v1565_v12, %v1525_v24  ;;  %v1531_v55 = vpop.permute.xlu2 %1530 }
 0x57e   :  { %v1503_v56 = vpop.permute.xlu0 %1502 }
 0x57f   :  { %v1566_v62 = vsel %vm450_vm7, %v4391_v23, %v1503_v56 }
 0x580   :  { %v1573_v33 = vsel %vm1570_vm10, %v1566_v62, %v1527_v52 }
 0x586   :  { %v1505_v35 = vpop.permute.xlu0 %1504 }
 0x587   :  { %v1567_v7 = vsel %vm450_vm7, %v4402_v61, %v1505_v35 }
 0x588   :  { %v1574_v6 = vsel %vm1570_vm10, %v1567_v7, %v1529_v21 }
 0x58e   :  { %v1507_v13 = vpop.permute.xlu0 %1506  ;;  %v1533_v19 = vpop.permute.xlu2 %1532 }
 0x58f   :  { %v1568_v23 = vsel %vm450_vm7, %v4406_v10, %v1507_v13  ;;  %v3461_v10 = vld [vmem:[%s5196_s9] ss:$0 sm:$0xff] }
 0x590   :  { %v1575_v53 = vsel %vm1570_vm10, %v1568_v23, %v1531_v55 }
 0x596   :  { %v1509_v46 = vpop.permute.xlu0 %1508 }
 0x597   :  { %v1569_v61 = vsel %vm450_vm7, %v4411_v16, %v1509_v46 }
 0x598   :  { %v1576_v11 = vsel %vm1570_vm10, %v1569_v61, %v1533_v19  ;;  %v1811_v61 = vld [vmem:[%s5199_s12 + $0x18] sm:$0xff]  ;;  %v1810_v19 = vld [vmem:[%s5199_s12 + $0x10] sm:$0xff] }
 0x599   :  { %1846 = vmatpush.msrb.mxu2 %v1811_v61 }
 0x59b   :  { %1847 = vmatpush.msrb.mxu2 %v1810_v19 }
 0x5a9   :  { %v1549_v2 = vpop.permute.xlu1 %1548 }
 0x5aa   :  { %v1578_v20 = vsel %vm551_vm9, %v1572_v40, %v1549_v2 }
 0x5ab   :  { %3254 = vmatmul.msk.f32.gmra.mxu1 %vm157_vm1, %v1578_v20 }
 0x5b1   :  { %v1551_v41 = vpop.permute.xlu1 %1550 }
 0x5b2   :  { %v1579_v27 = vsel %vm551_vm9, %v1573_v33, %v1551_v41 }
 0x5b3   :  { %3255 = vmatmul.msk.f32.gmra.mxu1 %vm157_vm1, %v1579_v27 }
 0x5ba   :  { %v1553_v29 = vpop.permute.xlu1 %1552 }
 0x5bb   :  { %v1580_v38 = vsel %vm551_vm9, %v1574_v6, %v1553_v29 }
 0x5bc   :  { %3256 = vmatmul.msk.f32.gmra.mxu1 %vm157_vm1, %v1580_v38 }
 0x5c2   :  { %v1555_v44 = vpop.permute.xlu1 %1554 }
 0x5c3   :  { %v1581_v8 = vsel %vm551_vm9, %v1575_v53, %v1555_v44 }
 0x5c4   :  { %3257 = vmatmul.msk.f32.gmra.mxu1 %vm157_vm1, %v1581_v8 }
 0x5ca   :  { %v1557_v54 = vpop.permute.xlu1 %1556 }
 0x5cb   :  { %v1582_v49 = vsel %vm551_vm9, %v1576_v11, %v1557_v54  ;;  %v1809_v54 = vld [vmem:[%s5199_s12 + $0x8] sm:$0xff]  ;;  %v1808_v11 = vld [vmem:[%s5199_s12] sm:$0xff] }
 0x5cc   :  { %3258 = vmatmul.msk.f32.gmra.mxu1 %vm157_vm1, %v1582_v49  ;;  %1848 = vmatpush.msrb.mxu2 %v1809_v54 }
 0x5ce   :  { %1849 = vmatpush.msrb.mxu2 %v1808_v11 }
 0x5ed   :  { %v1622_v17 = vpop.f32.mrf.mxu1 }
 0x5ee   :  { %v1640_v36 = vadd.f32 %v1622_v17, %v3818_v14 }
 0x5f0   :  { %v4475_v3 = vadd.f32 %v3461_v10, %v1640_v36 }
 0x5f2   :  { %v1658_v16 = vsel %vm157_vm1, %v4475_v3, 0.0 }
 0x5f3   :  { %1659 = vadd.xlane.f32.xlu0 %v1658_v16 }
 0x628   :  { %v1625_v48 = vpop.f32.mrf.mxu1 }
 0x629   :  { %v1641_v9 = vadd.f32 %v1625_v48, %v3825_v18 }
 0x62b   :  { %v4480_v45 = vadd.f32 %v3461_v10, %v1641_v9 }
 0x62d   :  { %v1661_v32 = vsel %vm157_vm1, %v4480_v45, 0.0 }
 0x62e   :  { %1662 = vadd.xlane.f32.xlu2 %v1661_v32 }
 0x630   :  { %v1628_v0 = vpop.f32.mrf.mxu1 }
 0x631   :  { %v1642_v58 = vadd.f32 %v1628_v0, %v3832_v22 }
 0x633   :  { %v4485_v60 = vadd.f32 %v3461_v10, %v1642_v58  ;;  %v4558_v58 = vld [vmem:[%s5197_s10] ss:$0 sm:$0xff] }
 0x635   :  { %v1664_v14 = vsel %vm157_vm1, %v4485_v60, 0.0 }
 0x636   :  { %1665 = vadd.xlane.f32.xlu1 %v1664_v14 }
 0x639   :  { %v1631_v43 = vpop.f32.mrf.mxu1 }
 0x63a   :  { %v1643_v59 = vadd.f32 %v1631_v43, %v3836_v25 }
 0x63c   :  { %v4490_v42 = vadd.f32 %v3461_v10, %v1643_v59  ;;  %v4563_v59 = vld [vmem:[%s5198_s11] ss:$0 sm:$0xff] }
 0x63e   :  { %v1667_v18 = vsel %vm157_vm1, %v4490_v42, 0.0 }
 0x63f   :  { %1668 = vadd.xlane.f32.xlu0 %v1667_v18 }
 0x641   :  { %v1634_v63 = vpop.f32.mrf.mxu1 }
 0x642   :  { %v1644_v57 = vadd.f32 %v1634_v63, %v3840_v28 }
 0x644   :  { %v4495_v47 = vadd.f32 %v3461_v10, %v1644_v57 }
 0x646   :  { %v1670_v22 = vsel %vm157_vm1, %v4495_v47, 0.0 }
 0x647   :  { %1671 = vadd.xlane.f32.xlu2 %v1670_v22 }
 0x649   :  { %v1637_v37 = vpop.f32.mrf.mxu1 }
 0x64a   :  { %v1645_v50 = vadd.f32 %v1637_v37, %v3844_v31 }
 0x64c   :  { %v4500_v4 = vadd.f32 %v3461_v10, %v1645_v50 }
 0x64e   :  { %v1673_v25 = vsel %vm157_vm1, %v4500_v4, 0.0 }
 0x64f   :  { %1674 = vadd.xlane.f32.xlu1 %v1673_v25 }
 0x666   :  { %v1660_v51 = vpop.xlane.xlu0 %1659 }
 0x667   :  { %v1676_v15 = vmul.f32 %v1660_v51, %v3848_v39 }
 0x669   :  { %v1682_v28 = vsub.f32 %v4475_v3, %v1676_v15 }
 0x66b   :  { %v1688_v5 = vmul.f32 %v1682_v28, %v1682_v28 }
 0x66d   :  { %v1694_v1 = vsel %vm157_vm1, %v1688_v5, 0.0 }
 0x66e   :  { %1695 = vadd.xlane.f32.xlu0 %v1694_v1 }
 0x6a1   :  { %v1663_v24 = vpop.xlane.xlu2 %1662 }
 0x6a2   :  { %v1677_v12 = vmul.f32 %v1663_v24, %v3848_v39 }
 0x6a4   :  { %v4509_v31 = vsub.f32 %v4480_v45, %v1677_v12 }
 0x6a6   :  { %v1689_v56 = vmul.f32 %v4509_v31, %v4509_v31 }
 0x6a8   :  { %v1697_v2 = vsel %vm157_vm1, %v1689_v56, 0.0 }
 0x6a9   :  { %1698 = vadd.xlane.f32.xlu2 %v1697_v2  ;;  %v1666_v40 = vpop.xlane.xlu1 %1665 }
 0x6aa   :  { %v1678_v20 = vmul.f32 %v1666_v40, %v3848_v39 }
 0x6ac   :  { %v4516_v62 = vsub.f32 %v4485_v60, %v1678_v20 }
 0x6ae   :  { %v1690_v52 = vmul.f32 %v4516_v62, %v4516_v62 }
 0x6b0   :  { %v1700_v35 = vsel %vm157_vm1, %v1690_v52, 0.0 }
 0x6b1   :  { %1701 = vadd.xlane.f32.xlu1 %v1700_v35 }
 0x6b2   :  { %v1669_v41 = vpop.xlane.xlu0 %1668 }
 0x6b3   :  { %v1679_v33 = vmul.f32 %v1669_v41, %v3848_v39 }
 0x6b5   :  { %v4523_v27 = vsub.f32 %v4490_v42, %v1679_v33 }
 0x6b7   :  { %v1691_v7 = vmul.f32 %v4523_v27, %v4523_v27 }
 0x6b9   :  { %v1703_v21 = vsel %vm157_vm1, %v1691_v7, 0.0 }
 0x6ba   :  { %1704 = vadd.xlane.f32.xlu0 %v1703_v21  ;;  %v1672_v13 = vpop.xlane.xlu2 %1671 }
 0x6bb   :  { %v1680_v29 = vmul.f32 %v1672_v13, %v3848_v39 }
 0x6bd   :  { %v4530_v6 = vsub.f32 %v4495_v47, %v1680_v29 }
 0x6bf   :  { %v1692_v38 = vmul.f32 %v4530_v6, %v4530_v6 }
 0x6c1   :  { %v1706_v23 = vsel %vm157_vm1, %v1692_v38, 0.0 }
 0x6c2   :  { %1707 = vadd.xlane.f32.xlu2 %v1706_v23  ;;  %v1675_v55 = vpop.xlane.xlu1 %1674 }
 0x6c3   :  { %v1681_v44 = vmul.f32 %v1675_v55, %v3848_v39 }
 0x6c5   :  { %v4537_v53 = vsub.f32 %v4500_v4, %v1681_v44 }
 0x6c7   :  { %v1693_v8 = vmul.f32 %v4537_v53, %v4537_v53 }
 0x6c9   :  { %v1709_v46 = vsel %vm157_vm1, %v1693_v8, 0.0 }
 0x6ca   :  { %1710 = vadd.xlane.f32.xlu1 %v1709_v46 }
 0x6e1   :  { %v1696_v49 = vpop.xlane.xlu0 %1695 }
 0x6e2   :  { %v1712_v10 = vmul.f32 %v1696_v49, %v3848_v39 }
 0x6e4   :  { %v1718_v17 = vadd.f32 1e-05, %v1712_v10 }
 0x6e6   :  { %3584 = vrsqrt.f32 %v1718_v17  ;;  %vm1730_vm12 = vweird.f32 %v1718_v17 }
 0x6ec   :  { %v3585_v36 = vpop.eup %3584 }
 0x6ed   :  { %v1725_v16 = vmul.f32 %v3585_v36, %v1718_v17  ;;  %vm1731_vm11 = vweird.f32 %v3585_v36 }
 0x6ee   :  { %vm1732_vm13 = vmor %vm1730_vm12, %vm1731_vm11 }
 0x6ef   :  { %v1726_v48 = vmul.f32 %v3585_v36, %v1725_v16 }
 0x6f1   :  { %v1727_v9 = vmul.f32 0.5, %v1726_v48 }
 0x6f3   :  { %v1728_v32 = vsub.f32 1.5, %v1727_v9 }
 0x6f5   :  { %v1729_v0 = vmul.f32 %v3585_v36, %v1728_v32 }
 0x6f7   :  { %v1733_v14 = vsel %vm1732_vm13, %v3585_v36, %v1729_v0 }
 0x6f8   :  { %v1784_v43 = vmul.f32 %v1733_v14, %v1682_v28 }
 0x6fa   :  { %v1793_v18 = vmul.f32 %v4558_v58, %v1784_v43 }
 0x6fc   :  { %v1802_v63 = vadd.f32 %v4563_v59, %v1793_v18 }
 0x6fe   :  { %3259 = vmatmul.msk.f32.vlgmr.msrb.gmra.mxu2 %vm157_vm1, %v1802_v63 }
 0x71c   :  { %v1699_v57 = vpop.xlane.xlu2 %1698 }
 0x71d   :  { %v1713_v22 = vmul.f32 %v1699_v57, %v3848_v39 }
 0x71f   :  { %v1719_v37 = vadd.f32 1e-05, %v1713_v22 }
 0x721   :  { %3586 = vrsqrt.f32 %v1719_v37  ;;  %vm1740_vm15 = vweird.f32 %v1719_v37 }
 0x724   :  { %v1702_v50 = vpop.xlane.xlu1 %1701 }
 0x725   :  { %v1714_v25 = vmul.f32 %v1702_v50, %v3848_v39 }
 0x727   :  { %v3587_v51 = vpop.eup %3586  ;;  %v1720_v15 = vadd.f32 1e-05, %v1714_v25 }
 0x728   :  { %v1735_v28 = vmul.f32 %v3587_v51, %v1719_v37  ;;  %vm1741_vm14 = vweird.f32 %v3587_v51 }
 0x729   :  { %3588 = vrsqrt.f32 %v1720_v15  ;;  %vm1742_vm2 = vmor %vm1740_vm15, %vm1741_vm14  ;;  %vm1750_vm4 = vweird.f32 %v1720_v15 }
 0x72a   :  { %v1736_v5 = vmul.f32 %v3587_v51, %v1735_v28 }
 0x72c   :  { %v1737_v1 = vmul.f32 0.5, %v1736_v5 }
 0x72d   :  { %v1705_v24 = vpop.xlane.xlu0 %1704 }
 0x72e   :  { %v1738_v12 = vsub.f32 1.5, %v1737_v1  ;;  %v1715_v56 = vmul.f32 %v1705_v24, %v3848_v39 }
 0x72f   :  { %v3589_v2 = vpop.eup %3588 }
 0x730   :  { %v1739_v40 = vmul.f32 %v3587_v51, %v1738_v12  ;;  %v1745_v20 = vmul.f32 %v3589_v2, %v1720_v15  ;;  %v1721_v52 = vadd.f32 1e-05, %v1715_v56  ;;  %vm1751_vm3 = vweird.f32 %v3589_v2 }
 0x731   :  { %vm1752_vm5 = vmor %vm1750_vm4, %vm1751_vm3 }
 0x732   :  { %v1743_v35 = vsel %vm1742_vm2, %v3587_v51, %v1739_v40  ;;  %v1746_v41 = vmul.f32 %v3589_v2, %v1745_v20  ;;  %3590 = vrsqrt.f32 %v1721_v52  ;;  %vm1760_vm8 = vweird.f32 %v1721_v52  ;;  %v2123_v20 = vld [vmem:[%s5201_s14 + $0x70] sm:$0xff] }
 0x733   :  { %v1785_v33 = vmul.f32 %v1743_v35, %v4509_v31 }
 0x734   :  { %v1747_v7 = vmul.f32 0.5, %v1746_v41  ;;  %v2120_v41 = vld [vmem:[%s5201_s14 + $0x58] sm:$0xff] }
 0x735   :  { %v1708_v21 = vpop.xlane.xlu2 %1707  ;;  %v1794_v13 = vmul.f32 %v4558_v58, %v1785_v33 }
 0x736   :  { %v1748_v29 = vsub.f32 1.5, %v1747_v7  ;;  %v1716_v38 = vmul.f32 %v1708_v21, %v3848_v39  ;;  %v2119_v7 = vld [vmem:[%s5201_s14 + $0x50] sm:$0xff] }
 0x737   :  { %v1803_v23 = vadd.f32 %v4563_v59, %v1794_v13  ;;  %v2118_v13 = vld [vmem:[%s5201_s14 + $0x48] sm:$0xff] }
 0x738   :  { %v3591_v55 = vpop.eup %3590  ;;  %v1749_v44 = vmul.f32 %v3589_v2, %v1748_v29  ;;  %v1722_v8 = vadd.f32 1e-05, %v1716_v38  ;;  %v2117_v38 = vld [vmem:[%s5201_s14 + $0x40] sm:$0xff] }
 0x739   :  { %v1755_v46 = vmul.f32 %v3591_v55, %v1721_v52  ;;  %3260 = vmatmul.msk.f32.gmra.mxu2 %vm157_vm1, %v1803_v23  ;;  %vm1761_vm6 = vweird.f32 %v3591_v55 }
 0x73a   :  { %v1753_v61 = vsel %vm1752_vm5, %v3589_v2, %v1749_v44  ;;  %3592 = vrsqrt.f32 %v1722_v8  ;;  %vm1762_vm11 = vmor %vm1760_vm8, %vm1761_vm6  ;;  %vm1770_vm13 = vweird.f32 %v1722_v8  ;;  %v2115_v44 = vld [vmem:[%s5201_s14 + $0x30] sm:$0xff] }
 0x73b   :  { %v1756_v31 = vmul.f32 %v3591_v55, %v1755_v46  ;;  %v1786_v19 = vmul.f32 %v1753_v61, %v4516_v62  ;;  %v2113_v46 = vld [vmem:[%s5201_s14 + $0x20] sm:$0xff] }
 0x73d   :  { %v1757_v54 = vmul.f32 0.5, %v1756_v31  ;;  %v1711_v11 = vpop.xlane.xlu1 %1710  ;;  %v1795_v49 = vmul.f32 %v4558_v58, %v1786_v19  ;;  %v2112_v31 = vld [vmem:[%s5201_s14 + $0x18] sm:$0xff] }
 0x73e   :  { %v1717_v10 = vmul.f32 %v1711_v11, %v3848_v39 }
 0x73f   :  { %v1758_v17 = vsub.f32 1.5, %v1757_v54  ;;  %v1804_v36 = vadd.f32 %v4563_v59, %v1795_v49  ;;  %v2111_v54 = vld [vmem:[%s5201_s14 + $0x10] sm:$0xff] }
 0x740   :  { %v3593_v16 = vpop.eup %3592  ;;  %v1723_v48 = vadd.f32 1e-05, %v1717_v10 }
 0x741   :  { %v1759_v9 = vmul.f32 %v3591_v55, %v1758_v17  ;;  %v1765_v32 = vmul.f32 %v3593_v16, %v1722_v8  ;;  %3261 = vmatmul.msk.f32.gmra.mxu2 %vm157_vm1, %v1804_v36  ;;  %vm1771_vm12 = vweird.f32 %v3593_v16  ;;  %v2114_v8 = vld [vmem:[%s5201_s14 + $0x28] sm:$0xff] }
 0x742   :  { %3594 = vrsqrt.f32 %v1723_v48  ;;  %vm1772_vm14 = vmor %vm1770_vm13, %vm1771_vm12  ;;  %vm1780_vm2 = vweird.f32 %v1723_v48  ;;  %v2110_v17 = vld [vmem:[%s5201_s14 + $0x8] sm:$0xff] }
 0x743   :  { %v1763_v62 = vsel %vm1762_vm11, %v3591_v55, %v1759_v9  ;;  %v1766_v0 = vmul.f32 %v3593_v16, %v1765_v32  ;;  %v2116_v55 = vld [vmem:[%s5201_s14 + $0x38] sm:$0xff] }
 0x744   :  { %v1787_v14 = vmul.f32 %v1763_v62, %v4523_v27 }
 0x745   :  { %v1767_v43 = vmul.f32 0.5, %v1766_v0 }
 0x746   :  { %v1796_v18 = vmul.f32 %v4558_v58, %v1787_v14 }
 0x747   :  { %v1768_v63 = vsub.f32 1.5, %v1767_v43 }
 0x748   :  { %v3595_v57 = vpop.eup %3594  ;;  %v1805_v22 = vadd.f32 %v4563_v59, %v1796_v18 }
 0x749   :  { %v1769_v37 = vmul.f32 %v3593_v16, %v1768_v63  ;;  %v1775_v50 = vmul.f32 %v3595_v57, %v1723_v48  ;;  %vm1781_vm15 = vweird.f32 %v3595_v57 }
 0x74a   :  { %3262 = vmatmul.msk.f32.gmra.mxu2 %vm157_vm1, %v1805_v22  ;;  %vm1782_vm3 = vmor %vm1780_vm2, %vm1781_vm15 }
 0x74b   :  { %v1773_v25 = vsel %vm1772_vm14, %v3593_v16, %v1769_v37  ;;  %v1776_v51 = vmul.f32 %v3595_v57, %v1775_v50  ;;  %v2109_v16 = vld [vmem:[%s5201_s14] sm:$0xff] }
 0x74c   :  { %v1788_v15 = vmul.f32 %v1773_v25, %v4530_v6  ;;  %v2124_v6 = vld [vmem:[%s5201_s14 + $0x78] sm:$0xff] }
 0x74d   :  { %v1777_v28 = vmul.f32 0.5, %v1776_v51  ;;  %2129 = vmatpush.msrb.mxu3 %v2124_v6 }
 0x74e   :  { %v1797_v27 = vmul.f32 %v4558_v58, %v1788_v15 }
 0x74f   :  { %v1778_v5 = vsub.f32 1.5, %v1777_v28  ;;  %2130 = vmatpush.msrb.mxu3 %v2123_v20 }
 0x750   :  { %v1806_v1 = vadd.f32 %v4563_v59, %v1797_v27 }
 0x751   :  { %v1779_v24 = vmul.f32 %v3595_v57, %v1778_v5 }
 0x752   :  { %3263 = vmatmul.msk.f32.gmra.mxu2 %vm157_vm1, %v1806_v1  ;;  %v3666_v1 = vmov -1.0  }
 0x753   :  { %v1783_v12 = vsel %vm1782_vm3, %v3595_v57, %v1779_v24 }
 0x754   :  { %v1789_v56 = vmul.f32 %v1783_v12, %v4537_v53  ;;  %v4602_v53 = vld [vmem:[%s5200_s13] ss:$0 sm:$0xff] }
 0x756   :  { %v1798_v2 = vmul.f32 %v4558_v58, %v1789_v56  ;;  %v2122_v58 = vld [vmem:[%s5201_s14 + $0x68] sm:$0xff] }
 0x757   :  { %2131 = vmatpush.msrb.mxu3 %v2122_v58 }
 0x758   :  { %v1807_v40 = vadd.f32 %v4563_v59, %v1798_v2  ;;  %v2121_v59 = vld [vmem:[%s5201_s14 + $0x60] sm:$0xff] }
 0x759   :  { %2132 = vmatpush.msrb.mxu3 %v2121_v59 }
 0x75a   :  { %3264 = vmatmul.msk.f32.gmra.mxu2 %vm157_vm1, %v1807_v40 }
 0x75b   :  { %2133 = vmatpush.msrb.mxu3 %v2120_v41 }
 0x75d   :  { %2134 = vmatpush.msrb.mxu3 %v2119_v7 }
 0x75f   :  { %2135 = vmatpush.msrb.mxu3 %v2118_v13 }
 0x761   :  { %2136 = vmatpush.msrb.mxu3 %v2117_v38 }
 0x763   :  { %2137 = vmatpush.msrb.mxu3 %v2116_v55 }
 0x765   :  { %2138 = vmatpush.msrb.mxu3 %v2115_v44 }
 0x767   :  { %2139 = vmatpush.msrb.mxu3 %v2114_v8 }
 0x769   :  { %2140 = vmatpush.msrb.mxu3 %v2113_v46 }
 0x76b   :  { %2141 = vmatpush.msrb.mxu3 %v2112_v31 }
 0x76d   :  { %2142 = vmatpush.msrb.mxu3 %v2111_v54 }
 0x76f   :  { %2143 = vmatpush.msrb.mxu3 %v2110_v17 }
 0x771   :  { %2144 = vmatpush.msrb.mxu3 %v2109_v16 }
 0x781   :  { %v1851_v52 = vpop.f32.mrf.mxu2 }
 0x782   :  { %v4611_v35 = vadd.f32 %v4602_v53, %v1851_v52 }
 0x784   :  { %v1875_v33 = vmul.f32 0.70710677, %v4611_v35  ;;  %v1869_v56 = vmul.f32 0.5, %v4611_v35 }
 0x786   :  { %v1893_v21 = vand.u32 2147483647, %v1875_v33  ;;  %vm1881_vm11 = vcmp.ge.f32.partialorder %v1875_v33, 0.0 }
 0x787   :  { %v1887_v24 = vsel %vm1881_vm11, 1.0, %v3666_v1 }
 0x788   :  { %v1899_v29 = vmul.f32 0.3275911, %v1893_v21  ;;  %v2055_v0 = vsub.f32 0.0, %v1893_v21 }
 0x78a   :  { %v1905_v23 = vadd.f32 1.0, %v1899_v29  ;;  %v2061_v18 = vmul.f32 %v2055_v0, %v1893_v21 }
 0x78c   :  { %3596 = vrcp.f32 %v1905_v23  ;;  %v1920_v49 = vand.u32 2147483647, %v1905_v23  ;;  %v1922_v10 = vand.u32 2147483648, %v1905_v23  ;;  %vm1916_vm5 = vweird.f32 %v1905_v23 }
 0x78d   :  { %v2067_v22 = vmul.f32 1.442695, %v2061_v18 }
 0x78e   :  { %v1923_v9 = vor.u32 1.1754944e-38, %v1922_v10  ;;  %vm1921_vm8 = vcmp.eq.f32.partialorder %v1920_v49, 8.507059e+37 }
 0x78f   :  { %3598 = vpow2.f32 %v2067_v22 }
 0x792   :  { %v3597_v61 = vpop.eup %3596 }
 0x793   :  { %v1912_v19 = vmul.f32 %v3597_v61, %v1905_v23  ;;  %vm1917_vm4 = vweird.f32 %v3597_v61 }
 0x794   :  { %vm1918_vm6 = vmor %vm1916_vm5, %vm1917_vm4 }
 0x795   :  { %v1913_v11 = vsub.f32 1.0, %v1912_v19  ;;  %v3599_v28 = vpop.eup %3598 }
 0x797   :  { %v1914_v36 = vmul.f32 %v3597_v61, %v1913_v11 }
 0x799   :  { %v1915_v48 = vadd.f32 %v3597_v61, %v1914_v36 }
 0x79b   :  { %v1919_v32 = vsel %vm1918_vm6, %v3597_v61, %v1915_v48 }
 0x79c   :  { %v1924_v62 = vsel %vm1921_vm8, %v1923_v9, %v1919_v32 }
 0x79d   :  { %v2001_v14 = vmul.f32 1.0614054, %v1924_v62 }
 0x79f   :  { %v2007_v43 = vadd.f32 -1.4531521, %v2001_v14 }
 0x7a1   :  { %v2013_v63 = vmul.f32 %v2007_v43, %v1924_v62 }
 0x7a3   :  { %v2019_v57 = vadd.f32 1.4214138, %v2013_v63 }
 0x7a5   :  { %v2025_v37 = vmul.f32 %v2019_v57, %v1924_v62 }
 0x7a7   :  { %v2031_v50 = vadd.f32 -0.28449672, %v2025_v37 }
 0x7a9   :  { %v2037_v25 = vmul.f32 %v2031_v50, %v1924_v62 }
 0x7ab   :  { %v2043_v51 = vadd.f32 0.2548296, %v2037_v25 }
 0x7ad   :  { %v2049_v15 = vmul.f32 %v2043_v51, %v1924_v62 }
 0x7af   :  { %v2079_v27 = vmul.f32 %v3599_v28, %v2049_v15 }
 0x7b1   :  { %v2085_v5 = vsub.f32 1.0, %v2079_v27 }
 0x7b3   :  { %v2091_v12 = vmul.f32 %v2085_v5, %v1887_v24 }
 0x7b5   :  { %v2097_v2 = vadd.f32 1.0, %v2091_v12 }
 0x7b7   :  { %v2103_v40 = vmul.f32 %v2097_v2, %v1869_v56 }
 0x7b9   :  { %2145 = vmatmul.f32.vlgmr.msrb.gmra.mxu3 %v2103_v40 }
 0x7bc   :  { %v1854_v6 = vpop.f32.mrf.mxu2 }
 0x7bd   :  { %v4653_v20 = vadd.f32 %v4602_v53, %v1854_v6 }
 0x7bf   :  { %v4656_v58 = vmul.f32 0.70710677, %v4653_v20 }
 0x7c1   :  { %v1894_v59 = vand.u32 2147483647, %v4656_v58 }
 0x7c3   :  { %v1900_v52 = vmul.f32 0.3275911, %v1894_v59  ;;  %v2056_v0 = vsub.f32 0.0, %v1894_v59 }
 0x7c4   :  { %v1857_v41 = vpop.f32.mrf.mxu2 }
 0x7c5   :  { %v1906_v33 = vadd.f32 1.0, %v1900_v52  ;;  %v4660_v7 = vadd.f32 %v4602_v53, %v1857_v41  ;;  %v2062_v51 = vmul.f32 %v2056_v0, %v1894_v59 }
 0x7c7   :  { %3600 = vrcp.f32 %v1906_v33  ;;  %v4663_v35 = vmul.f32 0.70710677, %v4660_v7  ;;  %v1937_v19 = vand.u32 2147483648, %v1906_v33  ;;  %v1935_v49 = vand.u32 2147483647, %v1906_v33 }
 0x7c8   :  { %vm1931_vm13 = vweird.f32 %v1906_v33 }
 0x7c9   :  { %v1895_v21 = vand.u32 2147483647, %v4663_v35  ;;  %v1938_v32 = vor.u32 1.1754944e-38, %v1937_v19  ;;  %vm1936_vm15 = vcmp.eq.f32.partialorder %v1935_v49, 8.507059e+37 }
 0x7cb   :  { %v1901_v13 = vmul.f32 0.3275911, %v1895_v21  ;;  %v2057_v15 = vsub.f32 0.0, %v1895_v21 }
 0x7cd   :  { %v3601_v29 = vpop.eup %3600  ;;  %v1907_v38 = vadd.f32 1.0, %v1901_v13  ;;  %v1860_v23 = vpop.f32.mrf.mxu2 }
 0x7ce   :  { %v1927_v55 = vmul.f32 %v3601_v29, %v1906_v33  ;;  %v4667_v44 = vadd.f32 %v4602_v53, %v1860_v23  ;;  %vm1932_vm12 = vweird.f32 %v3601_v29  ;;  %v2069_v33 = vmul.f32 1.442695, %v2062_v51 }
 0x7cf   :  { %3602 = vrcp.f32 %v1907_v38  ;;  %vm1933_vm14 = vmor %vm1931_vm13, %vm1932_vm12  ;;  %v1952_v18 = vand.u32 2147483648, %v1907_v38  ;;  %v1950_v22 = vand.u32 2147483647, %v1907_v38  ;;  %vm1946_vm3 = vweird.f32 %v1907_v38 }
 0x7d0   :  { %v1928_v8 = vsub.f32 1.0, %v1927_v55  ;;  %v4670_v46 = vmul.f32 0.70710677, %v4667_v44  ;;  %vm1882_vm13 = vcmp.ge.f32.partialorder %v4656_v58, 0.0 }
 0x7d1   :  { %v1953_v5 = vor.u32 1.1754944e-38, %v1952_v18  ;;  %vm1951_vm5 = vcmp.eq.f32.partialorder %v1950_v22, 8.507059e+37 }
 0x7d2   :  { %v4673_v61 = vand.u32 2147483647, %v4670_v46  ;;  %v1929_v31 = vmul.f32 %v3601_v29, %v1928_v8 }
 0x7d4   :  { %v1902_v54 = vmul.f32 0.3275911, %v4673_v61  ;;  %v1930_v11 = vadd.f32 %v3601_v29, %v1929_v31 }
 0x7d5   :  { %v3603_v10 = vpop.eup %3602  ;;  %v1863_v17 = vpop.f32.mrf.mxu2 }
 0x7d6   :  { %v1942_v36 = vmul.f32 %v3603_v10, %v1907_v38  ;;  %v4676_v16 = vadd.f32 1.0, %v1902_v54  ;;  %v4679_v48 = vadd.f32 %v4602_v53, %v1863_v17  ;;  %v1934_v9 = vsel %vm1933_vm14, %v3601_v29, %v1930_v11 }
 0x7d7   :  { %v1939_v43 = vsel %vm1936_vm15, %v1938_v32, %v1934_v9  ;;  %vm1947_vm2 = vweird.f32 %v3603_v10  ;;  %v2063_v29 = vmul.f32 %v2057_v15, %v1895_v21  ;;  %v2058_v32 = vsub.f32 0.0, %v4673_v61 }
 0x7d8   :  { %v1943_v62 = vsub.f32 1.0, %v1942_v36  ;;  %3604 = vrcp.f32 %v4676_v16  ;;  %v4683_v14 = vmul.f32 0.70710677, %v4679_v48  ;;  %v2002_v63 = vmul.f32 1.0614054, %v1939_v43  ;;  %vm1948_vm4 = vmor %vm1946_vm3, %vm1947_vm2 }
 0x7d9   :  { %v1967_v31 = vand.u32 2147483648, %v4676_v16  ;;  %v1965_v11 = vand.u32 2147483647, %v4676_v16  ;;  %vm1961_vm8 = vweird.f32 %v4676_v16  ;;  %v2071_v21 = vmul.f32 1.442695, %v2063_v29 }
 0x7da   :  { %v1944_v57 = vmul.f32 %v3603_v10, %v1943_v62  ;;  %v4686_v37 = vand.u32 2147483647, %v4683_v14  ;;  %v2008_v50 = vadd.f32 -1.4531521, %v2002_v63  ;;  %vm1883_vm15 = vcmp.ge.f32.partialorder %v4663_v35, 0.0 }
 0x7db   :  { %v1968_v18 = vor.u32 1.1754944e-38, %v1967_v31  ;;  %vm1966_vm12 = vcmp.eq.f32.partialorder %v1965_v11, 8.507059e+37 }
 0x7dc   :  { %v1945_v25 = vadd.f32 %v3603_v10, %v1944_v57  ;;  %v1903_v28 = vmul.f32 0.3275911, %v4686_v37  ;;  %v2014_v56 = vmul.f32 %v2008_v50, %v1939_v43  ;;  %v2059_v11 = vsub.f32 0.0, %v4686_v37 }
 0x7dd   :  { %v1866_v27 = vpop.f32.mrf.mxu2 }
 0x7de   :  { %v3605_v24 = vpop.eup %3604  ;;  %v4690_v12 = vadd.f32 %v4602_v53, %v1866_v27  ;;  %v1949_v2 = vsel %vm1948_vm4, %v3603_v10, %v1945_v25  ;;  %v4693_v6 = vadd.f32 1.0, %v1903_v28  ;;  %v2020_v41 = vadd.f32 1.4214138, %v2014_v56 }
 0x7df   :  { %v1957_v40 = vmul.f32 %v3605_v24, %v4676_v16  ;;  %v4695_v52 = vsel %vm1951_vm5, %v1953_v5, %v1949_v2  ;;  %vm1962_vm6 = vweird.f32 %v3605_v24  ;;  %v2064_v28 = vmul.f32 %v2058_v32, %v4673_v61 }
 0x7e0   :  { %v4698_v59 = vmul.f32 0.70710677, %v4690_v12  ;;  %3606 = vrcp.f32 %v4693_v6  ;;  %v2003_v53 = vmul.f32 1.0614054, %v4695_v52  ;;  %v2026_v23 = vmul.f32 %v2020_v41, %v1939_v43  ;;  %vm1963_vm11 = vmor %vm1961_vm8, %vm1962_vm6 }
 0x7e1   :  { %v1958_v13 = vsub.f32 1.0, %v1957_v40  ;;  %3608 = vpow2.f32 %v2069_v33  ;;  %v1980_v5 = vand.u32 2147483647, %v4693_v6  ;;  %v1870_v41 = vmul.f32 0.5, %v4653_v20 }
 0x7e2   :  { %v4703_v38 = vand.u32 2147483647, %v4698_v59  ;;  %v2009_v55 = vadd.f32 -1.4531521, %v2003_v53  ;;  %v2032_v54 = vadd.f32 -0.28449672, %v2026_v23  ;;  %vm1976_vm2 = vweird.f32 %v4693_v6 }
 0x7e3   :  { %v1959_v8 = vmul.f32 %v3605_v24, %v1958_v13  ;;  %v2073_v23 = vmul.f32 1.442695, %v2064_v28  ;;  %vm1981_vm4 = vcmp.eq.f32.partialorder %v1980_v5, 8.507059e+37 }
 0x7e4   :  { %v1904_v19 = vmul.f32 0.3275911, %v4703_v38  ;;  %v2015_v49 = vmul.f32 %v2009_v55, %v4695_v52  ;;  %v2038_v36 = vmul.f32 %v2032_v54, %v1939_v43 }
 0x7e5   :  { %v1960_v10 = vadd.f32 %v3605_v24, %v1959_v8 }
 0x7e6   :  { %v4710_v17 = vadd.f32 1.0, %v1904_v19  ;;  %v3607_v9 = vpop.eup %3606  ;;  %v2021_v62 = vadd.f32 1.4214138, %v2015_v49  ;;  %v2044_v57 = vadd.f32 0.2548296, %v2038_v36 }
 0x7e7   :  { %v1964_v0 = vsel %vm1963_vm11, %v3605_v24, %v1960_v10  ;;  %v1972_v63 = vmul.f32 %v3607_v9, %v4693_v6  ;;  %v3609_v15 = vpop.eup %3608  ;;  %v1982_v24 = vand.u32 2147483648, %v4693_v6  ;;  %vm1977_vm14 = vweird.f32 %v3607_v9 }
 0x7e8   :  { %3610 = vrcp.f32 %v4710_v17  ;;  %v2027_v16 = vmul.f32 %v2021_v62, %v4695_v52  ;;  %v4717_v22 = vsel %vm1966_vm12, %v1968_v18, %v1964_v0  ;;  %v2050_v25 = vmul.f32 %v2044_v57, %v1939_v43  ;;  %vm1978_vm3 = vmor %vm1976_vm2, %vm1977_vm14 }
 0x7e9   :  { %3612 = vpow2.f32 %v2071_v21  ;;  %v1973_v50 = vsub.f32 1.0, %v1972_v63  ;;  %v2004_v51 = vmul.f32 1.0614054, %v4717_v22  ;;  %v1888_v43 = vsel %vm1882_vm13, 1.0, %v3666_v1 }
 0x7ea   :  { %v2033_v27 = vadd.f32 -0.28449672, %v2027_v16  ;;  %v2080_v56 = vmul.f32 %v3609_v15, %v2050_v25  ;;  %v1983_v20 = vor.u32 1.1754944e-38, %v1982_v24  ;;  %v1997_v62 = vand.u32 2147483648, %v4710_v17 }
 0x7eb   :  { %v2010_v2 = vadd.f32 -1.4531521, %v2004_v51  ;;  %v1974_v40 = vmul.f32 %v3607_v9, %v1973_v50  ;;  %v1995_v63 = vand.u32 2147483647, %v4710_v17  ;;  %3614 = vpow2.f32 %v2073_v23 }
 0x7ec   :  { %v2039_v33 = vmul.f32 %v2033_v27, %v4695_v52  ;;  %v2086_v13 = vsub.f32 1.0, %v2080_v56  ;;  %v2065_v50 = vmul.f32 %v2059_v11, %v4686_v37  ;;  %vm1991_vm6 = vweird.f32 %v4710_v17 }
 0x7ed   :  { %v2016_v53 = vmul.f32 %v2010_v2, %v4717_v22  ;;  %v1975_v29 = vadd.f32 %v3607_v9, %v1974_v40  ;;  %v1889_v51 = vsel %vm1883_vm15, 1.0, %v3666_v1  ;;  %v1998_v27 = vor.u32 1.1754944e-38, %v1997_v62 }
 0x7ee   :  { %v3611_v61 = vpop.eup %3610  ;;  %v2045_v8 = vadd.f32 0.2548296, %v2039_v33  ;;  %v2092_v19 = vmul.f32 %v2086_v13, %v1888_v43  ;;  %vm1996_vm11 = vcmp.eq.f32.partialorder %v1995_v63, 8.507059e+37  ;;  %v2060_v56 = vsub.f32 0.0, %v4703_v38 }
 0x7ef   :  { %v1987_v55 = vmul.f32 %v3611_v61, %v4710_v17  ;;  %v3613_v31 = vpop.eup %3612  ;;  %v2022_v54 = vadd.f32 1.4214138, %v2016_v53  ;;  %v1979_v58 = vsel %vm1978_vm3, %v3607_v9, %v1975_v29  ;;  %vm1992_vm5 = vweird.f32 %v3611_v61 }
 0x7f0   :  { %v2051_v10 = vmul.f32 %v2045_v8, %v4695_v52  ;;  %v1984_v21 = vsel %vm1981_vm4, %v1983_v20, %v1979_v58  ;;  %v2098_v36 = vadd.f32 1.0, %v2092_v19  ;;  %vm1993_vm8 = vmor %vm1991_vm6, %vm1992_vm5  ;;  %v1871_v17 = vmul.f32 0.5, %v4660_v7 }
 0x7f1   :  { %v1988_v49 = vsub.f32 1.0, %v1987_v55  ;;  %v2028_v6 = vmul.f32 %v2022_v54, %v4717_v22  ;;  %v2005_v32 = vmul.f32 1.0614054, %v1984_v21  ;;  %v3615_v35 = vpop.eup %3614  ;;  %vm1884_vm12 = vcmp.ge.f32.partialorder %v4670_v46, 0.0 }
 0x7f2   :  { %v2081_v0 = vmul.f32 %v3613_v31, %v2051_v10  ;;  %v2104_v9 = vmul.f32 %v2098_v36, %v1870_v41  ;;  %v2075_v41 = vmul.f32 1.442695, %v2065_v50  ;;  %v1890_v19 = vsel %vm1884_vm12, 1.0, %v3666_v1 }
 0x7f3   :  { %v1989_v18 = vmul.f32 %v3611_v61, %v1988_v49  ;;  %v2034_v57 = vadd.f32 -0.28449672, %v2028_v6  ;;  %v2011_v16 = vadd.f32 -1.4531521, %v2005_v32  ;;  %v1872_v10 = vmul.f32 0.5, %v4667_v44 }
 0x7f4   :  { %v2087_v25 = vsub.f32 1.0, %v2081_v0  ;;  %2148 = vmatmul.f32.gmra.mxu3 %v2104_v9  ;;  %3616 = vpow2.f32 %v2075_v41  ;;  %vm1885_vm13 = vcmp.ge.f32.partialorder %v4683_v14, 0.0  ;;  %v1873_v44 = vmul.f32 0.5, %v4679_v48 }
 0x7f5   :  { %v1990_v52 = vadd.f32 %v3611_v61, %v1989_v18  ;;  %v2040_v15 = vmul.f32 %v2034_v57, %v4717_v22  ;;  %v2017_v28 = vmul.f32 %v2011_v16, %v1984_v21  ;;  %v1891_v63 = vsel %vm1885_vm13, 1.0, %v3666_v1 }
 0x7f6   :  { %v2093_v5 = vmul.f32 %v2087_v25, %v1889_v51  ;;  %vm1886_vm14 = vcmp.ge.f32.partialorder %v4698_v59, 0.0  ;;  %vm2445_vm2 = vcmask 254976  }
 0x7f7   :  { %v1994_v24 = vsel %vm1993_vm8, %v3611_v61, %v1990_v52  ;;  %v2046_v37 = vadd.f32 0.2548296, %v2040_v15  ;;  %v2023_v2 = vadd.f32 1.4214138, %v2017_v28  ;;  %v2066_v61 = vmul.f32 %v2060_v56, %v4703_v38 }
 0x7f8   :  { %v1999_v40 = vsel %vm1996_vm11, %v1998_v27, %v1994_v24  ;;  %v2099_v43 = vadd.f32 1.0, %v2093_v5  ;;  %v1892_v51 = vsel %vm1886_vm14, 1.0, %v3666_v1  ;;  %v1874_v28 = vmul.f32 0.5, %v4690_v12  ;;  %v3465_v24 = vld [vmem:[%s5202_s15] ss:$0 sm:$0xff] }
 0x7f9   :  { %v2006_v33 = vmul.f32 1.0614054, %v1999_v40  ;;  %v2052_v13 = vmul.f32 %v2046_v37, %v4717_v22  ;;  %v2029_v53 = vmul.f32 %v2023_v2, %v1984_v21  ;;  %v2077_v58 = vmul.f32 1.442695, %v2066_v61 }
 0x7fa   :  { %v2105_v29 = vmul.f32 %v2099_v43, %v1871_v17  ;;  %v3617_v6 = vpop.eup %3616 }
 0x7fb   :  { %v2012_v23 = vadd.f32 -1.4531521, %v2006_v33  ;;  %v2082_v55 = vmul.f32 %v3615_v35, %v2052_v13  ;;  %v2035_v8 = vadd.f32 -0.28449672, %v2029_v53  ;;  %3618 = vpow2.f32 %v2077_v58 }
 0x7fc   :  { %2151 = vmatmul.f32.gmra.mxu3 %v2105_v29 }
 0x7fd   :  { %v2018_v20 = vmul.f32 %v2012_v23, %v1999_v40  ;;  %v2088_v31 = vsub.f32 1.0, %v2082_v55  ;;  %v2041_v7 = vmul.f32 %v2035_v8, %v1984_v21 }
 0x7ff   :  { %v2024_v54 = vadd.f32 1.4214138, %v2018_v20  ;;  %v2094_v11 = vmul.f32 %v2088_v31, %v1890_v19  ;;  %v2047_v22 = vadd.f32 0.2548296, %v2041_v7 }
 0x801   :  { %v2030_v49 = vmul.f32 %v2024_v54, %v1999_v40  ;;  %v2100_v36 = vadd.f32 1.0, %v2094_v11  ;;  %v2053_v46 = vmul.f32 %v2047_v22, %v1984_v21  ;;  %v3619_v50 = vpop.eup %3618 }
 0x803   :  { %v2036_v38 = vadd.f32 -0.28449672, %v2030_v49  ;;  %v2106_v32 = vmul.f32 %v2100_v36, %v1872_v10  ;;  %v2083_v62 = vmul.f32 %v3617_v6, %v2053_v46 }
 0x805   :  { %v2042_v0 = vmul.f32 %v2036_v38, %v1999_v40  ;;  %2154 = vmatmul.f32.gmra.mxu3 %v2106_v32  ;;  %v2089_v18 = vsub.f32 1.0, %v2083_v62 }
 0x807   :  { %v2048_v9 = vadd.f32 0.2548296, %v2042_v0  ;;  %v2095_v57 = vmul.f32 %v2089_v18, %v1891_v63 }
 0x809   :  { %v2054_v16 = vmul.f32 %v2048_v9, %v1999_v40  ;;  %v2101_v25 = vadd.f32 1.0, %v2095_v57 }
 0x80b   :  { %v2084_v21 = vmul.f32 %v3619_v50, %v2054_v16  ;;  %v2107_v52 = vmul.f32 %v2101_v25, %v1873_v44 }
 0x80d   :  { %v2090_v14 = vsub.f32 1.0, %v2084_v21  ;;  %2157 = vmatmul.f32.gmra.mxu3 %v2107_v52 }
 0x80f   :  { %v2096_v15 = vmul.f32 %v2090_v14, %v1892_v51  ;;  %v3270_v51 = vld [vmem:[%s5193_s6 + $0x38] sm:$0xff] }
 0x810   :  { %2359 = vmatpush.msrb.mxu0 %v3270_v51 }
 0x811   :  { %v2102_v27 = vadd.f32 1.0, %v2096_v15  ;;  %v3280_v15 = vld [vmem:[%s5194_s7 + $0x38] sm:$0xff] }
 0x812   :  { %2399 = vmatpush.msra.mxu1 %v3280_v15 }
 0x813   :  { %v2108_v5 = vmul.f32 %v2102_v27, %v1874_v28  ;;  %v3269_v27 = vld [vmem:[%s5193_s6 + $0x30] sm:$0xff] }
 0x814   :  { %2360 = vmatpush.msrb.mxu0 %v3269_v27 }
 0x815   :  { %2160 = vmatmul.f32.gmra.mxu3 %v2108_v5  ;;  %v3279_v5 = vld [vmem:[%s5194_s7 + $0x30] sm:$0xff] }
 0x816   :  { %2400 = vmatpush.msra.mxu1 %v3279_v5 }
 0x83c   :  { %v2146_v48 = vpop.f32.mrf.mxu3 }
 0x83d   :  { %v2147_v56 = vadd.f32 %v3465_v24, %v2146_v48  ;;  %v3278_v48 = vld [vmem:[%s5194_s7 + $0x28] sm:$0xff] }
 0x83e   :  { %2401 = vmatpush.msra.mxu1 %v3278_v48 }
 0x83f   :  { %v2164_v59 = vadd.f32 %v2147_v56, %v4475_v3 }
 0x841   :  { %v2174_v37 = vsel %vm157_vm1, %v2164_v59, 0.0 }
 0x842   :  { %2175 = vadd.xlane.f32.xlu0 %v2174_v37  ;;  %v3277_v37 = vld [vmem:[%s5194_s7 + $0x20] sm:$0xff] }
 0x843   :  { %2402 = vmatpush.msra.mxu1 %v3277_v37 }
 0x877   :  { %v2149_v2 = vpop.f32.mrf.mxu3 }
 0x878   :  { %v2150_v40 = vadd.f32 %v3465_v24, %v2149_v2 }
 0x87a   :  { %v2165_v17 = vadd.f32 %v2150_v40, %v4480_v45 }
 0x87c   :  { %v2177_v12 = vsel %vm157_vm1, %v2165_v17, 0.0 }
 0x87d   :  { %2178 = vadd.xlane.f32.xlu2 %v2177_v12 }
 0x87f   :  { %v2152_v41 = vpop.f32.mrf.mxu3 }
 0x880   :  { %v2153_v43 = vadd.f32 %v3465_v24, %v2152_v41 }
 0x882   :  { %v2166_v33 = vadd.f32 %v2153_v43, %v4485_v60  ;;  %v145_v60 = vshrl.u32 %v140_v26, 7  ;;  %v3667_v26 = vmov 0.0  }
 0x884   :  { %v2180_v35 = vsel %vm157_vm1, %v2166_v33, 0.0  ;;  %v146_v31 = vmul.u32 24, %v145_v60 }
 0x885   :  { %2181 = vadd.xlane.f32.xlu1 %v2180_v35 }
 0x886   :  { %v4776_v19 = vsub.s32 %v4059_v30, %v146_v31 }
 0x888   :  { %v2155_v13 = vpop.f32.mrf.mxu3  ;;  %vm148_vm15 = vcmp.eq.s32.totalorder %v4776_v19, 16 }
 0x889   :  { %v2156_v53 = vadd.f32 %v3465_v24, %v2155_v13 }
 0x88b   :  { %v2167_v3 = vadd.f32 %v2156_v53, %v4490_v42 }
 0x88d   :  { %v2183_v29 = vsel %vm157_vm1, %v2167_v3, 0.0 }
 0x88e   :  { %2184 = vadd.xlane.f32.xlu0 %v2183_v29 }
 0x890   :  { %v2158_v23 = vpop.f32.mrf.mxu3 }
 0x891   :  { %v2159_v61 = vadd.f32 %v3465_v24, %v2158_v23 }
 0x893   :  { %v4768_v45 = vadd.f32 %v2159_v61, %v4495_v47  ;;  %v3162_v47 = vsel %vm148_vm15, 1.0, %v3667_v26  ;;  %v4850_v61 = vld [vmem:[%s5224_s21 + $0x1] ss:$0 sm:$0xff] }
 0x895   :  { %v2186_v55 = vsel %vm157_vm1, %v4768_v45, 0.0 }
 0x896   :  { %2187 = vadd.xlane.f32.xlu2 %v2186_v55  ;;  %v4855_v55 = vld [vmem:[%s5225_s24 + $0x1] ss:$0 sm:$0xff] }
 0x898   :  { %v2161_v8 = vpop.f32.mrf.mxu3 }
 0x899   :  { %v2162_v20 = vadd.f32 %v3465_v24, %v2161_v8  ;;  %v3268_v24 = vld [vmem:[%s5193_s6 + $0x28] sm:$0xff] }
 0x89a   :  { %2361 = vmatpush.msrb.mxu0 %v3268_v24 }
 0x89b   :  { %v2169_v7 = vadd.f32 %v2162_v20, %v4500_v4 }
 0x89d   :  { %2435 = vmatpush.msra.mxu2 %v2169_v7  ;;  %v2189_v42 = vsel %vm157_vm1, %v2169_v7, 0.0 }
 0x89e   :  { %2190 = vadd.xlane.f32.xlu1 %v2189_v42 }
 0x89f   :  { %2436 = vmatpush.msra.mxu2 %v4768_v45 }
 0x8a1   :  { %2437 = vmatpush.msra.mxu2 %v2167_v3 }
 0x8a3   :  { %2438 = vmatpush.msra.mxu2 %v2166_v33 }
 0x8a5   :  { %2439 = vmatpush.msra.mxu2 %v2165_v17 }
 0x8a7   :  { %2440 = vmatpush.msra.mxu2 %v2164_v59 }
 0x8a8   :  { %3287 = vmatmul.msk.f32.vlgmr.msra.gmra.mxu2 %vm77_vm0, %v3162_v47 }
 0x8b5   :  { %v2176_v4 = vpop.xlane.xlu0 %2175 }
 0x8b6   :  { %v2192_v54 = vmul.f32 %v2176_v4, %v3848_v39 }
 0x8b8   :  { %v4782_v58 = vsub.f32 %v2164_v59, %v2192_v54  ;;  %v3267_v59 = vld [vmem:[%s5193_s6 + $0x20] sm:$0xff] }
 0x8b9   :  { %2362 = vmatpush.msrb.mxu0 %v3267_v59 }
 0x8ba   :  { %v2204_v30 = vmul.f32 %v4782_v58, %v4782_v58 }
 0x8bc   :  { %v2210_v11 = vsel %vm157_vm1, %v2204_v30, 0.0 }
 0x8bd   :  { %2211 = vadd.xlane.f32.xlu0 %v2210_v11 }
 0x8f0   :  { %v2179_v22 = vpop.xlane.xlu2 %2178 }
 0x8f1   :  { %v2193_v49 = vmul.f32 %v2179_v22, %v3848_v39 }
 0x8f3   :  { %v4788_v10 = vsub.f32 %v2165_v17, %v2193_v49 }
 0x8f5   :  { %v2205_v36 = vmul.f32 %v4788_v10, %v4788_v10 }
 0x8f7   :  { %v2213_v46 = vsel %vm157_vm1, %v2205_v36, 0.0 }
 0x8f8   :  { %2214 = vadd.xlane.f32.xlu2 %v2213_v46  ;;  %v2182_v6 = vpop.xlane.xlu1 %2181 }
 0x8f9   :  { %v2194_v38 = vmul.f32 %v2182_v6, %v3848_v39 }
 0x8fb   :  { %v4794_v32 = vsub.f32 %v2166_v33, %v2194_v38 }
 0x8fd   :  { %v2206_v62 = vmul.f32 %v4794_v32, %v4794_v32 }
 0x8ff   :  { %v2216_v0 = vsel %vm157_vm1, %v2206_v62, 0.0 }
 0x900   :  { %2217 = vadd.xlane.f32.xlu0 %v2216_v0 }
 0x901   :  { %v2185_v18 = vpop.xlane.xlu0 %2184 }
 0x902   :  { %v2195_v63 = vmul.f32 %v2185_v18, %v3848_v39 }
 0x904   :  { %v4800_v9 = vsub.f32 %v2167_v3, %v2195_v63 }
 0x906   :  { %v2207_v57 = vmul.f32 %v4800_v9, %v4800_v9 }
 0x908   :  { %v2219_v16 = vsel %vm157_vm1, %v2207_v57, 0.0 }
 0x909   :  { %2220 = vadd.xlane.f32.xlu2 %v2219_v16  ;;  %v2188_v14 = vpop.xlane.xlu2 %2187 }
 0x90a   :  { %v2196_v28 = vmul.f32 %v2188_v14, %v3848_v39 }
 0x90c   :  { %v4839_v2 = vsub.f32 %v4768_v45, %v2196_v28 }
 0x90e   :  { %v2208_v41 = vmul.f32 %v4839_v2, %v4839_v2 }
 0x910   :  { %v2222_v33 = vsel %vm157_vm1, %v2208_v41, 0.0 }
 0x911   :  { %v2191_v50 = vpop.xlane.xlu1 %2190 }
 0x912   :  { %v2197_v44 = vmul.f32 %v2191_v50, %v3848_v39 }
 0x914   :  { %v4806_v25 = vsub.f32 %v2169_v7, %v2197_v44 }
 0x916   :  { %v2209_v21 = vmul.f32 %v4806_v25, %v4806_v25 }
 0x918   :  { %v2225_v52 = vsel %vm157_vm1, %v2209_v21, 0.0 }
 0x919   :  { %2226 = vadd.xlane.f32.xlu0 %v2225_v52 }
 0x92b   :  { %v4830_v56 = vpop.f32.mrf.mxu2 }
 0x92c   :  { %v2446_v40 = vsel %vm2445_vm2, %v4830_v56, 0.0 }
 0x92d   :  { %2447 = vadd.xlane.f32.xlu1 %v2446_v40 }
 0x930   :  { %v2212_v17 = vpop.xlane.xlu0 %2211 }
 0x931   :  { %v2228_v12 = vmul.f32 %v2212_v17, %v3848_v39 }
 0x933   :  { %v2234_v43 = vadd.f32 1e-05, %v2228_v12 }
 0x935   :  { %3620 = vrsqrt.f32 %v2234_v43  ;;  %2223 = vadd.xlane.f32.xlu1 %v2222_v33  ;;  %vm2246_vm4 = vweird.f32 %v2234_v43 }
 0x93b   :  { %v3621_v35 = vpop.eup %3620 }
 0x93c   :  { %v2241_v13 = vmul.f32 %v3621_v35, %v2234_v43  ;;  %vm2247_vm3 = vweird.f32 %v3621_v35 }
 0x93d   :  { %vm2248_vm5 = vmor %vm2246_vm4, %vm2247_vm3 }
 0x93e   :  { %v2242_v53 = vmul.f32 %v3621_v35, %v2241_v13 }
 0x940   :  { %v2243_v3 = vmul.f32 0.5, %v2242_v53 }
 0x942   :  { %v2244_v29 = vsub.f32 1.5, %v2243_v3 }
 0x944   :  { %v2245_v23 = vmul.f32 %v3621_v35, %v2244_v29 }
 0x946   :  { %v2249_v45 = vsel %vm2248_vm5, %v3621_v35, %v2245_v23 }
 0x947   :  { %v2300_v60 = vmul.f32 %v2249_v45, %v4782_v58 }
 0x949   :  { %v2309_v8 = vmul.f32 %v4850_v61, %v2300_v60 }
 0x94b   :  { %v2318_v20 = vadd.f32 %v4855_v55, %v2309_v8 }
 0x94d   :  { %3271 = vmatmul.msk.f32.vlgmr.msrb.gmra.mxu0 %vm157_vm1, %v2318_v20  ;;  %3281 = vmatmul.msk.f32.vlgmr.msra.gmra.mxu1 %vm157_vm1, %v2318_v20 }
 0x96b   :  { %v2215_v31 = vpop.xlane.xlu2 %2214 }
 0x96c   :  { %v2229_v7 = vmul.f32 %v2215_v31, %v3848_v39 }
 0x96e   :  { %v2235_v42 = vadd.f32 1e-05, %v2229_v7 }
 0x970   :  { %3622 = vrsqrt.f32 %v2235_v42  ;;  %vm2256_vm8 = vweird.f32 %v2235_v42 }
 0x973   :  { %v2218_v26 = vpop.xlane.xlu0 %2217 }
 0x974   :  { %v2230_v47 = vmul.f32 %v2218_v26, %v3848_v39 }
 0x976   :  { %v3623_v4 = vpop.eup %3622  ;;  %v2236_v54 = vadd.f32 1e-05, %v2230_v47 }
 0x977   :  { %v2251_v30 = vmul.f32 %v3623_v4, %v2235_v42  ;;  %vm2257_vm6 = vweird.f32 %v3623_v4 }
 0x978   :  { %3624 = vrsqrt.f32 %v2236_v54  ;;  %vm2258_vm11 = vmor %vm2256_vm8, %vm2257_vm6  ;;  %vm2266_vm13 = vweird.f32 %v2236_v54 }
 0x979   :  { %v2252_v58 = vmul.f32 %v3623_v4, %v2251_v30 }
 0x97b   :  { %v2253_v11 = vmul.f32 0.5, %v2252_v58 }
 0x97c   :  { %v2221_v22 = vpop.xlane.xlu2 %2220 }
 0x97d   :  { %v2231_v49 = vmul.f32 %v2221_v22, %v3848_v39  ;;  %v2254_v36 = vsub.f32 1.5, %v2253_v11 }
 0x97e   :  { %v3625_v46 = vpop.eup %3624 }
 0x97f   :  { %v2237_v6 = vadd.f32 1e-05, %v2231_v49  ;;  %v2255_v38 = vmul.f32 %v3623_v4, %v2254_v36  ;;  %v2261_v62 = vmul.f32 %v3625_v46, %v2236_v54  ;;  %vm2267_vm12 = vweird.f32 %v3625_v46 }
 0x980   :  { %vm2268_vm14 = vmor %vm2266_vm13, %vm2267_vm12 }
 0x981   :  { %3626 = vrsqrt.f32 %v2237_v6  ;;  %v2259_v0 = vsel %vm2258_vm11, %v3623_v4, %v2255_v38  ;;  %v2262_v18 = vmul.f32 %v3625_v46, %v2261_v62  ;;  %vm2276_vm3 = vweird.f32 %v2237_v6 }
 0x982   :  { %v2301_v63 = vmul.f32 %v2259_v0, %v4788_v10 }
 0x983   :  { %v2263_v57 = vmul.f32 0.5, %v2262_v18 }
 0x984   :  { %v2310_v16 = vmul.f32 %v4850_v61, %v2301_v63  ;;  %v3291_v63 = vld [vmem:[%s5192_s5 + $0x38] sm:$0xff] }
 0x985   :  { %v2264_v50 = vsub.f32 1.5, %v2263_v57  ;;  %2490 = vmatpush.msrb.mxu2 %v3291_v63  ;;  %v3290_v57 = vld [vmem:[%s5192_s5 + $0x30] sm:$0xff] }
 0x986   :  { %v2319_v21 = vadd.f32 %v4855_v55, %v2310_v16 }
 0x987   :  { %v3627_v44 = vpop.eup %3626  ;;  %v2265_v52 = vmul.f32 %v3625_v46, %v2264_v50  ;;  %2491 = vmatpush.msrb.mxu2 %v3290_v57 }
 0x988   :  { %v2271_v14 = vmul.f32 %v3627_v44, %v2237_v6  ;;  %3272 = vmatmul.msk.f32.gmra.mxu0 %vm157_vm1, %v2319_v21  ;;  %3282 = vmatmul.msk.f32.gmra.mxu1 %vm157_vm1, %v2319_v21  ;;  %vm2277_vm15 = vweird.f32 %v3627_v44 }
 0x989   :  { %v2269_v51 = vsel %vm2268_vm14, %v3625_v46, %v2265_v52  ;;  %vm2278_vm4 = vmor %vm2276_vm3, %vm2277_vm15  ;;  %v3288_v52 = vld [vmem:[%s5192_s5 + $0x20] sm:$0xff] }
 0x98a   :  { %v2272_v15 = vmul.f32 %v3627_v44, %v2271_v14  ;;  %v2302_v10 = vmul.f32 %v2269_v51, %v4794_v32 }
 0x98c   :  { %v2273_v28 = vmul.f32 0.5, %v2272_v15  ;;  %v2311_v27 = vmul.f32 %v4850_v61, %v2302_v10  ;;  %v2227_v17 = vpop.xlane.xlu0 %2226 }
 0x98d   :  { %v2233_v12 = vmul.f32 %v2227_v17, %v3848_v39 }
 0x98e   :  { %v2274_v5 = vsub.f32 1.5, %v2273_v28  ;;  %v2320_v24 = vadd.f32 %v4855_v55, %v2311_v27 }
 0x98f   :  { %v2239_v41 = vadd.f32 1e-05, %v2233_v12 }
 0x990   :  { %v2275_v48 = vmul.f32 %v3627_v44, %v2274_v5  ;;  %3273 = vmatmul.msk.f32.gmra.mxu0 %vm157_vm1, %v2320_v24  ;;  %3283 = vmatmul.msk.f32.gmra.mxu1 %vm157_vm1, %v2320_v24 }
 0x991   :  { %3628 = vrsqrt.f32 %v2239_v41  ;;  %vm2296_vm12 = vweird.f32 %v2239_v41 }
 0x992   :  { %v2279_v59 = vsel %vm2278_vm4, %v3627_v44, %v2275_v48  ;;  %v3289_v44 = vld [vmem:[%s5192_s5 + $0x28] sm:$0xff]  ;;  %vm151_vm4 = vcmp.ge.s32.totalorder %v4776_v19, 0  ;;  %s5226_s5 = smov 8  }
 0x993   :  { %v2303_v37 = vmul.f32 %v2279_v59, %v4800_v9  ;;  %2492 = vmatpush.msrb.mxu2 %v3289_v44 }
 0x995   :  { %v2312_v40 = vmul.f32 %v4850_v61, %v2303_v37  ;;  %2493 = vmatpush.msrb.mxu2 %v3288_v52 }
 0x997   :  { %v2321_v32 = vadd.f32 %v4855_v55, %v2312_v40  ;;  %v3629_v3 = vpop.eup %3628 }
 0x998   :  { %v2291_v45 = vmul.f32 %v3629_v3, %v2239_v41  ;;  %vm2297_vm6 = vweird.f32 %v3629_v3 }
 0x999   :  { %3274 = vmatmul.msk.f32.gmra.mxu0 %vm157_vm1, %v2321_v32  ;;  %3284 = vmatmul.msk.f32.gmra.mxu1 %vm157_vm1, %v2321_v32  ;;  %vm2298_vm13 = vmor %vm2296_vm12, %vm2297_vm6 }
 0x99a   :  { %v2292_v60 = vmul.f32 %v3629_v3, %v2291_v45 }
 0x99c   :  { %v2293_v20 = vmul.f32 0.5, %v2292_v60 }
 0x99e   :  { %v2294_v42 = vsub.f32 1.5, %v2293_v20 }
 0x9a0   :  { %v2448_v43 = vpop.xlane.xlu1 %2447  ;;  %v2295_v4 = vmul.f32 %v3629_v3, %v2294_v42 }
 0x9a1   :  { %v2449_v33 = vmul.f32 %v2448_v43, %v3848_v39 }
 0x9a2   :  { %v2299_v11 = vsel %vm2298_vm13, %v3629_v3, %v2295_v4 }
 0x9a3   :  { %v4883_v35 = vsub.f32 %v4830_v56, %v2449_v33  ;;  %v2305_v36 = vmul.f32 %v2299_v11, %v4806_v25 }
 0x9a5   :  { %v2451_v9 = vmul.f32 %v4883_v35, %v4883_v35  ;;  %v2314_v46 = vmul.f32 %v4850_v61, %v2305_v36 }
 0x9a7   :  { %v2452_v13 = vsel %vm2445_vm2, %v2451_v9, 0.0  ;;  %v2323_v6 = vadd.f32 %v4855_v55, %v2314_v46 }
 0x9a8   :  { %2453 = vadd.xlane.f32.xlu2 %v2452_v13  ;;  %v2224_v53 = vpop.xlane.xlu1 %2223 }
 0x9a9   :  { %v2232_v29 = vmul.f32 %v2224_v53, %v3848_v39 }
 0x9ab   :  { %v2238_v23 = vadd.f32 1e-05, %v2232_v29 }
 0x9ad   :  { %3630 = vrsqrt.f32 %v2238_v23  ;;  %vm2286_vm8 = vweird.f32 %v2238_v23 }
 0x9b3   :  { %v3631_v8 = vpop.eup %3630 }
 0x9b4   :  { %v2281_v31 = vmul.f32 %v3631_v8, %v2238_v23  ;;  %vm2287_vm5 = vweird.f32 %v3631_v8 }
 0x9b5   :  { %vm2288_vm11 = vmor %vm2286_vm8, %vm2287_vm5  ;;  %vm152_vm5 = vcmp.lt.s32.totalorder %v4776_v19, 17  ;;  %vm2541_vm8 = vcmask 386048  }
 0x9b6   :  { %v2282_v7 = vmul.f32 %v3631_v8, %v2281_v31  ;;  %vm153_vm6 = vmand %vm151_vm4, %vm152_vm5 }
 0x9b7   :  { %v4986_v60 = vsel %vm153_vm6, 0.0, %v3662_v34 }
 0x9b8   :  { %v2283_v26 = vmul.f32 0.5, %v2282_v7 }
 0x9ba   :  { %v2284_v47 = vsub.f32 1.5, %v2283_v26 }
 0x9bc   :  { %v2285_v54 = vmul.f32 %v3631_v8, %v2284_v47 }
 0x9be   :  { %v2289_v30 = vsel %vm2288_vm11, %v3631_v8, %v2285_v54 }
 0x9bf   :  { %v2304_v58 = vmul.f32 %v2289_v30, %v4839_v2 }
 0x9c1   :  { %v2313_v22 = vmul.f32 %v4850_v61, %v2304_v58 }
 0x9c3   :  { %v2322_v49 = vadd.f32 %v4855_v55, %v2313_v22 }
 0x9c5   :  { %3275 = vmatmul.msk.f32.gmra.mxu0 %vm157_vm1, %v2322_v49  ;;  %3285 = vmatmul.msk.f32.gmra.mxu1 %vm157_vm1, %v2322_v49 }
 0x9ca   :  { %v4899_v2 = vpop.f32.mrf.mxu0  ;;  %v4901_v38 = vpop.f32.mrf.mxu1 }
 0x9cd   :  { %3276 = vmatmul.msk.f32.gmra.mxu0 %vm157_vm1, %v2323_v6  ;;  %3286 = vmatmul.msk.f32.gmra.mxu1 %vm157_vm1, %v2323_v6 }
 0xa05   :  { %v4903_v62 = vpop.f32.mrf.mxu0  ;;  %v4905_v0 = vpop.f32.mrf.mxu1 }
 0xa06   :  { %v4979_v23 = vpack.i.bf16 %v4901_v38, %v4905_v0 }
 0xa0d   :  { %v4907_v25 = vpop.f32.mrf.mxu0  ;;  %v2410_v18 = vpop.f32.mrf.mxu1 }
 0xa0e   :  { %2582 = vrot.lane.b32.xlu2 %v4907_v25, %s3659_s2 }
 0xa16   :  { %v4917_v16 = vpop.f32.mrf.mxu0  ;;  %v2413_v50 = vpop.f32.mrf.mxu1 }
 0xa17   :  { %v4922_v21 = vpack.i.bf16 %v2410_v18, %v2413_v50  ;;  %2692 = vrot.lane.b32.xlu1 %v4917_v16, %s3660_s25  ;;  %2584 = vrot.lane.b32.xlu2 %v4917_v16, %s3659_s2 }
 0xa1b   :  { %v2454_v14 = vpop.xlane.xlu2 %2453 }
 0xa1c   :  { %v2455_v51 = vmul.f32 %v2454_v14, %v3848_v39 }
 0xa1e   :  { %v2456_v15 = vadd.f32 1e-05, %v2455_v51 }
 0xa20   :  { %3632 = vrsqrt.f32 %v2456_v15  ;;  %vm2463_vm15 = vweird.f32 %v2456_v15 }
 0xa26   :  { %v3633_v10 = vpop.eup %3632 }
 0xa27   :  { %v2458_v28 = vmul.f32 %v3633_v10, %v2456_v15  ;;  %vm2464_vm14 = vweird.f32 %v3633_v10 }
 0xa28   :  { %vm2465_vm3 = vmor %vm2463_vm15, %vm2464_vm14 }
 0xa29   :  { %v2459_v27 = vmul.f32 %v3633_v10, %v2458_v28 }
 0xa2b   :  { %v2460_v5 = vmul.f32 0.5, %v2459_v27 }
 0xa2d   :  { %v2461_v24 = vsub.f32 1.5, %v2460_v5 }
 0xa2f   :  { %v2462_v48 = vmul.f32 %v3633_v10, %v2461_v24 }
 0xa31   :  { %v2466_v59 = vsel %vm2465_vm3, %v3633_v10, %v2462_v48 }
 0xa32   :  { %v2467_v37 = vmul.f32 %v2466_v59, %v4883_v35 }
 0xa34   :  { %v2468_v40 = vmul.f32 %v4850_v61, %v2467_v37 }
 0xa36   :  { %v2469_v32 = vadd.f32 %v4855_v55, %v2468_v40 }
 0xa38   :  { %3292 = vmatmul.msk.f32.vlgmr.msrb.gmra.mxu2 %vm157_vm1, %v2469_v32 }
 0xa42   :  { %v2376_v17 = vpop.f32.mrf.mxu0  ;;  %v4936_v12 = vpop.f32.mrf.mxu1 }
 0xa43   :  { %2694 = vrot.lane.b32.xlu0 %v2376_v17, %s3660_s25  ;;  %2586 = vrot.lane.b32.xlu1 %v2376_v17, %s3659_s2 }
 0xa4a   :  { %v2379_v41 = vpop.f32.mrf.mxu0  ;;  %v4940_v43 = vpop.f32.mrf.mxu1 }
 0xa4b   :  { %2566 = vmatpush.msra.mxu2 %v4940_v43  ;;  %2696 = vrot.lane.b32.xlu2 %v2379_v41, %s3660_s25 }
 0xa4c   :  { %2588 = vrot.lane.b32.xlu0 %v2379_v41, %s3659_s2  ;;  %3293 = vmatpush.xpose.msk.msra.mxu3 %vm450_vm7, %v2379_v41 }
 0xa4d   :  { %2567 = vmatpush.msra.mxu2 %v4936_v12 }
 0xa4f   :  { %2568 = vmatpush.msra.mxu2 %v2413_v50  ;;  %v3412_v50 = vpack.i.bf16 %v4936_v12, %v4940_v43 }
 0xa50   :  { %3294 = vmatpush.xpose.msk.msra.mxu3 %vm450_vm7, %v2376_v17 }
 0xa51   :  { %2569 = vmatpush.msra.mxu2 %v2410_v18 }
 0xa53   :  { %2570 = vmatpush.msra.mxu2 %v4905_v0  ;;  %2798 = vrot.lane.b32.xlu2 %v2379_v41, %s3661_s23 }
 0xa54   :  { %3295 = vmatpush.xpose.msk.msra.mxu3 %vm450_vm7, %v4917_v16 }
 0xa55   :  { %2571 = vmatpush.msra.mxu2 %v4901_v38 }
 0xa58   :  { %3296 = vmatpush.xpose.msk.msra.mxu3 %vm450_vm7, %v4907_v25 }
 0xa5b   :  { %2688 = vrot.lane.b32.xlu2 %v4903_v62, %s3660_s25 }
 0xa5c   :  { %3297 = vmatpush.xpose.msk.msra.mxu3 %vm450_vm7, %v4903_v62 }
 0xa60   :  { %3298 = vmatpush.xpose.msk.msra.mxu3 %vm450_vm7, %v4899_v2 }
 0xa63   :  { %2578 = vrot.lane.b32.xlu2 %v4899_v2, %s3659_s2 }
 0xa68   :  { %v2583_v61 = vpop.permute.xlu2 %2582 }
 0xa71   :  { %v2585_v55 = vpop.permute.xlu2 %2584 }
 0xa89   :  { %v2693_v13 = vpop.permute.xlu1 %2692 }
 0xaa5   :  { %v2697_v33 = vpop.permute.xlu2 %2696 }
 0xaa6   :  { %3309 = vmatpush.xpose.msk.msrb.mxu2 %vm450_vm7, %v2697_v33 }
 0xaad   :  { %v2799_v35 = vpop.permute.xlu2 %2798 }
 0xaae   :  { %3317 = vmatpush.xpose.msk.msrb.mxu1 %vm450_vm7, %v2799_v35 }
 0xab5   :  { %v2695_v9 = vpop.permute.xlu0 %2694  ;;  %v2587_v29 = vpop.permute.xlu1 %2586 }
 0xab6   :  { %3310 = vmatpush.xpose.msk.msrb.mxu2 %vm450_vm7, %v2695_v9  ;;  %v2689_v47 = vpop.permute.xlu2 %2688 }
 0xaba   :  { %3311 = vmatpush.xpose.msk.msrb.mxu2 %vm450_vm7, %v2693_v13 }
 0xabb   :  { %v2495_v53 = vpop.f32.mrf.mxu2 }
 0xabc   :  { %2576 = vrot.lane.b32.xlu2 %v2495_v53, %s3659_s2  ;;  %3299 = vmatmul.msk.f32.vlgmr.msra.gmra.mxu3 %vm450_vm7, %v2495_v53 }
 0xabe   :  { %v2589_v3 = vpop.permute.xlu0 %2588  ;;  %v2579_v54 = vpop.permute.xlu2 %2578 }
 0xabf   :  { %3301 = vmatpush.xpose.msk.msra.mxu0 %vm450_vm7, %v2589_v3 }
 0xac3   :  { %3302 = vmatpush.xpose.msk.msra.mxu0 %vm450_vm7, %v2587_v29 }
 0xac4   :  { %2792 = vrot.lane.b32.xlu2 %v4907_v25, %s3661_s23 }
 0xac7   :  { %3303 = vmatpush.xpose.msk.msra.mxu0 %vm450_vm7, %v2585_v55 }
 0xacb   :  { %3304 = vmatpush.xpose.msk.msra.mxu0 %vm450_vm7, %v2583_v61 }
 0xacc   :  { %2788 = vrot.lane.b32.xlu2 %v4899_v2, %s3661_s23 }
 0xad4   :  { %3423 = vrot.lane.b32.xlu2 %v4979_v23, %s3659_s2 }
 0xb16   :  { %v2577_v58 = vpop.permute.xlu2 %2576 }
 0xb1e   :  { %v2793_v38 = vpop.permute.xlu2 %2792 }
 0xb26   :  { %v2789_v0 = vpop.permute.xlu2 %2788 }
 0xb2e   :  { %v3424_v41 = vpop.permute.xlu2 %3423 }
 0xb3f   :  { %v2536_v45 = vpop.f32.mrf.mxu3 }
 0xb40   :  { %v2539_v8 = vmul.f32 0.35355338, %v2536_v45 }
 0xb42   :  { %v2540_v20 = vadd.f32 %v2539_v8, %v4986_v60 }
 0xb44   :  { %v2542_v31 = vsel %vm2541_vm8, %v2540_v20, -inf }
 0xb45   :  { %2543 = vmax.xlane.f32.xlu1 %v2542_v31 }
 0xb5e   :  { %2690 = vrot.lane.b32.xlu1 %v4907_v25, %s3660_s25 }
 0xb66   :  { %2580 = vrot.lane.b32.xlu1 %v4903_v62, %s3659_s2 }
 0xb6e   :  { %2796 = vrot.lane.b32.xlu1 %v2376_v17, %s3661_s23 }
 0xb76   :  { %2686 = vrot.lane.b32.xlu1 %v4899_v2, %s3660_s25 }
 0xb7e   :  { %2684 = vrot.lane.b32.xlu1 %v2495_v53, %s3660_s25 }
 0xb86   :  { %2790 = vrot.lane.b32.xlu1 %v4903_v62, %s3661_s23 }
 0xb8e   :  { %2786 = vrot.lane.b32.xlu1 %v2495_v53, %s3661_s23 }
 0xbb8   :  { %v2544_v34 = vpop.xlane.xlu1 %2543 }
 0xbb9   :  { %v2545_v19 = vsub.f32 %v2540_v20, %v2544_v34 }
 0xbbb   :  { %v2546_v7 = vmul.f32 1.442695, %v2545_v19  ;;  %v3425_v19 = vunpack.i.l.bf16 %v3424_v41 }
 0xbbd   :  { %3634 = vpow2.f32 %v2546_v7 }
 0xbc3   :  { %v3635_v42 = vpop.eup %3634 }
 0xbc4   :  { %v2548_v26 = vsel %vm2541_vm8, %v3635_v42, 0.0 }
 0xbc5   :  { %2549 = vadd.xlane.f32.xlu0 %v2548_v26 }
 0xbd0   :  { %v2691_v4 = vpop.permute.xlu1 %2690 }
 0xbd1   :  { %3312 = vmatpush.xpose.msk.msrb.mxu2 %vm450_vm7, %v2691_v4 }
 0xbd5   :  { %3313 = vmatpush.xpose.msk.msrb.mxu2 %vm450_vm7, %v2689_v47 }
 0xbd8   :  { %v2581_v30 = vpop.permute.xlu1 %2580 }
 0xbd9   :  { %2794 = vrot.lane.b32.xlu0 %v4917_v16, %s3661_s23  ;;  %3305 = vmatpush.xpose.msk.msra.mxu0 %vm450_vm7, %v2581_v30 }
 0xbdd   :  { %3306 = vmatpush.xpose.msk.msra.mxu0 %vm450_vm7, %v2579_v54 }
 0xbe0   :  { %3307 = vmatmul.msk.f32.vlgmr.msra.gmra.mxu0 %vm450_vm7, %v2577_v58  ;;  %v2797_v11 = vpop.permute.xlu1 %2796 }
 0xbe1   :  { %3318 = vmatpush.xpose.msk.msrb.mxu1 %vm450_vm7, %v2797_v11 }
 0xbe8   :  { %v2687_v22 = vpop.permute.xlu1 %2686 }
 0xbe9   :  { %3314 = vmatpush.xpose.msk.msrb.mxu2 %vm450_vm7, %v2687_v22 }
 0xbf0   :  { %v2685_v6 = vpop.permute.xlu1 %2684 }
 0xbf8   :  { %v2791_v62 = vpop.permute.xlu1 %2790 }
 0xc00   :  { %v2787_v25 = vpop.permute.xlu1 %2786 }
 0xc38   :  { %v2550_v49 = vpop.xlane.xlu0 %2549 }
 0xc39   :  { %3636 = vrcp.f32 %v2550_v49 }
 0xc3f   :  { %v3637_v36 = vpop.eup %3636 }
 0xc40   :  { %v2552_v46 = vmul.f32 %v3637_v36, %v3635_v42  ;;  %v3426_v42 = vunpack.i.h.bf16 %v3424_v41 }
 0xc42   :  { %3300 = vmatmul.msk.f32.vlgmr.msra.gmra.mxu2 %vm77_vm0, %v2552_v46 }
 0xc4a   :  { %3315 = vmatmul.msk.f32.vlgmr.msrb.gmra.mxu2 %vm450_vm7, %v2685_v6 }
 0xc4b   :  { %v2795_v2 = vpop.permute.xlu0 %2794 }
 0xc4c   :  { %3319 = vmatpush.xpose.msk.msrb.mxu1 %vm450_vm7, %v2795_v2 }
 0xc50   :  { %3320 = vmatpush.xpose.msk.msrb.mxu1 %vm450_vm7, %v2793_v38 }
 0xc54   :  { %3321 = vmatpush.xpose.msk.msrb.mxu1 %vm450_vm7, %v2791_v62 }
 0xc58   :  { %3322 = vmatpush.xpose.msk.msrb.mxu1 %vm450_vm7, %v2789_v0 }
 0xc5b   :  { %3323 = vmatmul.msk.f32.vlgmr.msrb.gmra.mxu1 %vm450_vm7, %v2787_v25 }
 0xc5d   :  { %v2621_v18 = vpop.f32.mrf.mxu0 }
 0xc5e   :  { %v2624_v63 = vmul.f32 0.35355338, %v2621_v18 }
 0xc60   :  { %v2625_v57 = vadd.f32 %v2624_v63, %v4986_v60 }
 0xc62   :  { %v2626_v16 = vsel %vm2541_vm8, %v2625_v57, -inf }
 0xc63   :  { %2627 = vmax.xlane.f32.xlu0 %v2626_v16 }
 0xc77   :  { %3413 = vrot.lane.b32.xlu0 %v3412_v50, %s3659_s2 }
 0xc7f   :  { %3428 = vrot.lane.b32.xlu0 %v3412_v50, %s3660_s25 }
 0xcc5   :  { %v5024_v44 = vpop.f32.mrf.mxu2 }
 0xccd   :  { %v2729_v5 = vpop.f32.mrf.mxu2 }
 0xcce   :  { %v2732_v48 = vmul.f32 0.35355338, %v2729_v5 }
 0xcd0   :  { %v2733_v37 = vadd.f32 %v2732_v48, %v4986_v60 }
 0xcd2   :  { %v2734_v17 = vsel %vm2541_vm8, %v2733_v37, -inf }
 0xcd6   :  { %v2628_v52 = vpop.xlane.xlu0 %2627 }
 0xcd7   :  { %v2629_v14 = vsub.f32 %v2625_v57, %v2628_v52 }
 0xcd8   :  { %v2831_v51 = vpop.f32.mrf.mxu1 }
 0xcd9   :  { %v2630_v15 = vmul.f32 1.442695, %v2629_v14  ;;  %v2834_v10 = vmul.f32 0.35355338, %v2831_v51  ;;  %v3328_v51 = vld [vmem:[%s5195_s8 + $0x38] sm:$0xff] }
 0xcdb   :  { %3638 = vpow2.f32 %v2630_v15  ;;  %v2835_v28 = vadd.f32 %v2834_v10, %v4986_v60  ;;  %v3327_v15 = vld [vmem:[%s5195_s8 + $0x30] sm:$0xff]  ;;  %v3326_v10 = vld [vmem:[%s5195_s8 + $0x28] sm:$0xff] }
 0xcdd   :  { %v2836_v27 = vsel %vm2541_vm8, %v2835_v28, -inf }
 0xcde   :  { %2837 = vmax.xlane.f32.xlu1 %v2836_v27 }
 0xce1   :  { %v3639_v24 = vpop.eup %3638 }
 0xce2   :  { %v2632_v59 = vsel %vm2541_vm8, %v3639_v24, 0.0 }
 0xce3   :  { %2633 = vadd.xlane.f32.xlu2 %v2632_v59 }
 0xce9   :  { %v3414_v40 = vpop.permute.xlu0 %3413 }
 0xcea   :  { %v3415_v32 = vunpack.i.l.bf16 %v3414_v40  ;;  %v3416_v12 = vunpack.i.h.bf16 %v3414_v40  ;;  %v3466_v40 = vld [vmem:[%s5196_s9 + $0x1] ss:$0 sm:$0xff] }
 0xceb   :  { %2735 = vmax.xlane.f32.xlu2 %v2734_v17 }
 0xcec   :  { %2674 = vmatpush.msrb.mxu3 %v3415_v32 }
 0xcee   :  { %2675 = vmatpush.msrb.mxu3 %v3416_v12 }
 0xcf1   :  { %v3429_v7 = vpop.permute.xlu0 %3428 }
 0xcf2   :  { %v3430_v4 = vunpack.i.l.bf16 %v3429_v7  ;;  %v3431_v54 = vunpack.i.h.bf16 %v3429_v7 }
 0xcf7   :  { %3418 = vrot.lane.b32.xlu1 %v4922_v21, %s3659_s2  ;;  %s5227_s2 = smov 24  }
 0xcff   :  { %3433 = vrot.lane.b32.xlu1 %v4922_v21, %s3660_s25 }
 0xd03   :  { %3438 = vrot.lane.b32.xlu2 %v3412_v50, %s3661_s23 }
 0xd07   :  { %3443 = vrot.lane.b32.xlu1 %v4979_v23, %s3660_s25  ;;  %s5228_s25 = smov 16  }
 0xd0f   :  { %3448 = vrot.lane.b32.xlu1 %v4922_v21, %s3661_s23 }
 0xd17   :  { %3453 = vrot.lane.b32.xlu1 %v4979_v23, %s3661_s23 }
 0xd51   :  { %v2838_v43 = vpop.xlane.xlu1 %2837 }
 0xd52   :  { %v2839_v61 = vsub.f32 %v2835_v28, %v2838_v43  ;;  %v3325_v28 = vld [vmem:[%s5195_s8 + $0x20] sm:$0xff] }
 0xd54   :  { %v2840_v55 = vmul.f32 1.442695, %v2839_v61 }
 0xd56   :  { %3640 = vpow2.f32 %v2840_v55  ;;  %v2634_v33 = vpop.xlane.xlu2 %2633 }
 0xd5c   :  { %v3641_v35 = vpop.eup %3640 }
 0xd5d   :  { %v2842_v9 = vsel %vm2541_vm8, %v3641_v35, 0.0 }
 0xd5e   :  { %v2736_v13 = vpop.xlane.xlu2 %2735  ;;  %2843 = vadd.xlane.f32.xlu2 %v2842_v9  ;;  %v3334_v9 = vld [vmem:[%s5199_s12 + $0x28] sm:$0xff] }
 0xd5f   :  { %v2737_v53 = vsub.f32 %v2733_v37, %v2736_v13  ;;  %v3333_v13 = vld [vmem:[%s5199_s12 + $0x20] sm:$0xff] }
 0xd61   :  { %v2738_v3 = vmul.f32 1.442695, %v2737_v53 }
 0xd63   :  { %3642 = vpow2.f32 %v2738_v3 }
 0xd64   :  { %3644 = vrcp.f32 %v2634_v33 }
 0xd66   :  { %v3439_v29 = vpop.permute.xlu2 %3438 }
 0xd67   :  { %v3440_v45 = vunpack.i.l.bf16 %v3439_v29  ;;  %v3441_v60 = vunpack.i.h.bf16 %v3439_v29 }
 0xd69   :  { %v3643_v21 = vpop.eup %3642  ;;  %2878 = vmatpush.msrb.mxu0 %v3440_v45  ;;  %v3419_v23 = vpop.permute.xlu1 %3418 }
 0xd6a   :  { %v3420_v8 = vunpack.i.l.bf16 %v3419_v23  ;;  %v2740_v20 = vsel %vm2541_vm8, %v3643_v21, 0.0  ;;  %v3421_v31 = vunpack.i.h.bf16 %v3419_v23  ;;  %v3645_v34 = vpop.eup %3644 }
 0xd6b   :  { %2741 = vadd.xlane.f32.xlu0 %v2740_v20  ;;  %2879 = vmatpush.msrb.mxu0 %v3441_v60  ;;  %v2636_v26 = vmul.f32 %v3645_v34, %v3639_v24 }
 0xd6c   :  { %2676 = vmatpush.msrb.mxu3 %v3420_v8 }
 0xd6e   :  { %2677 = vmatpush.msrb.mxu3 %v3421_v31  ;;  %v3467_v31 = vld [vmem:[%s5197_s10 + $0x1] ss:$0 sm:$0xff] }
 0xd70   :  { %2678 = vmatpush.msrb.mxu3 %v3425_v19  ;;  %v3468_v19 = vld [vmem:[%s5198_s11 + $0x1] ss:$0 sm:$0xff] }
 0xd71   :  { %v3434_v47 = vpop.permute.xlu1 %3433 }
 0xd72   :  { %2679 = vmatpush.msrb.mxu3 %v3426_v42  ;;  %v3435_v30 = vunpack.i.l.bf16 %v3434_v47  ;;  %v3436_v58 = vunpack.i.h.bf16 %v3434_v47  ;;  %v3354_v47 = vld [vmem:[%s5201_s14 + $0xf8] sm:$0xff] }
 0xd73   :  { %3308 = vmatmul.msk.f32.vlgmr.msrb.gmra.mxu3 %vm77_vm0, %v2636_v26 }
 0xd74   :  { %2776 = vmatpush.msra.mxu3 %v3430_v4  ;;  %v3469_v4 = vld [vmem:[%s5200_s13 + $0x1] ss:$0 sm:$0xff] }
 0xd76   :  { %2777 = vmatpush.msra.mxu3 %v3431_v54  ;;  %v3353_v54 = vld [vmem:[%s5201_s14 + $0xf0] sm:$0xff] }
 0xd78   :  { %2778 = vmatpush.msra.mxu3 %v3435_v30  ;;  %v3352_v30 = vld [vmem:[%s5201_s14 + $0xe8] sm:$0xff] }
 0xd79   :  { %v3444_v11 = vpop.permute.xlu1 %3443 }
 0xd7a   :  { %v3445_v22 = vunpack.i.l.bf16 %v3444_v11  ;;  %2779 = vmatpush.msra.mxu3 %v3436_v58  ;;  %v3446_v49 = vunpack.i.h.bf16 %v3444_v11 }
 0xd7c   :  { %2780 = vmatpush.msra.mxu3 %v3445_v22  ;;  %v3351_v22 = vld [vmem:[%s5201_s14 + $0xe0] sm:$0xff] }
 0xd7e   :  { %2781 = vmatpush.msra.mxu3 %v3446_v49 }
 0xd80   :  { %2923 = vmatpush.msrb.mxu3 %v3328_v51 }
 0xd81   :  { %v3449_v36 = vpop.permute.xlu1 %3448 }
 0xd82   :  { %v3450_v46 = vunpack.i.l.bf16 %v3449_v36  ;;  %v3451_v6 = vunpack.i.h.bf16 %v3449_v36  ;;  %2924 = vmatpush.msrb.mxu3 %v3327_v15  ;;  %v3350_v36 = vld [vmem:[%s5201_s14 + $0xd8] sm:$0xff]  ;;  %v3341_v15 = vld [vmem:[%s5201_s14 + $0x90] sm:$0xff] }
 0xd84   :  { %2880 = vmatpush.msrb.mxu0 %v3450_v46  ;;  %2925 = vmatpush.msrb.mxu3 %v3326_v10 }
 0xd86   :  { %2881 = vmatpush.msrb.mxu0 %v3451_v6  ;;  %2926 = vmatpush.msrb.mxu3 %v3325_v28  ;;  %v3349_v6 = vld [vmem:[%s5201_s14 + $0xd0] sm:$0xff] }
 0xd89   :  { %v3454_v2 = vpop.permute.xlu1 %3453 }
 0xd8a   :  { %v3455_v38 = vunpack.i.l.bf16 %v3454_v2  ;;  %v3456_v62 = vunpack.i.h.bf16 %v3454_v2 }
 0xd8c   :  { %2882 = vmatpush.msrb.mxu0 %v3455_v38  ;;  %v3348_v38 = vld [vmem:[%s5201_s14 + $0xc8] sm:$0xff] }
 0xd8e   :  { %2883 = vmatpush.msrb.mxu0 %v3456_v62 }
 0xd90   :  { %3067 = vmatpush.msra.mxu0 %v3354_v47 }
 0xd92   :  { %3068 = vmatpush.msra.mxu0 %v3353_v54  ;;  %v3121_v54 = vld [vmem:[%s5206_s18 + $0x8] sm:$0xff] }
 0xd94   :  { %3069 = vmatpush.msra.mxu0 %v3352_v30  ;;  %v3120_v30 = vld [vmem:[%s5206_s18] sm:$0xff] }
 0xd96   :  { %3070 = vmatpush.msra.mxu0 %v3351_v22 }
 0xd98   :  { %3071 = vmatpush.msra.mxu0 %v3350_v36 }
 0xd9a   :  { %3072 = vmatpush.msra.mxu0 %v3349_v6 }
 0xd9c   :  { %3073 = vmatpush.msra.mxu0 %v3348_v38 }
 0xdd1   :  { %v2844_v0 = vpop.xlane.xlu2 %2843 }
 0xdd2   :  { %3646 = vrcp.f32 %v2844_v0  ;;  %v3347_v0 = vld [vmem:[%s5201_s14 + $0xc0] sm:$0xff] }
 0xdd3   :  { %3074 = vmatpush.msra.mxu0 %v3347_v0 }
 0xdd8   :  { %v3647_v25 = vpop.eup %3646 }
 0xdd9   :  { %v2846_v18 = vmul.f32 %v3647_v25, %v3641_v35  ;;  %v3336_v35 = vld [vmem:[%s5199_s12 + $0x38] sm:$0xff] }
 0xdda   :  { %2997 = vmatpush.msra.mxu2 %v3336_v35  ;;  %v3346_v25 = vld [vmem:[%s5201_s14 + $0xb8] sm:$0xff] }
 0xddb   :  { %3324 = vmatmul.msk.f32.vlgmr.msrb.gmra.mxu0 %vm77_vm0, %v2846_v18  ;;  %v3345_v18 = vld [vmem:[%s5201_s14 + $0xb0] sm:$0xff] }
 0xddc   :  { %3075 = vmatpush.msra.mxu0 %v3346_v25 }
 0xdde   :  { %v2742_v63 = vpop.xlane.xlu0 %2741  ;;  %3076 = vmatpush.msra.mxu0 %v3345_v18 }
 0xddf   :  { %3648 = vrcp.f32 %v2742_v63  ;;  %v3344_v63 = vld [vmem:[%s5201_s14 + $0xa8] sm:$0xff] }
 0xde0   :  { %3077 = vmatpush.msra.mxu0 %v3344_v63 }
 0xde5   :  { %v3649_v57 = vpop.eup %3648 }
 0xde6   :  { %v2744_v16 = vmul.f32 %v3649_v57, %v3643_v21 }
 0xde8   :  { %3316 = vmatmul.msk.f32.vlgmr.msra.gmra.mxu3 %vm77_vm0, %v2744_v16  ;;  %v3343_v16 = vld [vmem:[%s5201_s14 + $0xa0] sm:$0xff] }
 0xde9   :  { %3078 = vmatpush.msra.mxu0 %v3343_v16 }
 0xdf6   :  { %v2681_v50 = vpop.f32.mrf.mxu3 }
 0xdf7   :  { %2889 = vrot.lane.b32.xlu1 %v2681_v50, %s5226_s5 }
 0xe58   :  { %v2885_v52 = vpop.f32.mrf.mxu0 }
 0xe59   :  { %2897 = vrot.lane.b32.xlu1 %v2885_v52, %s5227_s2  ;;  %v3342_v52 = vld [vmem:[%s5201_s14 + $0x98] sm:$0xff] }
 0xe5a   :  { %3079 = vmatpush.msra.mxu0 %v3342_v52 }
 0xe5c   :  { %3080 = vmatpush.msra.mxu0 %v3341_v15 }
 0xe69   :  { %v2890_v27 = vpop.permute.xlu1 %2889 }
 0xe6a   :  { %v2900_v5 = vsel %vm450_vm7, %v5024_v44, %v2890_v27  ;;  %v3340_v27 = vld [vmem:[%s5201_s14 + $0x88] sm:$0xff] }
 0xe6b   :  { %v2783_v14 = vpop.f32.mrf.mxu3  ;;  %3081 = vmatpush.msra.mxu0 %v3340_v27 }
 0xe6c   :  { %2893 = vrot.lane.b32.xlu0 %v2783_v14, %s5228_s25 }
 0xecb   :  { %v2898_v48 = vpop.permute.xlu1 %2897 }
 0xede   :  { %v2894_v24 = vpop.permute.xlu0 %2893 }
 0xedf   :  { %v2901_v59 = vsel %vm1570_vm10, %v2900_v5, %v2894_v24  ;;  %v3339_v5 = vld [vmem:[%s5201_s14 + $0x80] sm:$0xff] }
 0xee0   :  { %v2902_v37 = vsel %vm551_vm9, %v2901_v59, %v2898_v48  ;;  %3082 = vmatpush.msra.mxu0 %v3339_v5 }
 0xee1   :  { %3329 = vmatmul.msk.f32.vlgmr.msrb.gmra.mxu3 %vm157_vm1, %v2902_v37 }
 0xf64   :  { %v2928_v32 = vpop.f32.mrf.mxu3 }
 0xf65   :  { %v2931_v17 = vadd.f32 %v2928_v32, %v4830_v56  ;;  %v3335_v56 = vld [vmem:[%s5199_s12 + $0x30] sm:$0xff] }
 0xf66   :  { %2998 = vmatpush.msra.mxu2 %v3335_v56 }
 0xf67   :  { %v5071_v12 = vadd.f32 %v3466_v40, %v2931_v17 }
 0xf68   :  { %2999 = vmatpush.msra.mxu2 %v3334_v9 }
 0xf69   :  { %v2942_v44 = vsel %vm2445_vm2, %v5071_v12, 0.0 }
 0xf6a   :  { %2943 = vadd.xlane.f32.xlu1 %v2942_v44  ;;  %3000 = vmatpush.msra.mxu2 %v3333_v13 }
 0xfdd   :  { %v2944_v41 = vpop.xlane.xlu1 %2943 }
 0xfde   :  { %v2945_v43 = vmul.f32 %v2944_v41, %v3848_v39 }
 0xfe0   :  { %v2946_v61 = vsub.f32 %v5071_v12, %v2945_v43 }
 0xfe2   :  { %v2947_v55 = vmul.f32 %v2946_v61, %v2946_v61 }
 0xfe4   :  { %v2948_v33 = vsel %vm2445_vm2, %v2947_v55, 0.0 }
 0xfe5   :  { %2949 = vadd.xlane.f32.xlu2 %v2948_v33 }
0x1058   :  { %v2950_v53 = vpop.xlane.xlu2 %2949 }
0x1059   :  { %v2951_v3 = vmul.f32 %v2950_v53, %v3848_v39 }
0x105b   :  { %v2952_v29 = vadd.f32 1e-05, %v2951_v3 }
0x105d   :  { %3650 = vrsqrt.f32 %v2952_v29  ;;  %vm2959_vm7 = vweird.f32 %v2952_v29 }
0x1063   :  { %v3651_v45 = vpop.eup %3650 }
0x1064   :  { %v2954_v21 = vmul.f32 %v3651_v45, %v2952_v29  ;;  %vm2960_vm0 = vweird.f32 %v3651_v45 }
0x1065   :  { %vm2961_vm9 = vmor %vm2959_vm7, %vm2960_vm0 }
0x1066   :  { %v2955_v60 = vmul.f32 %v3651_v45, %v2954_v21 }
0x1068   :  { %v2956_v23 = vmul.f32 0.5, %v2955_v60 }
0x106a   :  { %v2957_v8 = vsub.f32 1.5, %v2956_v23 }
0x106c   :  { %v2958_v20 = vmul.f32 %v3651_v45, %v2957_v8  ;;  %v3470_v8 = vld [vmem:[%s5202_s15 + $0x1] ss:$0 sm:$0xff] }
0x106e   :  { %v2962_v34 = vsel %vm2961_vm9, %v3651_v45, %v2958_v20 }
0x106f   :  { %v2963_v7 = vmul.f32 %v2962_v34, %v2946_v61 }
0x1071   :  { %v2967_v42 = vmul.f32 %v3467_v31, %v2963_v7 }
0x1073   :  { %v2971_v26 = vadd.f32 %v3468_v19, %v2967_v42 }
0x1075   :  { %3338 = vmatmul.msk.f32.vlgmr.msra.gmra.mxu2 %vm157_vm1, %v2971_v26 }
0x10f8   :  { %v3002_v58 = vpop.f32.mrf.mxu2 }
0x10f9   :  { %v5110_v11 = vadd.f32 %v3469_v4, %v3002_v58  ;;  %v3123_v4 = vld [vmem:[%s5206_s18 + $0x18] sm:$0xff] }
0x10fa   :  { %3143 = vmatpush.msra.mxu3 %v3123_v4 }
0x10fb   :  { %v3006_v49 = vmul.f32 0.70710677, %v5110_v11  ;;  %v3005_v21 = vmul.f32 0.5, %v5110_v11 }
0x10fd   :  { %v3009_v46 = vand.u32 2147483647, %v3006_v49  ;;  %vm3007_vm14 = vcmp.ge.f32.partialorder %v3006_v49, 0.0 }
0x10fe   :  { %v3008_v29 = vsel %vm3007_vm14, 1.0, %v3666_v1 }
0x10ff   :  { %v3010_v2 = vmul.f32 0.3275911, %v3009_v46  ;;  %v3036_v40 = vsub.f32 0.0, %v3009_v46 }
0x1101   :  { %v3011_v62 = vadd.f32 1.0, %v3010_v2  ;;  %v3037_v44 = vmul.f32 %v3036_v40, %v3009_v46 }
0x1103   :  { %3652 = vrcp.f32 %v3011_v62  ;;  %v3023_v51 = vand.u32 2147483648, %v3011_v62  ;;  %v3021_v28 = vand.u32 2147483647, %v3011_v62  ;;  %vm3017_vm11 = vweird.f32 %v3011_v62 }
0x1104   :  { %v3038_v61 = vmul.f32 1.442695, %v3037_v44 }
0x1105   :  { %v3024_v48 = vor.u32 1.1754944e-38, %v3023_v51  ;;  %vm3022_vm13 = vcmp.eq.f32.partialorder %v3021_v28, 8.507059e+37 }
0x1106   :  { %3654 = vpow2.f32 %v3038_v61 }
0x1109   :  { %v3653_v57 = vpop.eup %3652 }
0x110a   :  { %v3013_v50 = vmul.f32 %v3653_v57, %v3011_v62  ;;  %vm3018_vm10 = vweird.f32 %v3653_v57  ;;  %v3471_v62 = vld [vmem:[%s5203_s16] ss:$0 sm:$0xff] }
0x110b   :  { %vm3019_vm12 = vmor %vm3017_vm11, %vm3018_vm10 }
0x110c   :  { %v3014_v14 = vsub.f32 1.0, %v3013_v50  ;;  %v3655_v13 = vpop.eup %3654 }
0x110e   :  { %v3015_v10 = vmul.f32 %v3653_v57, %v3014_v14 }
0x1110   :  { %v3016_v24 = vadd.f32 %v3653_v57, %v3015_v10 }
0x1112   :  { %v3020_v59 = vsel %vm3019_vm12, %v3653_v57, %v3016_v24  ;;  %v3473_v57 = vld [vmem:[%s5205_s19] ss:$0 sm:$0xff] }
0x1113   :  { %v3025_v37 = vsel %vm3022_vm13, %v3024_v48, %v3020_v59 }
0x1114   :  { %v3027_v32 = vmul.f32 1.0614054, %v3025_v37 }
0x1116   :  { %v3028_v17 = vadd.f32 -1.4531521, %v3027_v32 }
0x1118   :  { %v3029_v41 = vmul.f32 %v3028_v17, %v3025_v37 }
0x111a   :  { %v3030_v43 = vadd.f32 1.4214138, %v3029_v41 }
0x111c   :  { %v3031_v55 = vmul.f32 %v3030_v43, %v3025_v37 }
0x111e   :  { %v3032_v33 = vadd.f32 -0.28449672, %v3031_v55 }
0x1120   :  { %v3033_v35 = vmul.f32 %v3032_v33, %v3025_v37 }
0x1122   :  { %v3034_v56 = vadd.f32 0.2548296, %v3033_v35 }
0x1124   :  { %v3035_v9 = vmul.f32 %v3034_v56, %v3025_v37 }
0x1126   :  { %v3040_v53 = vmul.f32 %v3655_v13, %v3035_v9 }
0x1128   :  { %v3041_v3 = vsub.f32 1.0, %v3040_v53 }
0x112a   :  { %v3042_v45 = vmul.f32 %v3041_v3, %v3008_v29 }
0x112c   :  { %v3043_v60 = vadd.f32 1.0, %v3042_v45 }
0x112e   :  { %v3044_v23 = vmul.f32 %v3043_v60, %v3005_v21 }
0x1130   :  { %3083 = vmatmul.f32.vlgmr.msra.gmra.mxu0 %v3044_v23 }
0x11ad   :  { %v3084_v20 = vpop.f32.mrf.mxu0 }
0x11ae   :  { %v3085_v31 = vadd.f32 %v3470_v8, %v3084_v20 }
0x11b0   :  { %v3087_v34 = vadd.f32 %v3085_v31, %v5071_v12  ;;  %v3122_v12 = vld [vmem:[%s5206_s18 + $0x10] sm:$0xff] }
0x11b1   :  { %3144 = vmatpush.msra.mxu3 %v3122_v12 }
0x11b2   :  { %v3090_v19 = vsel %vm2445_vm2, %v3087_v34, 0.0 }
0x11b3   :  { %3091 = vadd.xlane.f32.xlu0 %v3090_v19  ;;  %3145 = vmatpush.msra.mxu3 %v3121_v54 }
0x11b5   :  { %3146 = vmatpush.msra.mxu3 %v3120_v30 }
0x1226   :  { %v3092_v7 = vpop.xlane.xlu0 %3091 }
0x1227   :  { %v3093_v1 = vmul.f32 %v3092_v7, %v3848_v39 }
0x1229   :  { %v3094_v42 = vsub.f32 %v3087_v34, %v3093_v1 }
0x122b   :  { %v3095_v26 = vmul.f32 %v3094_v42, %v3094_v42 }
0x122d   :  { %v3096_v47 = vsel %vm2445_vm2, %v3095_v26, 0.0 }
0x122e   :  { %3097 = vadd.xlane.f32.xlu2 %v3096_v47 }
0x12a1   :  { %v3098_v58 = vpop.xlane.xlu2 %3097 }
0x12a2   :  { %v3099_v11 = vmul.f32 %v3098_v58, %v3848_v39  ;;  %v3472_v39 = vld [vmem:[%s5204_s17] ss:$0 sm:$0xff] }
0x12a4   :  { %v3100_v22 = vadd.f32 1e-05, %v3099_v11 }
0x12a6   :  { %3656 = vrsqrt.f32 %v3100_v22  ;;  %vm3107_vm15 = vweird.f32 %v3100_v22 }
0x12ac   :  { %v3657_v49 = vpop.eup %3656 }
0x12ad   :  { %v3102_v36 = vmul.f32 %v3657_v49, %v3100_v22  ;;  %vm3108_vm2 = vweird.f32 %v3657_v49 }
0x12ae   :  { %vm3109_vm3 = vmor %vm3107_vm15, %vm3108_vm2 }
0x12af   :  { %v3103_v46 = vmul.f32 %v3657_v49, %v3102_v36 }
0x12b1   :  { %v3104_v6 = vmul.f32 0.5, %v3103_v46 }
0x12b3   :  { %v3105_v2 = vsub.f32 1.5, %v3104_v6 }
0x12b5   :  { %v3106_v38 = vmul.f32 %v3657_v49, %v3105_v2 }
0x12b7   :  { %v3110_v0 = vsel %vm3109_vm3, %v3657_v49, %v3106_v38 }
0x12b8   :  { %v3111_v25 = vmul.f32 %v3110_v0, %v3094_v42 }
0x12ba   :  { %v3115_v18 = vmul.f32 %v3471_v62, %v3111_v25 }
0x12bc   :  { %v3119_v63 = vadd.f32 %v3472_v39, %v3115_v18 }
0x12be   :  { %3356 = vmatmul.msk.f32.vlgmr.msra.gmra.mxu3 %vm157_vm1, %v3119_v63 }
0x1341   :  { %v3148_v16 = vpop.f32.mrf.mxu3 }
0x1342   :  { %v3149_v50 = vadd.f32 %v3473_v57, %v3148_v16 }
0x1344   :  { %3151 = vst [vmem:[%s5207_s20] sm:$0x3] %v3149_v50 }

</bundles_post_ra>
